<compile_context>
chip_gen: v5e
topology: v5e:2x2
jax: 0.10.0
libtpu: 0.0.40
codegen_flags: <defaults>
</compile_context>

<pallas_src>
import math
from functools import partial

import jax
import jax.numpy as jnp
from jax.experimental import pallas as pl
from jax.experimental.pallas import tpu as pltpu


# Matmul-operand dtype: bf16 operands, f32 accumulation (safe on v5e/v6e/v7x).
MXU_DTYPE = jnp.bfloat16
LN_EPS = 1e-5


# ----------------------------------------------------------------------------
# In-kernel helpers
# ----------------------------------------------------------------------------
def _mm(a, b):
    """MXU matmul: bf16 operands, f32 accumulate."""
    return jnp.dot(a.astype(MXU_DTYPE), b.astype(MXU_DTYPE),
                   preferred_element_type=jnp.float32)


def _mm_nt(a, b):
    """a:(M,K) x b:(N,K) -> (M,N), contracting last dims (no explicit .T)."""
    return jax.lax.dot_general(a.astype(MXU_DTYPE), b.astype(MXU_DTYPE),
                               (((1,), (1,)), ((), ())),
                               preferred_element_type=jnp.float32)


def _ln(x, g, b, eps=LN_EPS):
    mu = jnp.mean(x, axis=-1, keepdims=True)
    xc = x - mu
    var = jnp.mean(xc * xc, axis=-1, keepdims=True)
    return xc * jax.lax.rsqrt(var + eps) * g + b


def _row_tile(m, target=256):
    """Largest power-of-two row tile <= target that divides m (else whole m)."""
    t = target
    while t >= 8:
        if m % t == 0:
            return t
        t //= 2
    return m


# ----------------------------------------------------------------------------
# Kernels
# ----------------------------------------------------------------------------
def _dimred_kernel(x_ref, w1_ref, b1_ref, w2_ref, b2_ref, o_ref):
    # Two fused 1x1 conv + (folded) BN + ReLU stages; hidden stays in VMEM.
    h = jnp.maximum(_mm(x_ref[...], w1_ref[...]) + b1_ref[...], 0.0)
    h = jnp.maximum(_mm(h, w2_ref[...]) + b2_ref[...], 0.0)
    o_ref[...] = h


def _patch_embed_pos_kernel(xp_ref, w_ref, b_ref, pos_ref, o_ref):
    # Patch-embedding linear + bias + positional-embedding add, one batch elem.
    # xp_ref: (1, N, K); w: (K, D); b: (1, D); pos: (N, D); out: (1, N, D)
    o_ref[0] = _mm(xp_ref[0], w_ref[...]) + b_ref[...] + pos_ref[...]


def _temb_kernel(x_ref, w1_ref, b1_ref, w2_ref, b2_ref, o_ref):
    # Timestep embedder: linear -> SiLU -> linear.  One modality per grid step.
    h = _mm(x_ref[...], w1_ref[0]) + b1_ref[0]
    h = h * jax.nn.sigmoid(h)
    o_ref[0] = _mm(h, w2_ref[0]) + b2_ref[0]


def _block_kernel(x_ref, ln1_g, ln1_b, qkv_w, qkv_b, proj_w, proj_b,
                  ln2_g, ln2_b, fc1_w, fc1_b, fc2_w, fc2_b, o_ref,
                  *, num_heads):
    """Fully fused timm-ViT Block for one batch element (S, D)."""
    x = x_ref[0]                       # (S, D)
    S, D = x.shape
    dh = D // num_heads

    # --- attention branch: x = x + proj(attn(ln1(x))) ---
    h = _ln(x, ln1_g[...], ln1_b[...])
    qkv = _mm(h, qkv_w[...]) + qkv_b[...]        # (S, 3D); scale folded into q
    pw = proj_w[...]
    attn = jnp.zeros((S, D), jnp.float32)
    for hd in range(num_heads):
        q = qkv[:, hd * dh:(hd + 1) * dh]
        k = qkv[:, D + hd * dh: D + (hd + 1) * dh]
        v = qkv[:, 2 * D + hd * dh: 2 * D + (hd + 1) * dh]
        s = _mm_nt(q, k)                          # (S, S)
        s = s - jnp.max(s, axis=-1, keepdims=True)
        p = jnp.exp(s)
        p = p * pl.reciprocal(jnp.sum(p, axis=-1, keepdims=True), approx=True)
        oh = _mm(p, v)                            # (S, dh)
        # per-head slice of proj_w: sum over heads == concat(heads) @ proj_w
        attn = attn + _mm(oh, pw[hd * dh:(hd + 1) * dh, :])
    x = x + attn + proj_b[...]

    # --- MLP branch: x = x + fc2(gelu(fc1(ln2(x)))) ---
    h = _ln(x, ln2_g[...], ln2_b[...])
    h = _mm(h, fc1_w[...]) + fc1_b[...]
    # TODO(synk): timm nn.GELU is exact erf; tanh-approx GELU used here.
    h = jax.nn.gelu(h, approximate=True)
    x = x + _mm(h, fc2_w[...]) + fc2_b[...]

    o_ref[0] = x


def _final_kernel(cls_ref, g_ref, b_ref, hw_ref, hb_ref, o_ref, *, B):
    """Final LayerNorm on cls rows + head linear (cat of HSI/LiDAR cls)."""
    c = _ln(cls_ref[...], g_ref[...], b_ref[...])   # (2B, D)
    D = c.shape[1]
    hsi = c[:B, :]
    lid = c[B:, :]
    hw = hw_ref[...]
    o_ref[...] = _mm(hsi, hw[:D, :]) + _mm(lid, hw[D:, :]) + hb_ref[...]


# ----------------------------------------------------------------------------
# pallas_call wrappers
# ----------------------------------------------------------------------------
def pallas_dimred(x, p):
    """x:(M,Cin) -> (M,Chid); two folded conv1x1+BN+ReLU stages, row-tiled."""
    M, Cin = x.shape
    Ch = p["w1"].shape[1]
    tm = _row_tile(M)
    return pl.pallas_call(
        _dimred_kernel,
        out_shape=jax.ShapeDtypeStruct((M, Ch), jnp.float32),
        grid=(M // tm,),
        in_specs=[
            pl.BlockSpec((tm, Cin), lambda i: (i, 0)),
            pl.BlockSpec((Cin, Ch), lambda i: (0, 0)),
            pl.BlockSpec((1, Ch), lambda i: (0, 0)),
            pl.BlockSpec((Ch, Ch), lambda i: (0, 0)),
            pl.BlockSpec((1, Ch), lambda i: (0, 0)),
        ],
        out_specs=pl.BlockSpec((tm, Ch), lambda i: (i, 0)),
        compiler_params=pltpu.CompilerParams(dimension_semantics=("parallel",)),
    )(x, p["w1"], p["b1"].reshape(1, -1), p["w2"], p["b2"].reshape(1, -1))


def pallas_patch_embed_pos(xp, w, b, pos_patches):
    """xp:(B,N,K) -> (B,N,D): patch-embed linear + bias + pos-embed add."""
    B, N, K = xp.shape
    D = w.shape[1]
    return pl.pallas_call(
        _patch_embed_pos_kernel,
        out_shape=jax.ShapeDtypeStruct((B, N, D), jnp.float32),
        grid=(B,),
        in_specs=[
            pl.BlockSpec((1, N, K), lambda i: (i, 0, 0)),
            pl.BlockSpec((K, D), lambda i: (0, 0)),
            pl.BlockSpec((1, D), lambda i: (0, 0)),
            pl.BlockSpec((N, D), lambda i: (0, 0)),
        ],
        out_specs=pl.BlockSpec((1, N, D), lambda i: (i, 0, 0)),
        compiler_params=pltpu.CompilerParams(dimension_semantics=("parallel",)),
    )(xp, w, b.reshape(1, D), pos_patches)


def pallas_temb_both(t_freq, p_h, p_l):
    """Both timestep MLPs (HSI + LiDAR) in one call, gridded over modality."""
    M, K = t_freq.shape
    D = p_h["w1"].shape[1]
    w1s = jnp.stack([p_h["w1"], p_l["w1"]])                   # (2, K, D)
    b1s = jnp.stack([p_h["b1"], p_l["b1"]]).reshape(2, 1, D)
    w2s = jnp.stack([p_h["w2"], p_l["w2"]])                   # (2, D, D)
    b2s = jnp.stack([p_h["b2"], p_l["b2"]]).reshape(2, 1, D)
    out = pl.pallas_call(
        _temb_kernel,
        out_shape=jax.ShapeDtypeStruct((2, M, D), jnp.float32),
        grid=(2,),
        in_specs=[
            pl.BlockSpec((M, K), lambda m: (0, 0)),
            pl.BlockSpec((1, K, D), lambda m: (m, 0, 0)),
            pl.BlockSpec((1, 1, D), lambda m: (m, 0, 0)),
            pl.BlockSpec((1, D, D), lambda m: (m, 0, 0)),
            pl.BlockSpec((1, 1, D), lambda m: (m, 0, 0)),
        ],
        out_specs=pl.BlockSpec((1, M, D), lambda m: (m, 0, 0)),
        compiler_params=pltpu.CompilerParams(dimension_semantics=("parallel",)),
    )(t_freq, w1s, b1s, w2s, b2s)
    return out[0], out[1]


def pallas_block(x, p, num_heads):
    """Fused ViT block over (Bt, S, D), grid over batch (megacore-parallel)."""
    Bt, S, D = x.shape
    H4 = p["fc1_w"].shape[1]

    def full(shape):
        return pl.BlockSpec(shape, lambda b: (0, 0))

    def r2(a):
        return a.reshape(1, -1)

    # NOTE: for realistic (D>=1024, S~200) sizes set
    # pltpu.CompilerParams(vmem_limit_bytes=...) explicitly and re-budget
    # against 64 MiB physical VMEM on v7x (vs 128 MiB on v5e/v6e).
    return pl.pallas_call(
        partial(_block_kernel, num_heads=num_heads),
        out_shape=jax.ShapeDtypeStruct((Bt, S, D), jnp.float32),
        grid=(Bt,),
        in_specs=[
            pl.BlockSpec((1, S, D), lambda b: (b, 0, 0)),
            full((1, D)), full((1, D)),
            full((D, 3 * D)), full((1, 3 * D)),
            full((D, D)), full((1, D)),
            full((1, D)), full((1, D)),
            full((D, H4)), full((1, H4)),
            full((H4, D)), full((1, D)),
        ],
        out_specs=pl.BlockSpec((1, S, D), lambda b: (b, 0, 0)),
        input_output_aliases={0: 0},   # residual stream updated in place
        compiler_params=pltpu.CompilerParams(dimension_semantics=("parallel",)),
    )(x,
      r2(p["ln1_g"]), r2(p["ln1_b"]),
      p["qkv_w"], r2(p["qkv_b"]),
      p["proj_w"], r2(p["proj_b"]),
      r2(p["ln2_g"]), r2(p["ln2_b"]),
      p["fc1_w"], r2(p["fc1_b"]),
      p["fc2_w"], r2(p["fc2_b"]))


def pallas_final(cls_all, norm_g, norm_b, head_w, head_b, B):
    """Final norm on the 2B cls rows + head linear -> (B, D)."""
    M2, D = cls_all.shape
    N = head_w.shape[1]
    return pl.pallas_call(
        partial(_final_kernel, B=B),
        out_shape=jax.ShapeDtypeStruct((B, N), jnp.float32),
        grid=(1,),
        in_specs=[
            pl.BlockSpec((M2, D), lambda i: (0, 0)),
            pl.BlockSpec((1, D), lambda i: (0, 0)),
            pl.BlockSpec((1, D), lambda i: (0, 0)),
            pl.BlockSpec((2 * D, N), lambda i: (0, 0)),
            pl.BlockSpec((1, N), lambda i: (0, 0)),
        ],
        out_specs=pl.BlockSpec((B, N), lambda i: (0, 0)),
    )(cls_all, norm_g.reshape(1, D), norm_b.reshape(1, D),
      head_w, head_b.reshape(1, N))


# ----------------------------------------------------------------------------
# Model glue
# ----------------------------------------------------------------------------
def fold_conv_bn(w, b, gamma, beta, eps=1e-5):
    # BatchNorm2d eval mode with running_mean=0, running_var=1.
    scale = gamma / jnp.sqrt(1.0 + eps)
    return w * scale[None, :], b * scale + beta


def dimen_redu_apply(x_nchw, p):
    B, C, H, W = x_nchw.shape
    x = x_nchw.transpose(0, 2, 3, 1).reshape(B * H * W, C)
    y = pallas_dimred(x, p)
    Ch = p["w2"].shape[1]
    return y.reshape(B, H, W, Ch)          # NHWC


def patchify(x_nhwc, patch):
    # Conv2d(kernel=stride=patch) == per-patch matmul; feature order (C, ph, pw).
    B, H, W, C = x_nhwc.shape
    gh, gw = H // patch, W // patch
    x = x_nhwc.reshape(B, gh, patch, gw, patch, C)
    x = x.transpose(0, 1, 3, 5, 2, 4).reshape(B, gh * gw, C * patch * patch)
    return x


def timestep_embedding(t, dim, max_period=10000.0):
    half = dim // 2
    freqs = jnp.exp(-math.log(max_period) * jnp.arange(half, dtype=jnp.float32) / half)
    args = t[:, None].astype(jnp.float32) * freqs[None, :]
    return jnp.concatenate([jnp.cos(args), jnp.sin(args)], axis=-1)


def embed_modality(x_nchw, dr_p, pe_w, pe_b, pos_embed, cls_token, t_tok, patch):
    B = x_nchw.shape[0]
    D = pe_w.shape[1]
    xf = dimen_redu_apply(x_nchw, dr_p)                               # (B,H,W,Ch)
    xp = patchify(xf, patch)                                          # (B,N,K)
    y = pallas_patch_embed_pos(xp, pe_w, pe_b, pos_embed[0, 1:, :])   # (B,N,D)
    cls = cls_token + pos_embed[:, :1, :]                             # (1,1,D)
    cls = jnp.broadcast_to(cls, (B, 1, D)) + t_tok[:, None, :]
    return jnp.concatenate([cls, y], axis=1)                          # (B,S,D)


def forward(params, x, x_lidar, t, cfg):
    B = x.shape[0]
    patch = cfg["patch_size"]

    # timestep embeddings for both modalities (one fused kernel)
    t_freq = timestep_embedding(t, cfg["freq_dim"])
    t_tok, t_tok_L = pallas_temb_both(t_freq, params["temb"], params["temb_L"])

    # dimen_redu -> patch embed (+pos) -> cls/time token, per modality
    xh = embed_modality(x, params["dr"], params["pe_w"], params["pe_b"],
                        params["pos_embed"], params["cls_token"], t_tok, patch)
    xl = embed_modality(x_lidar, params["dr_L"], params["pe_w_L"], params["pe_b_L"],
                        params["pos_embed_L"], params["cls_token_L"], t_tok_L, patch)

    # both modalities go through the SAME shared blocks -> batch them together
    xx = jnp.concatenate([xh, xl], axis=0)                            # (2B,S,D)
    for bp in params["blocks"]:
        xx = pallas_block(xx, bp, cfg["num_heads"])

    # norm(x)[:,0] == norm(x[:,0]) (LayerNorm is row-wise): only norm cls rows,
    # fused with the head linear.  Rows [0:B] = HSI outcome, [B:2B] = LiDAR.
    cls_all = xx[:, 0, :]                                             # (2B,D)
    return pallas_final(cls_all, params["norm_g"], params["norm_b"],
                        params["head_w"], params["head_b"], B)        # (B,D)


# ----------------------------------------------------------------------------
# Deterministic parameter initialization (with BN + attn-scale folding)
# ----------------------------------------------------------------------------
def _normal(key, shape, std=0.02):
    return std * jax.random.normal(key, shape, jnp.float32)


def init_dimen_redu(key, c_in, c_hid):
    k = jax.random.split(key, 8)
    w1, b1 = _normal(k[0], (c_in, c_hid), 0.1), _normal(k[1], (c_hid,))
    g1, be1 = 1.0 + _normal(k[2], (c_hid,), 0.05), _normal(k[3], (c_hid,))
    w2, b2 = _normal(k[4], (c_hid, c_hid), 0.1), _normal(k[5], (c_hid,))
    g2, be2 = 1.0 + _normal(k[6], (c_hid,), 0.05), _normal(k[7], (c_hid,))
    fw1, fb1 = fold_conv_bn(w1, b1, g1, be1)
    fw2, fb2 = fold_conv_bn(w2, b2, g2, be2)
    return {"w1": fw1, "b1": fb1, "w2": fw2, "b2": fb2}


def init_block(key, D, hidden, num_heads):
    k = jax.random.split(key, 4)
    qkv_w = _normal(k[0], (D, 3 * D))
    qkv_b = jnp.zeros((3 * D,), jnp.float32)
    # fold the attention scale dh**-0.5 into the q columns (weight AND bias)
    scale = (D // num_heads) ** -0.5
    qkv_w = qkv_w.at[:, :D].multiply(scale)
    qkv_b = qkv_b.at[:D].multiply(scale)
    return {
        "ln1_g": jnp.ones((D,), jnp.float32), "ln1_b": jnp.zeros((D,), jnp.float32),
        "qkv_w": qkv_w, "qkv_b": qkv_b,
        "proj_w": _normal(k[1], (D, D)), "proj_b": jnp.zeros((D,), jnp.float32),
        "ln2_g": jnp.ones((D,), jnp.float32), "ln2_b": jnp.zeros((D,), jnp.float32),
        "fc1_w": _normal(k[2], (D, hidden)), "fc1_b": jnp.zeros((hidden,), jnp.float32),
        "fc2_w": _normal(k[3], (hidden, D)), "fc2_b": jnp.zeros((D,), jnp.float32),
    }


def init_params(key, cfg):
    D = cfg["embed_dim"]
    patch = cfg["patch_size"]
    n_patches = (cfg["img_size"] // patch) ** 2
    hidden = int(cfg["mlp_ratio"] * D)
    keys = jax.random.split(key, 32)
    p = {}
    p["dr"] = init_dimen_redu(keys[0], cfg["in_chans"], cfg["hid_chans"])
    p["dr_L"] = init_dimen_redu(keys[1], cfg["in_chans_LIDAR"], cfg["hid_chans_LIDAR"])
    p["pe_w"] = _normal(keys[2], (cfg["hid_chans"] * patch * patch, D))
    p["pe_b"] = jnp.zeros((D,), jnp.float32)
    p["pe_w_L"] = _normal(keys[3], (cfg["hid_chans_LIDAR"] * patch * patch, D))
    p["pe_b_L"] = jnp.zeros((D,), jnp.float32)
    p["pos_embed"] = _normal(keys[4], (1, n_patches + 1, D))
    p["pos_embed_L"] = _normal(keys[5], (1, n_patches + 1, D))
    p["cls_token"] = _normal(keys[6], (1, 1, D))
    p["cls_token_L"] = _normal(keys[7], (1, 1, D))
    p["temb"] = {"w1": _normal(keys[8], (cfg["freq_dim"], D)), "b1": jnp.zeros((D,), jnp.float32),
                 "w2": _normal(keys[9], (D, D)), "b2": jnp.zeros((D,), jnp.float32)}
    p["temb_L"] = {"w1": _normal(keys[10], (cfg["freq_dim"], D)), "b1": jnp.zeros((D,), jnp.float32),
                   "w2": _normal(keys[11], (D, D)), "b2": jnp.zeros((D,), jnp.float32)}
    p["blocks"] = [init_block(keys[12 + i], D, hidden, cfg["num_heads"])
                   for i in range(cfg["depth"])]
    p["norm_g"] = jnp.ones((D,), jnp.float32)
    p["norm_b"] = jnp.zeros((D,), jnp.float32)
    p["head_w"] = _normal(keys[20], (2 * D, D))
    p["head_b"] = jnp.zeros((D,), jnp.float32)
    return p


# ----------------------------------------------------------------------------
if __name__ == "__main__":
    cfg = dict(
        img_size=16, patch_size=8,
        in_chans=4, in_chans_LIDAR=1,
        hid_chans=8, hid_chans_LIDAR=8,
        embed_dim=32, depth=2, num_heads=4, mlp_ratio=4.0,
        freq_dim=64,
    )

    root = jax.random.PRNGKey(0)
    k_p, k_x, k_l, k_t = jax.random.split(root, 4)
    params = init_params(k_p, cfg)

    B = 2
    x = jax.random.normal(k_x, (B, cfg["in_chans"], cfg["img_size"], cfg["img_size"]), jnp.float32)
    x_lidar = jax.random.normal(k_l, (B, cfg["in_chans_LIDAR"], cfg["img_size"], cfg["img_size"]), jnp.float32)
    t = jax.random.uniform(k_t, (B,), jnp.float32) * 100.0

    fwd = jax.jit(partial(forward, cfg=cfg))
    out = fwd(params, x, x_lidar, t)
    out = jax.block_until_ready(out)
    assert out.shape == (B, cfg["embed_dim"]), out.shape
    assert jnp.all(jnp.isfinite(out))
    print("KERNEL_OK")
</pallas_src>

<mosaic_0001>
module attributes {stable_mosaic.version = 11 : i64} {
  func.func @_temb_kernel(%arg0: i32, %arg1: memref<2x64xf32, #tpu.memory_space<vmem>>, %arg2: memref<1x64x32xf32, #tpu.memory_space<vmem>>, %arg3: memref<1x1x32xf32, #tpu.memory_space<vmem>>, %arg4: memref<1x32x32xf32, #tpu.memory_space<vmem>>, %arg5: memref<1x1x32xf32, #tpu.memory_space<vmem>>, %arg6: memref<1x2x32xf32, #tpu.memory_space<vmem>>) attributes {dimension_semantics = [#tpu.dimension_semantics<parallel>], iteration_bounds = array<i64: 2>, scalar_prefetch = 0 : i64, scratch_operands = 0 : i64, tpu.core_type = #tpu.core_type<tc>, window_params = [{pipeline_mode = #tpu.pipeline_mode<synchronous>, transform_indices = @transform_0, window_bounds = array<i64: 2, 64>}, {transform_indices = @transform_1, window_bounds = array<i64: 1, 64, 32>}, {transform_indices = @transform_2, window_bounds = array<i64: 1, 1, 32>}, {transform_indices = @transform_3, window_bounds = array<i64: 1, 32, 32>}, {transform_indices = @transform_4, window_bounds = array<i64: 1, 1, 32>}, {transform_indices = @transform_5, window_bounds = array<i64: 1, 2, 32>}]} {
    %c0 = arith.constant 0 : index
    %c0_0 = arith.constant 0 : index
    %0 = vector.load %arg1[%c0, %c0_0] : memref<2x64xf32, #tpu.memory_space<vmem>>, vector<2x64xf32>
    %c0_1 = arith.constant 0 : index
    %c0_2 = arith.constant 0 : index
    %c0_3 = arith.constant 0 : index
    %1 = vector.load %arg2[%c0_1, %c0_2, %c0_3] : memref<1x64x32xf32, #tpu.memory_space<vmem>>, vector<1x64x32xf32>
    %2 = vector.shape_cast %1 : vector<1x64x32xf32> to vector<64x32xf32>
    %3 = arith.truncf %0 : vector<2x64xf32> to vector<2x64xbf16>
    %4 = arith.truncf %2 : vector<64x32xf32> to vector<64x32xbf16>
    %cst = arith.constant dense<0.000000e+00> : vector<2x32xf32>
    %5 = tpu.matmul %3, %4, %cst {dimension_numbers = #tpu.dot_dimension_numbers<[1], [0], [0], [1], [0, 0, 1, 1], [], []>} : vector<2x64xbf16>, vector<64x32xbf16>, vector<2x32xf32> -> vector<2x32xf32>
    %c0_4 = arith.constant 0 : index
    %c0_5 = arith.constant 0 : index
    %c0_6 = arith.constant 0 : index
    %6 = vector.load %arg3[%c0_4, %c0_5, %c0_6] : memref<1x1x32xf32, #tpu.memory_space<vmem>>, vector<1x1x32xf32>
    %7 = vector.shape_cast %6 : vector<1x1x32xf32> to vector<1x32xf32>
    %8 = vector.broadcast %7 : vector<1x32xf32> to vector<2x32xf32>
    %9 = arith.addf %5, %8 : vector<2x32xf32>
    %10 = arith.negf %9 : vector<2x32xf32>
    %11 = math.exp %10 : vector<2x32xf32>
    %cst_7 = arith.constant 1.000000e+00 : f32
    %12 = vector.broadcast %cst_7 : f32 to vector<2x32xf32>
    %13 = arith.addf %12, %11 : vector<2x32xf32>
    %14 = arith.divf %12, %13 : vector<2x32xf32>
    %15 = arith.mulf %9, %14 : vector<2x32xf32>
    %c0_8 = arith.constant 0 : index
    %c0_9 = arith.constant 0 : index
    %c0_10 = arith.constant 0 : index
    %16 = vector.load %arg4[%c0_8, %c0_9, %c0_10] : memref<1x32x32xf32, #tpu.memory_space<vmem>>, vector<1x32x32xf32>
    %17 = vector.shape_cast %16 : vector<1x32x32xf32> to vector<32x32xf32>
    %18 = arith.truncf %15 : vector<2x32xf32> to vector<2x32xbf16>
    %19 = arith.truncf %17 : vector<32x32xf32> to vector<32x32xbf16>
    %cst_11 = arith.constant dense<0.000000e+00> : vector<2x32xf32>
    %20 = tpu.matmul %18, %19, %cst_11 {dimension_numbers = #tpu.dot_dimension_numbers<[1], [0], [0], [1], [0, 0, 1, 1], [], []>} : vector<2x32xbf16>, vector<32x32xbf16>, vector<2x32xf32> -> vector<2x32xf32>
    %c0_12 = arith.constant 0 : index
    %c0_13 = arith.constant 0 : index
    %c0_14 = arith.constant 0 : index
    %21 = vector.load %arg5[%c0_12, %c0_13, %c0_14] : memref<1x1x32xf32, #tpu.memory_space<vmem>>, vector<1x1x32xf32>
    %22 = vector.shape_cast %21 : vector<1x1x32xf32> to vector<1x32xf32>
    %23 = vector.broadcast %22 : vector<1x32xf32> to vector<2x32xf32>
    %24 = arith.addf %20, %23 : vector<2x32xf32>
    %c0_15 = arith.constant 0 : index
    %c0_16 = arith.constant 0 : index
    %c0_17 = arith.constant 0 : index
    %25 = vector.load %arg6[%c0_15, %c0_16, %c0_17] : memref<1x2x32xf32, #tpu.memory_space<vmem>>, vector<1x2x32xf32>
    %26 = vector.shape_cast %25 : vector<1x2x32xf32> to vector<2x32xf32>
    %27 = vector.shape_cast %24 : vector<2x32xf32> to vector<1x2x32xf32>
    tpu.vector_store %arg6[%c0_15, %c0_16, %c0_17], %27 {strides = array<i32>} : memref<1x2x32xf32, #tpu.memory_space<vmem>>, vector<1x2x32xf32>,
    return
  }
  func.func @transform_0(%arg0: i32) -> (i32, i32) {
    %c0_i32 = arith.constant 0 : i32
    %c0_i32_0 = arith.constant 0 : i32
    %c0_i32_1 = arith.constant 0 : i32
    return %c0_i32, %c0_i32_0 : i32, i32
  }
  func.func @transform_1(%arg0: i32) -> (i32, i32, i32) {
    %c0_i32 = arith.constant 0 : i32
    %c0_i32_0 = arith.constant 0 : i32
    %c0_i32_1 = arith.constant 0 : i32
    return %arg0, %c0_i32, %c0_i32_0 : i32, i32, i32
  }
  func.func @transform_2(%arg0: i32) -> (i32, i32, i32) {
    %c0_i32 = arith.constant 0 : i32
    %c0_i32_0 = arith.constant 0 : i32
    %c0_i32_1 = arith.constant 0 : i32
    return %arg0, %c0_i32, %c0_i32_0 : i32, i32, i32
  }
  func.func @transform_3(%arg0: i32) -> (i32, i32, i32) {
    %c0_i32 = arith.constant 0 : i32
    %c0_i32_0 = arith.constant 0 : i32
    %c0_i32_1 = arith.constant 0 : i32
    return %arg0, %c0_i32, %c0_i32_0 : i32, i32, i32
  }
  func.func @transform_4(%arg0: i32) -> (i32, i32, i32) {
    %c0_i32 = arith.constant 0 : i32
    %c0_i32_0 = arith.constant 0 : i32
    %c0_i32_1 = arith.constant 0 : i32
    return %arg0, %c0_i32, %c0_i32_0 : i32, i32, i32
  }
  func.func @transform_5(%arg0: i32) -> (i32, i32, i32) {
    %c0_i32 = arith.constant 0 : i32
    %c0_i32_0 = arith.constant 0 : i32
    %c0_i32_1 = arith.constant 0 : i32
    return %arg0, %c0_i32, %c0_i32_0 : i32, i32, i32
  }
}

module attributes {stable_mosaic.version = 11 : i64} {
  func.func @_dimred_kernel(%arg0: i32, %arg1: memref<256x4xf32, #tpu.memory_space<vmem>>, %arg2: memref<4x8xf32, #tpu.memory_space<vmem>>, %arg3: memref<1x8xf32, #tpu.memory_space<vmem>>, %arg4: memref<8x8xf32, #tpu.memory_space<vmem>>, %arg5: memref<1x8xf32, #tpu.memory_space<vmem>>, %arg6: memref<256x8xf32, #tpu.memory_space<vmem>>) attributes {dimension_semantics = [#tpu.dimension_semantics<parallel>], iteration_bounds = array<i64: 2>, scalar_prefetch = 0 : i64, scratch_operands = 0 : i64, tpu.core_type = #tpu.core_type<tc>, window_params = [{transform_indices = @transform_0, window_bounds = array<i64: 256, 4>}, {pipeline_mode = #tpu.pipeline_mode<synchronous>, transform_indices = @transform_1, window_bounds = array<i64: 4, 8>}, {pipeline_mode = #tpu.pipeline_mode<synchronous>, transform_indices = @transform_2, window_bounds = array<i64: 1, 8>}, {pipeline_mode = #tpu.pipeline_mode<synchronous>, transform_indices = @transform_3, window_bounds = array<i64: 8, 8>}, {pipeline_mode = #tpu.pipeline_mode<synchronous>, transform_indices = @transform_4, window_bounds = array<i64: 1, 8>}, {transform_indices = @transform_5, window_bounds = array<i64: 256, 8>}]} {
    %c0 = arith.constant 0 : index
    %c0_0 = arith.constant 0 : index
    %0 = vector.load %arg1[%c0, %c0_0] : memref<256x4xf32, #tpu.memory_space<vmem>>, vector<256x4xf32>
    %c0_1 = arith.constant 0 : index
    %c0_2 = arith.constant 0 : index
    %1 = vector.load %arg2[%c0_1, %c0_2] : memref<4x8xf32, #tpu.memory_space<vmem>>, vector<4x8xf32>
    %2 = arith.truncf %0 : vector<256x4xf32> to vector<256x4xbf16>
    %3 = arith.truncf %1 : vector<4x8xf32> to vector<4x8xbf16>
    %cst = arith.constant dense<0.000000e+00> : vector<256x8xf32>
    %4 = tpu.matmul %2, %3, %cst {dimension_numbers = #tpu.dot_dimension_numbers<[1], [0], [0], [1], [0, 0, 1, 1], [], []>} : vector<256x4xbf16>, vector<4x8xbf16>, vector<256x8xf32> -> vector<256x8xf32>
    %c0_3 = arith.constant 0 : index
    %c0_4 = arith.constant 0 : index
    %5 = vector.load %arg3[%c0_3, %c0_4] : memref<1x8xf32, #tpu.memory_space<vmem>>, vector<1x8xf32>
    %6 = vector.broadcast %5 : vector<1x8xf32> to vector<256x8xf32>
    %7 = arith.addf %4, %6 : vector<256x8xf32>
    %cst_5 = arith.constant 0.000000e+00 : f32
    %8 = vector.broadcast %cst_5 : f32 to vector<256x8xf32>
    %9 = arith.maximumf %7, %8 : vector<256x8xf32>
    %c0_6 = arith.constant 0 : index
    %c0_7 = arith.constant 0 : index
    %10 = vector.load %arg4[%c0_6, %c0_7] : memref<8x8xf32, #tpu.memory_space<vmem>>, vector<8x8xf32>
    %11 = arith.truncf %9 : vector<256x8xf32> to vector<256x8xbf16>
    %12 = arith.truncf %10 : vector<8x8xf32> to vector<8x8xbf16>
    %cst_8 = arith.constant dense<0.000000e+00> : vector<256x8xf32>
    %13 = tpu.matmul %11, %12, %cst_8 {dimension_numbers = #tpu.dot_dimension_numbers<[1], [0], [0], [1], [0, 0, 1, 1], [], []>} : vector<256x8xbf16>, vector<8x8xbf16>, vector<256x8xf32> -> vector<256x8xf32>
    %c0_9 = arith.constant 0 : index
    %c0_10 = arith.constant 0 : index
    %14 = vector.load %arg5[%c0_9, %c0_10] : memref<1x8xf32, #tpu.memory_space<vmem>>, vector<1x8xf32>
    %15 = vector.broadcast %14 : vector<1x8xf32> to vector<256x8xf32>
    %16 = arith.addf %13, %15 : vector<256x8xf32>
    %cst_11 = arith.constant 0.000000e+00 : f32
    %17 = vector.broadcast %cst_11 : f32 to vector<256x8xf32>
    %18 = arith.maximumf %16, %17 : vector<256x8xf32>
    %c0_12 = arith.constant 0 : index
    %c0_13 = arith.constant 0 : index
    %19 = vector.load %arg6[%c0_12, %c0_13] : memref<256x8xf32, #tpu.memory_space<vmem>>, vector<256x8xf32>
    tpu.vector_store %arg6[%c0_12, %c0_13], %18 {strides = array<i32>} : memref<256x8xf32, #tpu.memory_space<vmem>>, vector<256x8xf32>,
    return
  }
  func.func @transform_0(%arg0: i32) -> (i32, i32) {
    %c0_i32 = arith.constant 0 : i32
    %c0_i32_0 = arith.constant 0 : i32
    return %arg0, %c0_i32 : i32, i32
  }
  func.func @transform_1(%arg0: i32) -> (i32, i32) {
    %c0_i32 = arith.constant 0 : i32
    %c0_i32_0 = arith.constant 0 : i32
    %c0_i32_1 = arith.constant 0 : i32
    return %c0_i32, %c0_i32_0 : i32, i32
  }
  func.func @transform_2(%arg0: i32) -> (i32, i32) {
    %c0_i32 = arith.constant 0 : i32
    %c0_i32_0 = arith.constant 0 : i32
    %c0_i32_1 = arith.constant 0 : i32
    return %c0_i32, %c0_i32_0 : i32, i32
  }
  func.func @transform_3(%arg0: i32) -> (i32, i32) {
    %c0_i32 = arith.constant 0 : i32
    %c0_i32_0 = arith.constant 0 : i32
    %c0_i32_1 = arith.constant 0 : i32
    return %c0_i32, %c0_i32_0 : i32, i32
  }
  func.func @transform_4(%arg0: i32) -> (i32, i32) {
    %c0_i32 = arith.constant 0 : i32
    %c0_i32_0 = arith.constant 0 : i32
    %c0_i32_1 = arith.constant 0 : i32
    return %c0_i32, %c0_i32_0 : i32, i32
  }
  func.func @transform_5(%arg0: i32) -> (i32, i32) {
    %c0_i32 = arith.constant 0 : i32
    %c0_i32_0 = arith.constant 0 : i32
    return %arg0, %c0_i32 : i32, i32
  }
}

module attributes {stable_mosaic.version = 11 : i64} {
  func.func @_patch_embed_pos_kernel(%arg0: i32, %arg1: memref<1x4x512xf32, #tpu.memory_space<vmem>>, %arg2: memref<512x32xf32, #tpu.memory_space<vmem>>, %arg3: memref<1x32xf32, #tpu.memory_space<vmem>>, %arg4: memref<4x32xf32, #tpu.memory_space<vmem>>, %arg5: memref<1x4x32xf32, #tpu.memory_space<vmem>>) attributes {dimension_semantics = [#tpu.dimension_semantics<parallel>], iteration_bounds = array<i64: 2>, scalar_prefetch = 0 : i64, scratch_operands = 0 : i64, tpu.core_type = #tpu.core_type<tc>, window_params = [{transform_indices = @transform_0, window_bounds = array<i64: 1, 4, 512>}, {pipeline_mode = #tpu.pipeline_mode<synchronous>, transform_indices = @transform_1, window_bounds = array<i64: 512, 32>}, {pipeline_mode = #tpu.pipeline_mode<synchronous>, transform_indices = @transform_2, window_bounds = array<i64: 1, 32>}, {pipeline_mode = #tpu.pipeline_mode<synchronous>, transform_indices = @transform_3, window_bounds = array<i64: 4, 32>}, {transform_indices = @transform_4, window_bounds = array<i64: 1, 4, 32>}]} {
    %c0 = arith.constant 0 : index
    %c0_0 = arith.constant 0 : index
    %c0_1 = arith.constant 0 : index
    %0 = vector.load %arg1[%c0, %c0_0, %c0_1] : memref<1x4x512xf32, #tpu.memory_space<vmem>>, vector<1x4x512xf32>
    %1 = vector.shape_cast %0 : vector<1x4x512xf32> to vector<4x512xf32>
    %c0_2 = arith.constant 0 : index
    %c0_3 = arith.constant 0 : index
    %2 = vector.load %arg2[%c0_2, %c0_3] : memref<512x32xf32, #tpu.memory_space<vmem>>, vector<512x32xf32>
    %3 = arith.truncf %1 : vector<4x512xf32> to vector<4x512xbf16>
    %4 = arith.truncf %2 : vector<512x32xf32> to vector<512x32xbf16>
    %cst = arith.constant dense<0.000000e+00> : vector<4x32xf32>
    %5 = tpu.matmul %3, %4, %cst {dimension_numbers = #tpu.dot_dimension_numbers<[1], [0], [0], [1], [0, 0, 1, 1], [], []>} : vector<4x512xbf16>, vector<512x32xbf16>, vector<4x32xf32> -> vector<4x32xf32>
    %c0_4 = arith.constant 0 : index
    %c0_5 = arith.constant 0 : index
    %6 = vector.load %arg3[%c0_4, %c0_5] : memref<1x32xf32, #tpu.memory_space<vmem>>, vector<1x32xf32>
    %7 = vector.broadcast %6 : vector<1x32xf32> to vector<4x32xf32>
    %8 = arith.addf %5, %7 : vector<4x32xf32>
    %c0_6 = arith.constant 0 : index
    %c0_7 = arith.constant 0 : index
    %9 = vector.load %arg4[%c0_6, %c0_7] : memref<4x32xf32, #tpu.memory_space<vmem>>, vector<4x32xf32>
    %10 = arith.addf %8, %9 : vector<4x32xf32>
    %c0_8 = arith.constant 0 : index
    %c0_9 = arith.constant 0 : index
    %c0_10 = arith.constant 0 : index
    %11 = vector.load %arg5[%c0_8, %c0_9, %c0_10] : memref<1x4x32xf32, #tpu.memory_space<vmem>>, vector<1x4x32xf32>
    %12 = vector.shape_cast %11 : vector<1x4x32xf32> to vector<4x32xf32>
    %13 = vector.shape_cast %10 : vector<4x32xf32> to vector<1x4x32xf32>
    tpu.vector_store %arg5[%c0_8, %c0_9, %c0_10], %13 {strides = array<i32>} : memref<1x4x32xf32, #tpu.memory_space<vmem>>, vector<1x4x32xf32>,
    return
  }
  func.func @transform_0(%arg0: i32) -> (i32, i32, i32) {
    %c0_i32 = arith.constant 0 : i32
    %c0_i32_0 = arith.constant 0 : i32
    %c0_i32_1 = arith.constant 0 : i32
    return %arg0, %c0_i32, %c0_i32_0 : i32, i32, i32
  }
  func.func @transform_1(%arg0: i32) -> (i32, i32) {
    %c0_i32 = arith.constant 0 : i32
    %c0_i32_0 = arith.constant 0 : i32
    %c0_i32_1 = arith.constant 0 : i32
    return %c0_i32, %c0_i32_0 : i32, i32
  }
  func.func @transform_2(%arg0: i32) -> (i32, i32) {
    %c0_i32 = arith.constant 0 : i32
    %c0_i32_0 = arith.constant 0 : i32
    %c0_i32_1 = arith.constant 0 : i32
    return %c0_i32, %c0_i32_0 : i32, i32
  }
  func.func @transform_3(%arg0: i32) -> (i32, i32) {
    %c0_i32 = arith.constant 0 : i32
    %c0_i32_0 = arith.constant 0 : i32
    %c0_i32_1 = arith.constant 0 : i32
    return %c0_i32, %c0_i32_0 : i32, i32
  }
  func.func @transform_4(%arg0: i32) -> (i32, i32, i32) {
    %c0_i32 = arith.constant 0 : i32
    %c0_i32_0 = arith.constant 0 : i32
    %c0_i32_1 = arith.constant 0 : i32
    return %arg0, %c0_i32, %c0_i32_0 : i32, i32, i32
  }
}

module attributes {stable_mosaic.version = 11 : i64} {
  func.func @_dimred_kernel(%arg0: i32, %arg1: memref<256x1xf32, #tpu.memory_space<vmem>>, %arg2: memref<1x8xf32, #tpu.memory_space<vmem>>, %arg3: memref<1x8xf32, #tpu.memory_space<vmem>>, %arg4: memref<8x8xf32, #tpu.memory_space<vmem>>, %arg5: memref<1x8xf32, #tpu.memory_space<vmem>>, %arg6: memref<256x8xf32, #tpu.memory_space<vmem>>) attributes {dimension_semantics = [#tpu.dimension_semantics<parallel>], iteration_bounds = array<i64: 2>, scalar_prefetch = 0 : i64, scratch_operands = 0 : i64, tpu.core_type = #tpu.core_type<tc>, window_params = [{transform_indices = @transform_0, window_bounds = array<i64: 256, 1>}, {pipeline_mode = #tpu.pipeline_mode<synchronous>, transform_indices = @transform_1, window_bounds = array<i64: 1, 8>}, {pipeline_mode = #tpu.pipeline_mode<synchronous>, transform_indices = @transform_2, window_bounds = array<i64: 1, 8>}, {pipeline_mode = #tpu.pipeline_mode<synchronous>, transform_indices = @transform_3, window_bounds = array<i64: 8, 8>}, {pipeline_mode = #tpu.pipeline_mode<synchronous>, transform_indices = @transform_4, window_bounds = array<i64: 1, 8>}, {transform_indices = @transform_5, window_bounds = array<i64: 256, 8>}]} {
    %c0 = arith.constant 0 : index
    %c0_0 = arith.constant 0 : index
    %0 = vector.load %arg1[%c0, %c0_0] : memref<256x1xf32, #tpu.memory_space<vmem>>, vector<256x1xf32>
    %c0_1 = arith.constant 0 : index
    %c0_2 = arith.constant 0 : index
    %1 = vector.load %arg2[%c0_1, %c0_2] : memref<1x8xf32, #tpu.memory_space<vmem>>, vector<1x8xf32>
    %2 = arith.truncf %0 : vector<256x1xf32> to vector<256x1xbf16>
    %3 = arith.truncf %1 : vector<1x8xf32> to vector<1x8xbf16>
    %cst = arith.constant dense<0.000000e+00> : vector<256x8xf32>
    %4 = tpu.matmul %2, %3, %cst {dimension_numbers = #tpu.dot_dimension_numbers<[1], [0], [0], [1], [0, 0, 1, 1], [], []>} : vector<256x1xbf16>, vector<1x8xbf16>, vector<256x8xf32> -> vector<256x8xf32>
    %c0_3 = arith.constant 0 : index
    %c0_4 = arith.constant 0 : index
    %5 = vector.load %arg3[%c0_3, %c0_4] : memref<1x8xf32, #tpu.memory_space<vmem>>, vector<1x8xf32>
    %6 = vector.broadcast %5 : vector<1x8xf32> to vector<256x8xf32>
    %7 = arith.addf %4, %6 : vector<256x8xf32>
    %cst_5 = arith.constant 0.000000e+00 : f32
    %8 = vector.broadcast %cst_5 : f32 to vector<256x8xf32>
    %9 = arith.maximumf %7, %8 : vector<256x8xf32>
    %c0_6 = arith.constant 0 : index
    %c0_7 = arith.constant 0 : index
    %10 = vector.load %arg4[%c0_6, %c0_7] : memref<8x8xf32, #tpu.memory_space<vmem>>, vector<8x8xf32>
    %11 = arith.truncf %9 : vector<256x8xf32> to vector<256x8xbf16>
    %12 = arith.truncf %10 : vector<8x8xf32> to vector<8x8xbf16>
    %cst_8 = arith.constant dense<0.000000e+00> : vector<256x8xf32>
    %13 = tpu.matmul %11, %12, %cst_8 {dimension_numbers = #tpu.dot_dimension_numbers<[1], [0], [0], [1], [0, 0, 1, 1], [], []>} : vector<256x8xbf16>, vector<8x8xbf16>, vector<256x8xf32> -> vector<256x8xf32>
    %c0_9 = arith.constant 0 : index
    %c0_10 = arith.constant 0 : index
    %14 = vector.load %arg5[%c0_9, %c0_10] : memref<1x8xf32, #tpu.memory_space<vmem>>, vector<1x8xf32>
    %15 = vector.broadcast %14 : vector<1x8xf32> to vector<256x8xf32>
    %16 = arith.addf %13, %15 : vector<256x8xf32>
    %cst_11 = arith.constant 0.000000e+00 : f32
    %17 = vector.broadcast %cst_11 : f32 to vector<256x8xf32>
    %18 = arith.maximumf %16, %17 : vector<256x8xf32>
    %c0_12 = arith.constant 0 : index
    %c0_13 = arith.constant 0 : index
    %19 = vector.load %arg6[%c0_12, %c0_13] : memref<256x8xf32, #tpu.memory_space<vmem>>, vector<256x8xf32>
    tpu.vector_store %arg6[%c0_12, %c0_13], %18 {strides = array<i32>} : memref<256x8xf32, #tpu.memory_space<vmem>>, vector<256x8xf32>,
    return
  }
  func.func @transform_0(%arg0: i32) -> (i32, i32) {
    %c0_i32 = arith.constant 0 : i32
    %c0_i32_0 = arith.constant 0 : i32
    return %arg0, %c0_i32 : i32, i32
  }
  func.func @transform_1(%arg0: i32) -> (i32, i32) {
    %c0_i32 = arith.constant 0 : i32
    %c0_i32_0 = arith.constant 0 : i32
    %c0_i32_1 = arith.constant 0 : i32
    return %c0_i32, %c0_i32_0 : i32, i32
  }
  func.func @transform_2(%arg0: i32) -> (i32, i32) {
    %c0_i32 = arith.constant 0 : i32
    %c0_i32_0 = arith.constant 0 : i32
    %c0_i32_1 = arith.constant 0 : i32
    return %c0_i32, %c0_i32_0 : i32, i32
  }
  func.func @transform_3(%arg0: i32) -> (i32, i32) {
    %c0_i32 = arith.constant 0 : i32
    %c0_i32_0 = arith.constant 0 : i32
    %c0_i32_1 = arith.constant 0 : i32
    return %c0_i32, %c0_i32_0 : i32, i32
  }
  func.func @transform_4(%arg0: i32) -> (i32, i32) {
    %c0_i32 = arith.constant 0 : i32
    %c0_i32_0 = arith.constant 0 : i32
    %c0_i32_1 = arith.constant 0 : i32
    return %c0_i32, %c0_i32_0 : i32, i32
  }
  func.func @transform_5(%arg0: i32) -> (i32, i32) {
    %c0_i32 = arith.constant 0 : i32
    %c0_i32_0 = arith.constant 0 : i32
    return %arg0, %c0_i32 : i32, i32
  }
}

module attributes {stable_mosaic.version = 11 : i64} {
  func.func @_final_kernel(%arg0: i32, %arg1: memref<4x32xf32, #tpu.memory_space<vmem>>, %arg2: memref<1x32xf32, #tpu.memory_space<vmem>>, %arg3: memref<1x32xf32, #tpu.memory_space<vmem>>, %arg4: memref<64x32xf32, #tpu.memory_space<vmem>>, %arg5: memref<1x32xf32, #tpu.memory_space<vmem>>, %arg6: memref<2x32xf32, #tpu.memory_space<vmem>>) attributes {dimension_semantics = [#tpu.dimension_semantics<arbitrary>], iteration_bounds = array<i64: 1>, scalar_prefetch = 0 : i64, scratch_operands = 0 : i64, tpu.core_type = #tpu.core_type<tc>, window_params = [{pipeline_mode = #tpu.pipeline_mode<synchronous>, transform_indices = @transform_0, window_bounds = array<i64: 4, 32>}, {pipeline_mode = #tpu.pipeline_mode<synchronous>, transform_indices = @transform_1, window_bounds = array<i64: 1, 32>}, {pipeline_mode = #tpu.pipeline_mode<synchronous>, transform_indices = @transform_2, window_bounds = array<i64: 1, 32>}, {pipeline_mode = #tpu.pipeline_mode<synchronous>, transform_indices = @transform_3, window_bounds = array<i64: 64, 32>}, {pipeline_mode = #tpu.pipeline_mode<synchronous>, transform_indices = @transform_4, window_bounds = array<i64: 1, 32>}, {pipeline_mode = #tpu.pipeline_mode<synchronous>, transform_indices = @transform_5, window_bounds = array<i64: 2, 32>}]} {
    %c0 = arith.constant 0 : index
    %c0_0 = arith.constant 0 : index
    %0 = vector.load %arg1[%c0, %c0_0] : memref<4x32xf32, #tpu.memory_space<vmem>>, vector<4x32xf32>
    %c0_1 = arith.constant 0 : index
    %c0_2 = arith.constant 0 : index
    %1 = vector.load %arg2[%c0_1, %c0_2] : memref<1x32xf32, #tpu.memory_space<vmem>>, vector<1x32xf32>
    %c0_3 = arith.constant 0 : index
    %c0_4 = arith.constant 0 : index
    %2 = vector.load %arg3[%c0_3, %c0_4] : memref<1x32xf32, #tpu.memory_space<vmem>>, vector<1x32xf32>
    %cst = arith.constant dense<0.000000e+00> : vector<4xf32>
    %3 = vector.multi_reduction <add>, %0, %cst [1] : vector<4x32xf32> to vector<4xf32>
    %4 = vector.shape_cast %3 : vector<4xf32> to vector<4x1xf32>
    %cst_5 = arith.constant 3.200000e+01 : f32
    %5 = vector.broadcast %cst_5 : f32 to vector<4x1xf32>
    %6 = arith.divf %4, %5 : vector<4x1xf32>
    %7 = vector.broadcast %6 : vector<4x1xf32> to vector<4x32xf32>
    %8 = arith.subf %0, %7 : vector<4x32xf32>
    %9 = arith.mulf %8, %8 : vector<4x32xf32>
    %cst_6 = arith.constant dense<0.000000e+00> : vector<4xf32>
    %10 = vector.multi_reduction <add>, %9, %cst_6 [1] : vector<4x32xf32> to vector<4xf32>
    %11 = vector.shape_cast %10 : vector<4xf32> to vector<4x1xf32>
    %cst_7 = arith.constant 3.200000e+01 : f32
    %12 = vector.broadcast %cst_7 : f32 to vector<4x1xf32>
    %13 = arith.divf %11, %12 : vector<4x1xf32>
    %cst_8 = arith.constant 9.99999974E-6 : f32
    %14 = vector.broadcast %cst_8 : f32 to vector<4x1xf32>
    %15 = arith.addf %13, %14 : vector<4x1xf32>
    %16 = math.rsqrt %15 : vector<4x1xf32>
    %17 = vector.broadcast %16 : vector<4x1xf32> to vector<4x32xf32>
    %18 = arith.mulf %8, %17 : vector<4x32xf32>
    %19 = vector.broadcast %1 : vector<1x32xf32> to vector<4x32xf32>
    %20 = arith.mulf %18, %19 : vector<4x32xf32>
    %21 = vector.broadcast %2 : vector<1x32xf32> to vector<4x32xf32>
    %22 = arith.addf %20, %21 : vector<4x32xf32>
    %23 = vector.extract_strided_slice %22 {offsets = [0, 0], sizes = [2, 32], strides = [1, 1]} : vector<4x32xf32> to vector<2x32xf32>
    %24 = vector.extract_strided_slice %22 {offsets = [2, 0], sizes = [2, 32], strides = [1, 1]} : vector<4x32xf32> to vector<2x32xf32>
    %c0_9 = arith.constant 0 : index
    %c0_10 = arith.constant 0 : index
    %25 = vector.load %arg4[%c0_9, %c0_10] : memref<64x32xf32, #tpu.memory_space<vmem>>, vector<64x32xf32>
    %26 = vector.extract_strided_slice %25 {offsets = [0, 0], sizes = [32, 32], strides = [1, 1]} : vector<64x32xf32> to vector<32x32xf32>
    %27 = arith.truncf %23 : vector<2x32xf32> to vector<2x32xbf16>
    %28 = arith.truncf %26 : vector<32x32xf32> to vector<32x32xbf16>
    %cst_11 = arith.constant dense<0.000000e+00> : vector<2x32xf32>
    %29 = tpu.matmul %27, %28, %cst_11 {dimension_numbers = #tpu.dot_dimension_numbers<[1], [0], [0], [1], [0, 0, 1, 1], [], []>} : vector<2x32xbf16>, vector<32x32xbf16>, vector<2x32xf32> -> vector<2x32xf32>
    %30 = vector.extract_strided_slice %25 {offsets = [32, 0], sizes = [32, 32], strides = [1, 1]} : vector<64x32xf32> to vector<32x32xf32>
    %31 = arith.truncf %24 : vector<2x32xf32> to vector<2x32xbf16>
    %32 = arith.truncf %30 : vector<32x32xf32> to vector<32x32xbf16>
    %cst_12 = arith.constant dense<0.000000e+00> : vector<2x32xf32>
    %33 = tpu.matmul %31, %32, %cst_12 {dimension_numbers = #tpu.dot_dimension_numbers<[1], [0], [0], [1], [0, 0, 1, 1], [], []>} : vector<2x32xbf16>, vector<32x32xbf16>, vector<2x32xf32> -> vector<2x32xf32>
    %34 = arith.addf %29, %33 : vector<2x32xf32>
    %c0_13 = arith.constant 0 : index
    %c0_14 = arith.constant 0 : index
    %35 = vector.load %arg5[%c0_13, %c0_14] : memref<1x32xf32, #tpu.memory_space<vmem>>, vector<1x32xf32>
    %36 = vector.broadcast %35 : vector<1x32xf32> to vector<2x32xf32>
    %37 = arith.addf %34, %36 : vector<2x32xf32>
    %c0_15 = arith.constant 0 : index
    %c0_16 = arith.constant 0 : index
    %38 = vector.load %arg6[%c0_15, %c0_16] : memref<2x32xf32, #tpu.memory_space<vmem>>, vector<2x32xf32>
    tpu.vector_store %arg6[%c0_15, %c0_16], %37 {strides = array<i32>} : memref<2x32xf32, #tpu.memory_space<vmem>>, vector<2x32xf32>,
    return
  }
  func.func @transform_0(%arg0: i32) -> (i32, i32) {
    %c0_i32 = arith.constant 0 : i32
    %c0_i32_0 = arith.constant 0 : i32
    %c0_i32_1 = arith.constant 0 : i32
    return %c0_i32, %c0_i32_0 : i32, i32
  }
  func.func @transform_1(%arg0: i32) -> (i32, i32) {
    %c0_i32 = arith.constant 0 : i32
    %c0_i32_0 = arith.constant 0 : i32
    %c0_i32_1 = arith.constant 0 : i32
    return %c0_i32, %c0_i32_0 : i32, i32
  }
  func.func @transform_2(%arg0: i32) -> (i32, i32) {
    %c0_i32 = arith.constant 0 : i32
    %c0_i32_0 = arith.constant 0 : i32
    %c0_i32_1 = arith.constant 0 : i32
    return %c0_i32, %c0_i32_0 : i32, i32
  }
  func.func @transform_3(%arg0: i32) -> (i32, i32) {
    %c0_i32 = arith.constant 0 : i32
    %c0_i32_0 = arith.constant 0 : i32
    %c0_i32_1 = arith.constant 0 : i32
    return %c0_i32, %c0_i32_0 : i32, i32
  }
  func.func @transform_4(%arg0: i32) -> (i32, i32) {
    %c0_i32 = arith.constant 0 : i32
    %c0_i32_0 = arith.constant 0 : i32
    %c0_i32_1 = arith.constant 0 : i32
    return %c0_i32, %c0_i32_0 : i32, i32
  }
  func.func @transform_5(%arg0: i32) -> (i32, i32) {
    %c0_i32 = arith.constant 0 : i32
    %c0_i32_0 = arith.constant 0 : i32
    %c0_i32_1 = arith.constant 0 : i32
    return %c0_i32, %c0_i32_0 : i32, i32
  }
}

module attributes {stable_mosaic.version = 11 : i64} {
  func.func @_block_kernel(%arg0: i32, %arg1: memref<1x5x32xf32, #tpu.memory_space<vmem>>, %arg2: memref<1x32xf32, #tpu.memory_space<vmem>>, %arg3: memref<1x32xf32, #tpu.memory_space<vmem>>, %arg4: memref<32x96xf32, #tpu.memory_space<vmem>>, %arg5: memref<1x96xf32, #tpu.memory_space<vmem>>, %arg6: memref<32x32xf32, #tpu.memory_space<vmem>>, %arg7: memref<1x32xf32, #tpu.memory_space<vmem>>, %arg8: memref<1x32xf32, #tpu.memory_space<vmem>>, %arg9: memref<1x32xf32, #tpu.memory_space<vmem>>, %arg10: memref<32x128xf32, #tpu.memory_space<vmem>>, %arg11: memref<1x128xf32, #tpu.memory_space<vmem>>, %arg12: memref<128x32xf32, #tpu.memory_space<vmem>>, %arg13: memref<1x32xf32, #tpu.memory_space<vmem>>, %arg14: memref<1x5x32xf32, #tpu.memory_space<vmem>>) attributes {dimension_semantics = [#tpu.dimension_semantics<parallel>], iteration_bounds = array<i64: 4>, scalar_prefetch = 0 : i64, scratch_operands = 0 : i64, tpu.core_type = #tpu.core_type<tc>, window_params = [{transform_indices = @transform_0, window_bounds = array<i64: 1, 5, 32>}, {pipeline_mode = #tpu.pipeline_mode<synchronous>, transform_indices = @transform_1, window_bounds = array<i64: 1, 32>}, {pipeline_mode = #tpu.pipeline_mode<synchronous>, transform_indices = @transform_2, window_bounds = array<i64: 1, 32>}, {pipeline_mode = #tpu.pipeline_mode<synchronous>, transform_indices = @transform_3, window_bounds = array<i64: 32, 96>}, {pipeline_mode = #tpu.pipeline_mode<synchronous>, transform_indices = @transform_4, window_bounds = array<i64: 1, 96>}, {pipeline_mode = #tpu.pipeline_mode<synchronous>, transform_indices = @transform_5, window_bounds = array<i64: 32, 32>}, {pipeline_mode = #tpu.pipeline_mode<synchronous>, transform_indices = @transform_6, window_bounds = array<i64: 1, 32>}, {pipeline_mode = #tpu.pipeline_mode<synchronous>, transform_indices = @transform_7, window_bounds = array<i64: 1, 32>}, {pipeline_mode = #tpu.pipeline_mode<synchronous>, transform_indices = @transform_8, window_bounds = array<i64: 1, 32>}, {pipeline_mode = #tpu.pipeline_mode<synchronous>, transform_indices = @transform_9, window_bounds = array<i64: 32, 128>}, {pipeline_mode = #tpu.pipeline_mode<synchronous>, transform_indices = @transform_10, window_bounds = array<i64: 1, 128>}, {pipeline_mode = #tpu.pipeline_mode<synchronous>, transform_indices = @transform_11, window_bounds = array<i64: 128, 32>}, {pipeline_mode = #tpu.pipeline_mode<synchronous>, transform_indices = @transform_12, window_bounds = array<i64: 1, 32>}, {transform_indices = @transform_13, window_bounds = array<i64: 1, 5, 32>}]} {
    %c0 = arith.constant 0 : index
    %c0_0 = arith.constant 0 : index
    %c0_1 = arith.constant 0 : index
    %0 = vector.load %arg1[%c0, %c0_0, %c0_1] : memref<1x5x32xf32, #tpu.memory_space<vmem>>, vector<1x5x32xf32>
    %1 = vector.shape_cast %0 : vector<1x5x32xf32> to vector<5x32xf32>
    %c0_2 = arith.constant 0 : index
    %c0_3 = arith.constant 0 : index
    %2 = vector.load %arg2[%c0_2, %c0_3] : memref<1x32xf32, #tpu.memory_space<vmem>>, vector<1x32xf32>
    %c0_4 = arith.constant 0 : index
    %c0_5 = arith.constant 0 : index
    %3 = vector.load %arg3[%c0_4, %c0_5] : memref<1x32xf32, #tpu.memory_space<vmem>>, vector<1x32xf32>
    %cst = arith.constant dense<0.000000e+00> : vector<5xf32>
    %4 = vector.multi_reduction <add>, %1, %cst [1] : vector<5x32xf32> to vector<5xf32>
    %5 = vector.shape_cast %4 : vector<5xf32> to vector<5x1xf32>
    %cst_6 = arith.constant 3.200000e+01 : f32
    %6 = vector.broadcast %cst_6 : f32 to vector<5x1xf32>
    %7 = arith.divf %5, %6 : vector<5x1xf32>
    %8 = vector.broadcast %7 : vector<5x1xf32> to vector<5x32xf32>
    %9 = arith.subf %1, %8 : vector<5x32xf32>
    %10 = arith.mulf %9, %9 : vector<5x32xf32>
    %cst_7 = arith.constant dense<0.000000e+00> : vector<5xf32>
    %11 = vector.multi_reduction <add>, %10, %cst_7 [1] : vector<5x32xf32> to vector<5xf32>
    %12 = vector.shape_cast %11 : vector<5xf32> to vector<5x1xf32>
    %cst_8 = arith.constant 3.200000e+01 : f32
    %13 = vector.broadcast %cst_8 : f32 to vector<5x1xf32>
    %14 = arith.divf %12, %13 : vector<5x1xf32>
    %cst_9 = arith.constant 9.99999974E-6 : f32
    %15 = vector.broadcast %cst_9 : f32 to vector<5x1xf32>
    %16 = arith.addf %14, %15 : vector<5x1xf32>
    %17 = math.rsqrt %16 : vector<5x1xf32>
    %18 = vector.broadcast %17 : vector<5x1xf32> to vector<5x32xf32>
    %19 = arith.mulf %9, %18 : vector<5x32xf32>
    %20 = vector.broadcast %2 : vector<1x32xf32> to vector<5x32xf32>
    %21 = arith.mulf %19, %20 : vector<5x32xf32>
    %22 = vector.broadcast %3 : vector<1x32xf32> to vector<5x32xf32>
    %23 = arith.addf %21, %22 : vector<5x32xf32>
    %c0_10 = arith.constant 0 : index
    %c0_11 = arith.constant 0 : index
    %24 = vector.load %arg4[%c0_10, %c0_11] : memref<32x96xf32, #tpu.memory_space<vmem>>, vector<32x96xf32>
    %25 = arith.truncf %23 : vector<5x32xf32> to vector<5x32xbf16>
    %26 = arith.truncf %24 : vector<32x96xf32> to vector<32x96xbf16>
    %cst_12 = arith.constant dense<0.000000e+00> : vector<5x96xf32>
    %27 = tpu.matmul %25, %26, %cst_12 {dimension_numbers = #tpu.dot_dimension_numbers<[1], [0], [0], [1], [0, 0, 1, 1], [], []>} : vector<5x32xbf16>, vector<32x96xbf16>, vector<5x96xf32> -> vector<5x96xf32>
    %c0_13 = arith.constant 0 : index
    %c0_14 = arith.constant 0 : index
    %28 = vector.load %arg5[%c0_13, %c0_14] : memref<1x96xf32, #tpu.memory_space<vmem>>, vector<1x96xf32>
    %29 = vector.broadcast %28 : vector<1x96xf32> to vector<5x96xf32>
    %30 = arith.addf %27, %29 : vector<5x96xf32>
    %c0_15 = arith.constant 0 : index
    %c0_16 = arith.constant 0 : index
    %31 = vector.load %arg6[%c0_15, %c0_16] : memref<32x32xf32, #tpu.memory_space<vmem>>, vector<32x32xf32>
    %cst_17 = arith.constant 0.000000e+00 : f32
    %32 = vector.broadcast %cst_17 : f32 to vector<5x32xf32>
    %33 = vector.extract_strided_slice %30 {offsets = [0, 0], sizes = [5, 8], strides = [1, 1]} : vector<5x96xf32> to vector<5x8xf32>
    %34 = vector.extract_strided_slice %30 {offsets = [0, 32], sizes = [5, 8], strides = [1, 1]} : vector<5x96xf32> to vector<5x8xf32>
    %35 = vector.extract_strided_slice %30 {offsets = [0, 64], sizes = [5, 8], strides = [1, 1]} : vector<5x96xf32> to vector<5x8xf32>
    %36 = arith.truncf %33 : vector<5x8xf32> to vector<5x8xbf16>
    %37 = arith.truncf %34 : vector<5x8xf32> to vector<5x8xbf16>
    %cst_18 = arith.constant dense<0.000000e+00> : vector<5x5xf32>
    %38 = tpu.matmul %36, %37, %cst_18 {dimension_numbers = #tpu.dot_dimension_numbers<[1], [1], [0], [0], [0, 0, 1, 0], [], []>} : vector<5x8xbf16>, vector<5x8xbf16>, vector<5x5xf32> -> vector<5x5xf32>
    %cst_19 = arith.constant dense<0xFF800000> : vector<5xf32>
    %39 = vector.multi_reduction <maximumf>, %38, %cst_19 [1] : vector<5x5xf32> to vector<5xf32>
    %40 = vector.shape_cast %39 : vector<5xf32> to vector<5x1xf32>
    %41 = vector.broadcast %40 : vector<5x1xf32> to vector<5x5xf32>
    %42 = arith.subf %38, %41 : vector<5x5xf32>
    %43 = math.exp %42 : vector<5x5xf32>
    %cst_20 = arith.constant dense<0.000000e+00> : vector<5xf32>
    %44 = vector.multi_reduction <add>, %43, %cst_20 [1] : vector<5x5xf32> to vector<5xf32>
    %45 = vector.shape_cast %44 : vector<5xf32> to vector<5x1xf32>
    %46 = tpu.reciprocal %45 {approx = true} : vector<5x1xf32> -> vector<5x1xf32>
    %47 = vector.broadcast %46 : vector<5x1xf32> to vector<5x5xf32>
    %48 = arith.mulf %43, %47 : vector<5x5xf32>
    %49 = arith.truncf %48 : vector<5x5xf32> to vector<5x5xbf16>
    %50 = arith.truncf %35 : vector<5x8xf32> to vector<5x8xbf16>
    %cst_21 = arith.constant dense<0.000000e+00> : vector<5x8xf32>
    %51 = tpu.matmul %49, %50, %cst_21 {dimension_numbers = #tpu.dot_dimension_numbers<[1], [0], [0], [1], [0, 0, 1, 1], [], []>} : vector<5x5xbf16>, vector<5x8xbf16>, vector<5x8xf32> -> vector<5x8xf32>
    %52 = vector.extract_strided_slice %31 {offsets = [0, 0], sizes = [8, 32], strides = [1, 1]} : vector<32x32xf32> to vector<8x32xf32>
    %53 = arith.truncf %51 : vector<5x8xf32> to vector<5x8xbf16>
    %54 = arith.truncf %52 : vector<8x32xf32> to vector<8x32xbf16>
    %cst_22 = arith.constant dense<0.000000e+00> : vector<5x32xf32>
    %55 = tpu.matmul %53, %54, %cst_22 {dimension_numbers = #tpu.dot_dimension_numbers<[1], [0], [0], [1], [0, 0, 1, 1], [], []>} : vector<5x8xbf16>, vector<8x32xbf16>, vector<5x32xf32> -> vector<5x32xf32>
    %56 = arith.addf %32, %55 : vector<5x32xf32>
    %57 = vector.extract_strided_slice %30 {offsets = [0, 8], sizes = [5, 8], strides = [1, 1]} : vector<5x96xf32> to vector<5x8xf32>
    %58 = vector.extract_strided_slice %30 {offsets = [0, 40], sizes = [5, 8], strides = [1, 1]} : vector<5x96xf32> to vector<5x8xf32>
    %59 = vector.extract_strided_slice %30 {offsets = [0, 72], sizes = [5, 8], strides = [1, 1]} : vector<5x96xf32> to vector<5x8xf32>
    %60 = arith.truncf %57 : vector<5x8xf32> to vector<5x8xbf16>
    %61 = arith.truncf %58 : vector<5x8xf32> to vector<5x8xbf16>
    %cst_23 = arith.constant dense<0.000000e+00> : vector<5x5xf32>
    %62 = tpu.matmul %60, %61, %cst_23 {dimension_numbers = #tpu.dot_dimension_numbers<[1], [1], [0], [0], [0, 0, 1, 0], [], []>} : vector<5x8xbf16>, vector<5x8xbf16>, vector<5x5xf32> -> vector<5x5xf32>
    %cst_24 = arith.constant dense<0xFF800000> : vector<5xf32>
    %63 = vector.multi_reduction <maximumf>, %62, %cst_24 [1] : vector<5x5xf32> to vector<5xf32>
    %64 = vector.shape_cast %63 : vector<5xf32> to vector<5x1xf32>
    %65 = vector.broadcast %64 : vector<5x1xf32> to vector<5x5xf32>
    %66 = arith.subf %62, %65 : vector<5x5xf32>
    %67 = math.exp %66 : vector<5x5xf32>
    %cst_25 = arith.constant dense<0.000000e+00> : vector<5xf32>
    %68 = vector.multi_reduction <add>, %67, %cst_25 [1] : vector<5x5xf32> to vector<5xf32>
    %69 = vector.shape_cast %68 : vector<5xf32> to vector<5x1xf32>
    %70 = tpu.reciprocal %69 {approx = true} : vector<5x1xf32> -> vector<5x1xf32>
    %71 = vector.broadcast %70 : vector<5x1xf32> to vector<5x5xf32>
    %72 = arith.mulf %67, %71 : vector<5x5xf32>
    %73 = arith.truncf %72 : vector<5x5xf32> to vector<5x5xbf16>
    %74 = arith.truncf %59 : vector<5x8xf32> to vector<5x8xbf16>
    %cst_26 = arith.constant dense<0.000000e+00> : vector<5x8xf32>
    %75 = tpu.matmul %73, %74, %cst_26 {dimension_numbers = #tpu.dot_dimension_numbers<[1], [0], [0], [1], [0, 0, 1, 1], [], []>} : vector<5x5xbf16>, vector<5x8xbf16>, vector<5x8xf32> -> vector<5x8xf32>
    %76 = vector.extract_strided_slice %31 {offsets = [8, 0], sizes = [8, 32], strides = [1, 1]} : vector<32x32xf32> to vector<8x32xf32>
    %77 = arith.truncf %75 : vector<5x8xf32> to vector<5x8xbf16>
    %78 = arith.truncf %76 : vector<8x32xf32> to vector<8x32xbf16>
    %cst_27 = arith.constant dense<0.000000e+00> : vector<5x32xf32>
    %79 = tpu.matmul %77, %78, %cst_27 {dimension_numbers = #tpu.dot_dimension_numbers<[1], [0], [0], [1], [0, 0, 1, 1], [], []>} : vector<5x8xbf16>, vector<8x32xbf16>, vector<5x32xf32> -> vector<5x32xf32>
    %80 = arith.addf %56, %79 : vector<5x32xf32>
    %81 = vector.extract_strided_slice %30 {offsets = [0, 16], sizes = [5, 8], strides = [1, 1]} : vector<5x96xf32> to vector<5x8xf32>
    %82 = vector.extract_strided_slice %30 {offsets = [0, 48], sizes = [5, 8], strides = [1, 1]} : vector<5x96xf32> to vector<5x8xf32>
    %83 = vector.extract_strided_slice %30 {offsets = [0, 80], sizes = [5, 8], strides = [1, 1]} : vector<5x96xf32> to vector<5x8xf32>
    %84 = arith.truncf %81 : vector<5x8xf32> to vector<5x8xbf16>
    %85 = arith.truncf %82 : vector<5x8xf32> to vector<5x8xbf16>
    %cst_28 = arith.constant dense<0.000000e+00> : vector<5x5xf32>
    %86 = tpu.matmul %84, %85, %cst_28 {dimension_numbers = #tpu.dot_dimension_numbers<[1], [1], [0], [0], [0, 0, 1, 0], [], []>} : vector<5x8xbf16>, vector<5x8xbf16>, vector<5x5xf32> -> vector<5x5xf32>
    %cst_29 = arith.constant dense<0xFF800000> : vector<5xf32>
    %87 = vector.multi_reduction <maximumf>, %86, %cst_29 [1] : vector<5x5xf32> to vector<5xf32>
    %88 = vector.shape_cast %87 : vector<5xf32> to vector<5x1xf32>
    %89 = vector.broadcast %88 : vector<5x1xf32> to vector<5x5xf32>
    %90 = arith.subf %86, %89 : vector<5x5xf32>
    %91 = math.exp %90 : vector<5x5xf32>
    %cst_30 = arith.constant dense<0.000000e+00> : vector<5xf32>
    %92 = vector.multi_reduction <add>, %91, %cst_30 [1] : vector<5x5xf32> to vector<5xf32>
    %93 = vector.shape_cast %92 : vector<5xf32> to vector<5x1xf32>
    %94 = tpu.reciprocal %93 {approx = true} : vector<5x1xf32> -> vector<5x1xf32>
    %95 = vector.broadcast %94 : vector<5x1xf32> to vector<5x5xf32>
    %96 = arith.mulf %91, %95 : vector<5x5xf32>
    %97 = arith.truncf %96 : vector<5x5xf32> to vector<5x5xbf16>
    %98 = arith.truncf %83 : vector<5x8xf32> to vector<5x8xbf16>
    %cst_31 = arith.constant dense<0.000000e+00> : vector<5x8xf32>
    %99 = tpu.matmul %97, %98, %cst_31 {dimension_numbers = #tpu.dot_dimension_numbers<[1], [0], [0], [1], [0, 0, 1, 1], [], []>} : vector<5x5xbf16>, vector<5x8xbf16>, vector<5x8xf32> -> vector<5x8xf32>
    %100 = vector.extract_strided_slice %31 {offsets = [16, 0], sizes = [8, 32], strides = [1, 1]} : vector<32x32xf32> to vector<8x32xf32>
    %101 = arith.truncf %99 : vector<5x8xf32> to vector<5x8xbf16>
    %102 = arith.truncf %100 : vector<8x32xf32> to vector<8x32xbf16>
    %cst_32 = arith.constant dense<0.000000e+00> : vector<5x32xf32>
    %103 = tpu.matmul %101, %102, %cst_32 {dimension_numbers = #tpu.dot_dimension_numbers<[1], [0], [0], [1], [0, 0, 1, 1], [], []>} : vector<5x8xbf16>, vector<8x32xbf16>, vector<5x32xf32> -> vector<5x32xf32>
    %104 = arith.addf %80, %103 : vector<5x32xf32>
    %105 = vector.extract_strided_slice %30 {offsets = [0, 24], sizes = [5, 8], strides = [1, 1]} : vector<5x96xf32> to vector<5x8xf32>
    %106 = vector.extract_strided_slice %30 {offsets = [0, 56], sizes = [5, 8], strides = [1, 1]} : vector<5x96xf32> to vector<5x8xf32>
    %107 = vector.extract_strided_slice %30 {offsets = [0, 88], sizes = [5, 8], strides = [1, 1]} : vector<5x96xf32> to vector<5x8xf32>
    %108 = arith.truncf %105 : vector<5x8xf32> to vector<5x8xbf16>
    %109 = arith.truncf %106 : vector<5x8xf32> to vector<5x8xbf16>
    %cst_33 = arith.constant dense<0.000000e+00> : vector<5x5xf32>
    %110 = tpu.matmul %108, %109, %cst_33 {dimension_numbers = #tpu.dot_dimension_numbers<[1], [1], [0], [0], [0, 0, 1, 0], [], []>} : vector<5x8xbf16>, vector<5x8xbf16>, vector<5x5xf32> -> vector<5x5xf32>
    %cst_34 = arith.constant dense<0xFF800000> : vector<5xf32>
    %111 = vector.multi_reduction <maximumf>, %110, %cst_34 [1] : vector<5x5xf32> to vector<5xf32>
    %112 = vector.shape_cast %111 : vector<5xf32> to vector<5x1xf32>
    %113 = vector.broadcast %112 : vector<5x1xf32> to vector<5x5xf32>
    %114 = arith.subf %110, %113 : vector<5x5xf32>
    %115 = math.exp %114 : vector<5x5xf32>
    %cst_35 = arith.constant dense<0.000000e+00> : vector<5xf32>
    %116 = vector.multi_reduction <add>, %115, %cst_35 [1] : vector<5x5xf32> to vector<5xf32>
    %117 = vector.shape_cast %116 : vector<5xf32> to vector<5x1xf32>
    %118 = tpu.reciprocal %117 {approx = true} : vector<5x1xf32> -> vector<5x1xf32>
    %119 = vector.broadcast %118 : vector<5x1xf32> to vector<5x5xf32>
    %120 = arith.mulf %115, %119 : vector<5x5xf32>
    %121 = arith.truncf %120 : vector<5x5xf32> to vector<5x5xbf16>
    %122 = arith.truncf %107 : vector<5x8xf32> to vector<5x8xbf16>
    %cst_36 = arith.constant dense<0.000000e+00> : vector<5x8xf32>
    %123 = tpu.matmul %121, %122, %cst_36 {dimension_numbers = #tpu.dot_dimension_numbers<[1], [0], [0], [1], [0, 0, 1, 1], [], []>} : vector<5x5xbf16>, vector<5x8xbf16>, vector<5x8xf32> -> vector<5x8xf32>
    %124 = vector.extract_strided_slice %31 {offsets = [24, 0], sizes = [8, 32], strides = [1, 1]} : vector<32x32xf32> to vector<8x32xf32>
    %125 = arith.truncf %123 : vector<5x8xf32> to vector<5x8xbf16>
    %126 = arith.truncf %124 : vector<8x32xf32> to vector<8x32xbf16>
    %cst_37 = arith.constant dense<0.000000e+00> : vector<5x32xf32>
    %127 = tpu.matmul %125, %126, %cst_37 {dimension_numbers = #tpu.dot_dimension_numbers<[1], [0], [0], [1], [0, 0, 1, 1], [], []>} : vector<5x8xbf16>, vector<8x32xbf16>, vector<5x32xf32> -> vector<5x32xf32>
    %128 = arith.addf %104, %127 : vector<5x32xf32>
    %129 = arith.addf %1, %128 : vector<5x32xf32>
    %c0_38 = arith.constant 0 : index
    %c0_39 = arith.constant 0 : index
    %130 = vector.load %arg7[%c0_38, %c0_39] : memref<1x32xf32, #tpu.memory_space<vmem>>, vector<1x32xf32>
    %131 = vector.broadcast %130 : vector<1x32xf32> to vector<5x32xf32>
    %132 = arith.addf %129, %131 : vector<5x32xf32>
    %c0_40 = arith.constant 0 : index
    %c0_41 = arith.constant 0 : index
    %133 = vector.load %arg8[%c0_40, %c0_41] : memref<1x32xf32, #tpu.memory_space<vmem>>, vector<1x32xf32>
    %c0_42 = arith.constant 0 : index
    %c0_43 = arith.constant 0 : index
    %134 = vector.load %arg9[%c0_42, %c0_43] : memref<1x32xf32, #tpu.memory_space<vmem>>, vector<1x32xf32>
    %cst_44 = arith.constant dense<0.000000e+00> : vector<5xf32>
    %135 = vector.multi_reduction <add>, %132, %cst_44 [1] : vector<5x32xf32> to vector<5xf32>
    %136 = vector.shape_cast %135 : vector<5xf32> to vector<5x1xf32>
    %cst_45 = arith.constant 3.200000e+01 : f32
    %137 = vector.broadcast %cst_45 : f32 to vector<5x1xf32>
    %138 = arith.divf %136, %137 : vector<5x1xf32>
    %139 = vector.broadcast %138 : vector<5x1xf32> to vector<5x32xf32>
    %140 = arith.subf %132, %139 : vector<5x32xf32>
    %141 = arith.mulf %140, %140 : vector<5x32xf32>
    %cst_46 = arith.constant dense<0.000000e+00> : vector<5xf32>
    %142 = vector.multi_reduction <add>, %141, %cst_46 [1] : vector<5x32xf32> to vector<5xf32>
    %143 = vector.shape_cast %142 : vector<5xf32> to vector<5x1xf32>
    %cst_47 = arith.constant 3.200000e+01 : f32
    %144 = vector.broadcast %cst_47 : f32 to vector<5x1xf32>
    %145 = arith.divf %143, %144 : vector<5x1xf32>
    %cst_48 = arith.constant 9.99999974E-6 : f32
    %146 = vector.broadcast %cst_48 : f32 to vector<5x1xf32>
    %147 = arith.addf %145, %146 : vector<5x1xf32>
    %148 = math.rsqrt %147 : vector<5x1xf32>
    %149 = vector.broadcast %148 : vector<5x1xf32> to vector<5x32xf32>
    %150 = arith.mulf %140, %149 : vector<5x32xf32>
    %151 = vector.broadcast %133 : vector<1x32xf32> to vector<5x32xf32>
    %152 = arith.mulf %150, %151 : vector<5x32xf32>
    %153 = vector.broadcast %134 : vector<1x32xf32> to vector<5x32xf32>
    %154 = arith.addf %152, %153 : vector<5x32xf32>
    %c0_49 = arith.constant 0 : index
    %c0_50 = arith.constant 0 : index
    %155 = vector.load %arg10[%c0_49, %c0_50] : memref<32x128xf32, #tpu.memory_space<vmem>>, vector<32x128xf32>
    %156 = arith.truncf %154 : vector<5x32xf32> to vector<5x32xbf16>
    %157 = arith.truncf %155 : vector<32x128xf32> to vector<32x128xbf16>
    %cst_51 = arith.constant dense<0.000000e+00> : vector<5x128xf32>
    %158 = tpu.matmul %156, %157, %cst_51 {dimension_numbers = #tpu.dot_dimension_numbers<[1], [0], [0], [1], [0, 0, 1, 1], [], []>} : vector<5x32xbf16>, vector<32x128xbf16>, vector<5x128xf32> -> vector<5x128xf32>
    %c0_52 = arith.constant 0 : index
    %c0_53 = arith.constant 0 : index
    %159 = vector.load %arg11[%c0_52, %c0_53] : memref<1x128xf32, #tpu.memory_space<vmem>>, vector<1x128xf32>
    %160 = vector.broadcast %159 : vector<1x128xf32> to vector<5x128xf32>
    %161 = arith.addf %158, %160 : vector<5x128xf32>
    %162 = arith.mulf %161, %161 : vector<5x128xf32>
    %163 = arith.mulf %161, %162 : vector<5x128xf32>
    %cst_54 = arith.constant 4.471500e-02 : f32
    %164 = vector.broadcast %cst_54 : f32 to vector<5x128xf32>
    %165 = arith.mulf %164, %163 : vector<5x128xf32>
    %166 = arith.addf %161, %165 : vector<5x128xf32>
    %cst_55 = arith.constant 0.797884583 : f32
    %167 = vector.broadcast %cst_55 : f32 to vector<5x128xf32>
    %168 = arith.mulf %167, %166 : vector<5x128xf32>
    %169 = math.tanh %168 : vector<5x128xf32>
    %cst_56 = arith.constant 1.000000e+00 : f32
    %170 = vector.broadcast %cst_56 : f32 to vector<5x128xf32>
    %171 = arith.addf %170, %169 : vector<5x128xf32>
    %cst_57 = arith.constant 5.000000e-01 : f32
    %172 = vector.broadcast %cst_57 : f32 to vector<5x128xf32>
    %173 = arith.mulf %172, %171 : vector<5x128xf32>
    %174 = arith.mulf %161, %173 : vector<5x128xf32>
    %c0_58 = arith.constant 0 : index
    %c0_59 = arith.constant 0 : index
    %175 = vector.load %arg12[%c0_58, %c0_59] : memref<128x32xf32, #tpu.memory_space<vmem>>, vector<128x32xf32>
    %176 = arith.truncf %174 : vector<5x128xf32> to vector<5x128xbf16>
    %177 = arith.truncf %175 : vector<128x32xf32> to vector<128x32xbf16>
    %cst_60 = arith.constant dense<0.000000e+00> : vector<5x32xf32>
    %178 = tpu.matmul %176, %177, %cst_60 {dimension_numbers = #tpu.dot_dimension_numbers<[1], [0], [0], [1], [0, 0, 1, 1], [], []>} : vector<5x128xbf16>, vector<128x32xbf16>, vector<5x32xf32> -> vector<5x32xf32>
    %179 = arith.addf %132, %178 : vector<5x32xf32>
    %c0_61 = arith.constant 0 : index
    %c0_62 = arith.constant 0 : index
    %180 = vector.load %arg13[%c0_61, %c0_62] : memref<1x32xf32, #tpu.memory_space<vmem>>, vector<1x32xf32>
    %181 = vector.broadcast %180 : vector<1x32xf32> to vector<5x32xf32>
    %182 = arith.addf %179, %181 : vector<5x32xf32>
    %c0_63 = arith.constant 0 : index
    %c0_64 = arith.constant 0 : index
    %c0_65 = arith.constant 0 : index
    %183 = vector.load %arg14[%c0_63, %c0_64, %c0_65] : memref<1x5x32xf32, #tpu.memory_space<vmem>>, vector<1x5x32xf32>
    %184 = vector.shape_cast %183 : vector<1x5x32xf32> to vector<5x32xf32>
    %185 = vector.shape_cast %182 : vector<5x32xf32> to vector<1x5x32xf32>
    tpu.vector_store %arg14[%c0_63, %c0_64, %c0_65], %185 {strides = array<i32>} : memref<1x5x32xf32, #tpu.memory_space<vmem>>, vector<1x5x32xf32>,
    return
  }
  func.func @transform_0(%arg0: i32) -> (i32, i32, i32) {
    %c0_i32 = arith.constant 0 : i32
    %c0_i32_0 = arith.constant 0 : i32
    %c0_i32_1 = arith.constant 0 : i32
    return %arg0, %c0_i32, %c0_i32_0 : i32, i32, i32
  }
  func.func @transform_1(%arg0: i32) -> (i32, i32) {
    %c0_i32 = arith.constant 0 : i32
    %c0_i32_0 = arith.constant 0 : i32
    %c0_i32_1 = arith.constant 0 : i32
    return %c0_i32, %c0_i32_0 : i32, i32
  }
  func.func @transform_2(%arg0: i32) -> (i32, i32) {
    %c0_i32 = arith.constant 0 : i32
    %c0_i32_0 = arith.constant 0 : i32
    %c0_i32_1 = arith.constant 0 : i32
    return %c0_i32, %c0_i32_0 : i32, i32
  }
  func.func @transform_3(%arg0: i32) -> (i32, i32) {
    %c0_i32 = arith.constant 0 : i32
    %c0_i32_0 = arith.constant 0 : i32
    %c0_i32_1 = arith.constant 0 : i32
    return %c0_i32, %c0_i32_0 : i32, i32
  }
  func.func @transform_4(%arg0: i32) -> (i32, i32) {
    %c0_i32 = arith.constant 0 : i32
    %c0_i32_0 = arith.constant 0 : i32
    %c0_i32_1 = arith.constant 0 : i32
    return %c0_i32, %c0_i32_0 : i32, i32
  }
  func.func @transform_5(%arg0: i32) -> (i32, i32) {
    %c0_i32 = arith.constant 0 : i32
    %c0_i32_0 = arith.constant 0 : i32
    %c0_i32_1 = arith.constant 0 : i32
    return %c0_i32, %c0_i32_0 : i32, i32
  }
  func.func @transform_6(%arg0: i32) -> (i32, i32) {
    %c0_i32 = arith.constant 0 : i32
    %c0_i32_0 = arith.constant 0 : i32
    %c0_i32_1 = arith.constant 0 : i32
    return %c0_i32, %c0_i32_0 : i32, i32
  }
  func.func @transform_7(%arg0: i32) -> (i32, i32) {
    %c0_i32 = arith.constant 0 : i32
    %c0_i32_0 = arith.constant 0 : i32
    %c0_i32_1 = arith.constant 0 : i32
    return %c0_i32, %c0_i32_0 : i32, i32
  }
  func.func @transform_8(%arg0: i32) -> (i32, i32) {
    %c0_i32 = arith.constant 0 : i32
    %c0_i32_0 = arith.constant 0 : i32
    %c0_i32_1 = arith.constant 0 : i32
    return %c0_i32, %c0_i32_0 : i32, i32
  }
  func.func @transform_9(%arg0: i32) -> (i32, i32) {
    %c0_i32 = arith.constant 0 : i32
    %c0_i32_0 = arith.constant 0 : i32
    %c0_i32_1 = arith.constant 0 : i32
    return %c0_i32, %c0_i32_0 : i32, i32
  }
  func.func @transform_10(%arg0: i32) -> (i32, i32) {
    %c0_i32 = arith.constant 0 : i32
    %c0_i32_0 = arith.constant 0 : i32
    %c0_i32_1 = arith.constant 0 : i32
    return %c0_i32, %c0_i32_0 : i32, i32
  }
  func.func @transform_11(%arg0: i32) -> (i32, i32) {
    %c0_i32 = arith.constant 0 : i32
    %c0_i32_0 = arith.constant 0 : i32
    %c0_i32_1 = arith.constant 0 : i32
    return %c0_i32, %c0_i32_0 : i32, i32
  }
  func.func @transform_12(%arg0: i32) -> (i32, i32) {
    %c0_i32 = arith.constant 0 : i32
    %c0_i32_0 = arith.constant 0 : i32
    %c0_i32_1 = arith.constant 0 : i32
    return %c0_i32, %c0_i32_0 : i32, i32
  }
  func.func @transform_13(%arg0: i32) -> (i32, i32, i32) {
    %c0_i32 = arith.constant 0 : i32
    %c0_i32_0 = arith.constant 0 : i32
    %c0_i32_1 = arith.constant 0 : i32
    return %arg0, %c0_i32, %c0_i32_0 : i32, i32, i32
  }
}

</mosaic_0001>

<bundles_post_ra>
// kernel: forward.8
= control target key start
LH: loop header
LB: loop body
LE: loop exit
PB: predicated region body
PF: predicated region fallthrough
CT: control target
= control target key end

     0   :  { %s509_s18 = smov 0   ;;  %s550_s0 = inlined_call_operand.vmem [shape: f32[2,64], index: 0, kind: input, shape index: {}]   ;;  %s551_s1 = inlined_call_operand.vmem [shape: f32[2,64,32], index: 1, kind: input, shape index: {}]   ;;  %s552_s2 = inlined_call_operand.vmem [shape: f32[2,1,32], index: 2, kind: input, shape index: {}]   ;;  %s553_s3 = inlined_call_operand.vmem [shape: f32[2,32,32], index: 3, kind: input, shape index: {}]   ;;  %s554_s4 = inlined_call_operand.vmem [shape: f32[2,1,32], index: 4, kind: input, shape index: {}]   ;;  %s555_s5 = inlined_call_operand.vmem [shape: f32[2,2,32], index: 5, kind: output, shape index: {}]  }
   0x1 LB: > { %s440_s19 = sadd.s32 4294967295, %s477_s18   ;;  %p444_p0 = scmp.ge.s32.totalorder %s477_s18, 1  ;;  %s477_s18 = sphi %s509_s18, %s15_s18  }
   0x2   : > { %p213_p1 = scmp.lt.s32.totalorder %s477_s18, 3 }
   0x4   : > { %p214_p2 = pnand %p444_p0, %p213_p1 }
   0x5   : > { %p251_p3 = scmp.lt.s32.totalorder (!%p214_p2), %s440_s19, 1 }
   0x6   : > { %217 = sbr.rel (%p214_p2) target bundleno = 326 (0x146), region = 40 }
   0xb   : > { %s557_s19 = smov (!%p251_p3, %s440_s19), 1  ;;  %v272_v12 = vld [vmem:[%s550_s0] sm:$0x3]  ;;  %vm290_vm0 = vcmask 523264   ;;  %vm338_vm5 = vcmask 261120   ;;  %vm355_vm6 = vcmask 254976  }
   0xc   : > { %s455_s20 = sshll.u32 %s557_s19, 6  ;;  %s258_s23 = scalar_lea.vmem %s552_s2, %s557_s19  ;;  %v281_v13 = vpack.c.bf16 %v272_v12, %v272_v12 }
   0xd   : > { %s255_s26 = scalar_lea.vmem %s551_s1, %s455_s20  ;;  %s266_s6 = scalar_lea.vmem %s554_s4, %s557_s19  ;;  %v465_v17 = vld [vmem:[%s258_s23] ss:$0 sm:$0xff] }
   0xe   : > { %v279_v0 = vld [vmem:[%s255_s26 + $0x30] sm:$0xff]  ;;  %v280_v1 = vld [vmem:[%s255_s26 + $0x38] sm:$0xff]  ;;  %v277_v2 = vld [vmem:[%s255_s26 + $0x20] sm:$0xff]  ;;  %s456_s7 = sshll.u32 %s557_s19, 5  ;;  %s449_s11 = sshll.u32 %s557_s19, 1 }
   0xf   : > { %v285_v3 = vpack.c.bf16 %v280_v1, %v279_v0  ;;  %v278_v4 = vld [vmem:[%s255_s26 + $0x28] sm:$0xff]  ;;  %v275_v6 = vld [vmem:[%s255_s26 + $0x10] sm:$0xff]  ;;  %v276_v7 = vld [vmem:[%s255_s26 + $0x18] sm:$0xff]  ;;  %s263_s10 = scalar_lea.vmem %s553_s3, %s456_s7  ;;  %s270_s16 = scalar_lea.vmem %s555_s5, %s449_s11 }
  0x10   : > { %v284_v5 = vpack.c.bf16 %v278_v4, %v277_v2  ;;  %v283_v8 = vpack.c.bf16 %v276_v7, %v275_v6  ;;  %v273_v9 = vld [vmem:[%s255_s26] sm:$0xff]  ;;  %v274_v10 = vld [vmem:[%s255_s26 + $0x8] sm:$0xff]  ;;  %v329_v14 = vld [vmem:[%s263_s10 + $0x10] sm:$0xff] }
  0x11   : > { %298 = vmatpush.bf16.msra.mxu0 %v285_v3  ;;  %v282_v11 = vpack.c.bf16 %v274_v10, %v273_v9  ;;  %v330_v15 = vld [vmem:[%s263_s10 + $0x18] sm:$0xff]  ;;  %v327_v18 = vld [vmem:[%s263_s10] sm:$0xff]  ;;  %v328_v19 = vld [vmem:[%s263_s10 + $0x8] sm:$0xff] }
  0x12   : > { %v333_v16 = vpack.c.bf16 %v330_v15, %v329_v14  ;;  %v332_v20 = vpack.c.bf16 %v328_v19, %v327_v18  ;;  %v466_v39 = vld [vmem:[%s266_s6] ss:$0 sm:$0xff] }
  0x14   : > { %348 = vmatpush.bf16.msra.mxu1 %v333_v16 }
  0x15   : > { %299 = vmatpush.bf16.msra.mxu0 %v284_v5 }
  0x18   : > { %349 = vmatpush.bf16.msra.mxu1 %v332_v20 }
  0x19   : > { %300 = vmatpush.bf16.msra.mxu0 %v283_v8 }
  0x1d   : > { %301 = vmatpush.bf16.msra.mxu0 %v282_v11 }
  0x20   : > { %450 = vmatmul.msk.bf16.vlgmr.msra.gmra.mxu0 %vm290_vm0, %v281_v13 }
  0x9d   : > { %v303_v21 = vpop.f32.mrf.mxu0 }
  0x9e   : > { %v304_v22 = vadd.f32 %v465_v17, %v303_v21 }
  0xa0   : > { %v451_v23 = vmul.f32 -1.442695, %v304_v22 }
  0xa2   : > { %467 = vpow2.f32 %v451_v23 }
  0xa5   : > { %v305_v24 = vpop.f32.mrf.mxu0 }
  0xa8   : > { %v468_v25 = vpop.eup %467 }
  0xa9   : > { %v310_v26 = vadd.f32 1.0, %v468_v25 }
  0xab   : > { %469 = vrcp.f32 %v310_v26  ;;  %v322_v30 = vand.u32 2147483648, %v310_v26  ;;  %v320_v32 = vand.u32 2147483647, %v310_v26  ;;  %vm316_vm2 = vweird.f32 %v310_v26 }
  0xad   : > { %v323_v34 = vor.u32 1.1754944e-38, %v322_v30  ;;  %vm321_vm4 = vcmp.eq.f32.partialorder %v320_v32, 8.507059e+37 }
  0xb1   : > { %v470_v27 = vpop.eup %469 }
  0xb2   : > { %v312_v28 = vmul.f32 %v470_v27, %v310_v26  ;;  %vm317_vm1 = vweird.f32 %v470_v27 }
  0xb3   : > { %vm318_vm3 = vmor %vm316_vm2, %vm317_vm1 }
  0xb4   : > { %v313_v29 = vsub.f32 1.0, %v312_v28 }
  0xb6   : > { %v314_v31 = vmul.f32 %v470_v27, %v313_v29 }
  0xb8   : > { %v315_v33 = vadd.f32 %v470_v27, %v314_v31 }
  0xba   : > { %v319_v35 = vsel %vm318_vm3, %v470_v27, %v315_v33 }
  0xbb   : > { %v324_v36 = vsel %vm321_vm4, %v323_v34, %v319_v35 }
  0xbc   : > { %v326_v37 = vmul.f32 %v324_v36, %v304_v22 }
  0xbe   : > { %v331_v38 = vpack.c.bf16 %v326_v37, %v326_v37 }
  0xc0   : > { %452 = vmatmul.msk.bf16.vlgmr.msra.gmra.mxu1 %vm338_vm5, %v331_v38 }
 0x13d   : > { %v351_v40 = vpop.f32.mrf.mxu1 }
 0x13e   : > { %v352_v41 = vadd.f32 %v466_v39, %v351_v40 }
 0x140   : > { %356 = vst.msk [vmem:[%s270_s16] sm:$0x3] %vm355_vm6, %v352_v41 }
 0x145   : > { %v353_v42 = vpop.f32.mrf.mxu1 }
 0x146 PF: > { %s15_s18 = sadd.s32 1, %s477_s18  }
 0x147   : > { %p12_p4 = scmp.ge.s32.totalorder %s15_s18, 4  }
 0x149   :  { %14 = sbr.rel (!%p12_p4) target bundleno = 1 (0x1), region = 79 }

// kernel: forward.9
= control target key start
LH: loop header
LB: loop body
LE: loop exit
PB: predicated region body
PF: predicated region fallthrough
CT: control target
= control target key end

     0   :  { %s834_s18 = smov 0   ;;  %s1070_s0 = inlined_call_operand.vmem [shape: f32[512,4], index: 0, kind: input, shape index: {}]   ;;  %s1071_s1 = inlined_call_operand.vmem [shape: f32[4,8], index: 1, kind: input, shape index: {}]   ;;  %s1072_s2 = inlined_call_operand.vmem [shape: f32[1,8], index: 2, kind: input, shape index: {}]   ;;  %s1073_s3 = inlined_call_operand.vmem [shape: f32[8,8], index: 3, kind: input, shape index: {}]   ;;  %s1074_s4 = inlined_call_operand.vmem [shape: f32[1,8], index: 4, kind: input, shape index: {}]   ;;  %s1075_s5 = inlined_call_operand.vmem [shape: f32[512,8], index: 5, kind: output, shape index: {}]  }
   0x1 LB: > { %s741_s19 = sadd.s32 4294967295, %s802_s18   ;;  %p745_p0 = scmp.ge.s32.totalorder %s802_s18, 1  ;;  %s802_s18 = sphi %s834_s18, %s15_s18  }
   0x2   : > { %p188_p1 = scmp.lt.s32.totalorder %s802_s18, 3 }
   0x4   : > { %p189_p2 = pnand %p745_p0, %p188_p1 }
   0x5   : > { %s746_s22 = sshll.u32 (!%p189_p2), %s741_s19, 5 }
   0x6   : > { %192 = sbr.rel (%p189_p2) target bundleno = 421 (0x1a5), region = 40  ;;  %p217_p3 = scmp.lt.s32.totalorder (!%p189_p2), %s746_s22, 63 }
   0xb   : > { %v261_v0 = vld [vmem:[%s1071_s1] sm:$0xf]  ;;  %vm332_vm0 = vcmask 1041408   ;;  %s1077_s22 = smov (!%p217_p3, %s746_s22), 63  ;;  %vm283_vm1 = vcmask 31744   ;;  %vm528_vm2 = vcmask 1043456  }
   0xc   : > { %v278_v1 = vpack.c.bf16 %v261_v0, %v261_v0  ;;  %s747_s23 = sshll.u32 %s1077_s22, 3  ;;  %v457_v45 = vld [vmem:[%s1073_s3] sm:$0xff]  ;;  %vm479_vm3 = vcmask 64512  }
   0xd   : > { %s853_s26 = scalar_lea.vmem %s1070_s0, %s747_s23  ;;  %v474_v46 = vpack.c.bf16 %v457_v45, %v457_v45  ;;  %v909_v55 = vld [vmem:[%s1072_s2] ss:$0 sm:$0xff]  ;;  %s970_s10 = scalar_lea.vmem %s1075_s5, %s747_s23 }
   0xe   : > { %v334_v2 = vsel %vm332_vm0, %v278_v1, 0  ;;  %v229_v3 = vld [vmem:[%s853_s26] sm:$0xff]  ;;  %v230_v4 = vld [vmem:[%s853_s26 + $0x8] sm:$0xff]  ;;  %v231_v9 = vld [vmem:[%s853_s26 + $0x10] sm:$0xff] }
   0xf   : > { %343 = vmatpush.bf16.msra.mxu0 %v334_v2  ;;  %784 = vmatpush.bf16.msra.mxu2 %v334_v2  ;;  %v245_v5 = vld [vmem:[%s853_s26 + $0x80] sm:$0xff]  ;;  %v262_v6 = vpack.c.bf16 %v230_v4, %v229_v3  ;;  %v246_v7 = vld [vmem:[%s853_s26 + $0x88] sm:$0xff]  ;;  %v232_v10 = vld [vmem:[%s853_s26 + $0x18] sm:$0xff]  ;;  %v530_v49 = vsel %vm528_vm2, %v474_v46, 0 }
  0x10   : > { %v270_v8 = vpack.c.bf16 %v246_v7, %v245_v5  ;;  %v247_v11 = vld [vmem:[%s853_s26 + $0x90] sm:$0xff]  ;;  %v248_v12 = vld [vmem:[%s853_s26 + $0x98] sm:$0xff]  ;;  %v263_v13 = vpack.c.bf16 %v232_v10, %v231_v9  ;;  %v233_v15 = vld [vmem:[%s853_s26 + $0x20] sm:$0xff]  ;;  %539 = vmatpush.bf16.msra.mxu1 %v530_v49  ;;  %785 = vmatpush.bf16.msra.mxu3 %v530_v49 }
  0x11   : > { %v271_v14 = vpack.c.bf16 %v248_v12, %v247_v11  ;;  %v234_v16 = vld [vmem:[%s853_s26 + $0x28] sm:$0xff]  ;;  %v249_v17 = vld [vmem:[%s853_s26 + $0xa0] sm:$0xff]  ;;  %v235_v21 = vld [vmem:[%s853_s26 + $0x30] sm:$0xff] }
  0x12   : > { %750 = vmatmul.msk.bf16.vlgmr.msra.gmra.mxu0 %vm283_vm1, %v262_v6  ;;  %758 = vmatmul.msk.bf16.vlgmr.msra.gmra.mxu2 %vm283_vm1, %v270_v8  ;;  %v250_v18 = vld [vmem:[%s853_s26 + $0xa8] sm:$0xff]  ;;  %v264_v19 = vpack.c.bf16 %v234_v16, %v233_v15  ;;  %v236_v22 = vld [vmem:[%s853_s26 + $0x38] sm:$0xff]  ;;  %v251_v23 = vld [vmem:[%s853_s26 + $0xb0] sm:$0xff] }
  0x13   : > { %v272_v20 = vpack.c.bf16 %v250_v18, %v249_v17  ;;  %v252_v24 = vld [vmem:[%s853_s26 + $0xb8] sm:$0xff]  ;;  %v265_v25 = vpack.c.bf16 %v236_v22, %v235_v21  ;;  %v237_v27 = vld [vmem:[%s853_s26 + $0x40] sm:$0xff]  ;;  %v238_v28 = vld [vmem:[%s853_s26 + $0x48] sm:$0xff] }
  0x14   : > { %v273_v26 = vpack.c.bf16 %v252_v24, %v251_v23  ;;  %v253_v29 = vld [vmem:[%s853_s26 + $0xc0] sm:$0xff]  ;;  %v254_v30 = vld [vmem:[%s853_s26 + $0xc8] sm:$0xff]  ;;  %v266_v31 = vpack.c.bf16 %v238_v28, %v237_v27  ;;  %v239_v33 = vld [vmem:[%s853_s26 + $0x50] sm:$0xff] }
  0x15   : > { %v274_v32 = vpack.c.bf16 %v254_v30, %v253_v29  ;;  %v240_v34 = vld [vmem:[%s853_s26 + $0x58] sm:$0xff]  ;;  %v255_v35 = vld [vmem:[%s853_s26 + $0xd0] sm:$0xff]  ;;  %v241_v39 = vld [vmem:[%s853_s26 + $0x60] sm:$0xff] }
  0x16   : > { %v256_v36 = vld [vmem:[%s853_s26 + $0xd8] sm:$0xff]  ;;  %v267_v37 = vpack.c.bf16 %v240_v34, %v239_v33  ;;  %v242_v40 = vld [vmem:[%s853_s26 + $0x68] sm:$0xff]  ;;  %v257_v41 = vld [vmem:[%s853_s26 + $0xe0] sm:$0xff] }
  0x17   : > { %v275_v38 = vpack.c.bf16 %v256_v36, %v255_v35  ;;  %v258_v42 = vld [vmem:[%s853_s26 + $0xe8] sm:$0xff]  ;;  %v268_v43 = vpack.c.bf16 %v242_v40, %v241_v39  ;;  %v243_v47 = vld [vmem:[%s853_s26 + $0x70] sm:$0xff]  ;;  %v244_v48 = vld [vmem:[%s853_s26 + $0x78] sm:$0xff] }
  0x18   : > { %v276_v44 = vpack.c.bf16 %v258_v42, %v257_v41  ;;  %v259_v50 = vld [vmem:[%s853_s26 + $0xf0] sm:$0xff]  ;;  %v260_v51 = vld [vmem:[%s853_s26 + $0xf8] sm:$0xff]  ;;  %v269_v52 = vpack.c.bf16 %v244_v48, %v243_v47 }
  0x19   : > { %v277_v53 = vpack.c.bf16 %v260_v51, %v259_v50 }
  0x22   : > { %751 = vmatmul.msk.bf16.gmra.mxu0 %vm283_vm1, %v263_v13  ;;  %759 = vmatmul.msk.bf16.gmra.mxu2 %vm283_vm1, %v271_v14 }
  0x32   : > { %752 = vmatmul.msk.bf16.gmra.mxu0 %vm283_vm1, %v264_v19  ;;  %760 = vmatmul.msk.bf16.gmra.mxu2 %vm283_vm1, %v272_v20 }
  0x42   : > { %753 = vmatmul.msk.bf16.gmra.mxu0 %vm283_vm1, %v265_v25  ;;  %761 = vmatmul.msk.bf16.gmra.mxu2 %vm283_vm1, %v273_v26 }
  0x52   : > { %754 = vmatmul.msk.bf16.gmra.mxu0 %vm283_vm1, %v266_v31  ;;  %762 = vmatmul.msk.bf16.gmra.mxu2 %vm283_vm1, %v274_v32 }
  0x62   : > { %755 = vmatmul.msk.bf16.gmra.mxu0 %vm283_vm1, %v267_v37  ;;  %763 = vmatmul.msk.bf16.gmra.mxu2 %vm283_vm1, %v275_v38 }
  0x72   : > { %756 = vmatmul.msk.bf16.gmra.mxu0 %vm283_vm1, %v268_v43  ;;  %764 = vmatmul.msk.bf16.gmra.mxu2 %vm283_vm1, %v276_v44 }
  0x82   : > { %757 = vmatmul.msk.bf16.gmra.mxu0 %vm283_vm1, %v269_v52  ;;  %765 = vmatmul.msk.bf16.gmra.mxu2 %vm283_vm1, %v277_v53 }
  0x8f   : > { %v345_v54 = vpop.f32.mrf.mxu0 }
  0x90   : > { %v346_v56 = vadd.f32 %v909_v55, %v345_v54 }
  0x92   : > { %v425_v59 = vmax.f32 %v346_v56, 0.0 }
  0x95   : > { %v385_v57 = vpop.f32.mrf.mxu2 }
  0x96   : > { %v386_v63 = vadd.f32 %v909_v55, %v385_v57 }
  0x97   : > { %v347_v58 = vpop.f32.mrf.mxu0 }
  0x98   : > { %v348_v60 = vadd.f32 %v909_v55, %v347_v58  ;;  %v441_v3 = vmax.f32 %v386_v63, 0.0 }
  0x9a   : > { %v426_v61 = vmax.f32 %v348_v60, 0.0 }
  0x9c   : > { %v458_v62 = vpack.c.bf16 %v426_v61, %v425_v59 }
  0x9d   : > { %v387_v0 = vpop.f32.mrf.mxu2 }
  0x9e   : > { %766 = vmatmul.msk.bf16.vlgmr.msra.gmra.mxu1 %vm479_vm3, %v458_v62  ;;  %v388_v1 = vadd.f32 %v909_v55, %v387_v0 }
  0x9f   : > { %v350_v2 = vpop.f32.mrf.mxu0 }
  0xa0   : > { %v442_v4 = vmax.f32 %v388_v1, 0.0  ;;  %v351_v6 = vadd.f32 %v909_v55, %v350_v2 }
  0xa2   : > { %v466_v5 = vpack.c.bf16 %v442_v4, %v441_v3  ;;  %v427_v9 = vmax.f32 %v351_v6, 0.0 }
  0xa4   : > { %774 = vmatmul.msk.bf16.vlgmr.msra.gmra.mxu3 %vm479_vm3, %v466_v5 }
  0xa5   : > { %v390_v7 = vpop.f32.mrf.mxu2 }
  0xa6   : > { %v391_v13 = vadd.f32 %v909_v55, %v390_v7 }
  0xa7   : > { %v352_v8 = vpop.f32.mrf.mxu0 }
  0xa8   : > { %v353_v10 = vadd.f32 %v909_v55, %v352_v8  ;;  %v443_v17 = vmax.f32 %v391_v13, 0.0 }
  0xaa   : > { %v428_v11 = vmax.f32 %v353_v10, 0.0 }
  0xac   : > { %v459_v12 = vpack.c.bf16 %v428_v11, %v427_v9 }
  0xad   : > { %v392_v14 = vpop.f32.mrf.mxu2 }
  0xae   : > { %767 = vmatmul.msk.bf16.gmra.mxu1 %vm479_vm3, %v459_v12  ;;  %v393_v15 = vadd.f32 %v909_v55, %v392_v14 }
  0xaf   : > { %v355_v16 = vpop.f32.mrf.mxu0 }
  0xb0   : > { %v444_v18 = vmax.f32 %v393_v15, 0.0  ;;  %v356_v20 = vadd.f32 %v909_v55, %v355_v16 }
  0xb2   : > { %v467_v19 = vpack.c.bf16 %v444_v18, %v443_v17  ;;  %v429_v23 = vmax.f32 %v356_v20, 0.0 }
  0xb4   : > { %775 = vmatmul.msk.bf16.gmra.mxu3 %vm479_vm3, %v467_v19 }
  0xb5   : > { %v395_v21 = vpop.f32.mrf.mxu2 }
  0xb6   : > { %v396_v27 = vadd.f32 %v909_v55, %v395_v21 }
  0xb7   : > { %v357_v22 = vpop.f32.mrf.mxu0 }
  0xb8   : > { %v358_v24 = vadd.f32 %v909_v55, %v357_v22  ;;  %v445_v31 = vmax.f32 %v396_v27, 0.0 }
  0xba   : > { %v430_v25 = vmax.f32 %v358_v24, 0.0 }
  0xbc   : > { %v460_v26 = vpack.c.bf16 %v430_v25, %v429_v23 }
  0xbd   : > { %v397_v28 = vpop.f32.mrf.mxu2 }
  0xbe   : > { %768 = vmatmul.msk.bf16.gmra.mxu1 %vm479_vm3, %v460_v26  ;;  %v398_v29 = vadd.f32 %v909_v55, %v397_v28 }
  0xbf   : > { %v360_v30 = vpop.f32.mrf.mxu0 }
  0xc0   : > { %v446_v32 = vmax.f32 %v398_v29, 0.0  ;;  %v361_v34 = vadd.f32 %v909_v55, %v360_v30 }
  0xc2   : > { %v468_v33 = vpack.c.bf16 %v446_v32, %v445_v31  ;;  %v431_v37 = vmax.f32 %v361_v34, 0.0 }
  0xc4   : > { %776 = vmatmul.msk.bf16.gmra.mxu3 %vm479_vm3, %v468_v33 }
  0xc5   : > { %v400_v35 = vpop.f32.mrf.mxu2 }
  0xc6   : > { %v401_v41 = vadd.f32 %v909_v55, %v400_v35 }
  0xc7   : > { %v362_v36 = vpop.f32.mrf.mxu0 }
  0xc8   : > { %v363_v38 = vadd.f32 %v909_v55, %v362_v36  ;;  %v447_v45 = vmax.f32 %v401_v41, 0.0 }
  0xca   : > { %v432_v39 = vmax.f32 %v363_v38, 0.0 }
  0xcc   : > { %v461_v40 = vpack.c.bf16 %v432_v39, %v431_v37 }
  0xcd   : > { %v402_v42 = vpop.f32.mrf.mxu2 }
  0xce   : > { %769 = vmatmul.msk.bf16.gmra.mxu1 %vm479_vm3, %v461_v40  ;;  %v403_v43 = vadd.f32 %v909_v55, %v402_v42  ;;  %v962_v40 = vld [vmem:[%s1074_s4] ss:$0 sm:$0xff] }
  0xcf   : > { %v365_v44 = vpop.f32.mrf.mxu0 }
  0xd0   : > { %v448_v46 = vmax.f32 %v403_v43, 0.0  ;;  %v366_v48 = vadd.f32 %v909_v55, %v365_v44 }
  0xd2   : > { %v469_v47 = vpack.c.bf16 %v448_v46, %v447_v45  ;;  %v433_v51 = vmax.f32 %v366_v48, 0.0 }
  0xd4   : > { %777 = vmatmul.msk.bf16.gmra.mxu3 %vm479_vm3, %v469_v47 }
  0xd5   : > { %v405_v49 = vpop.f32.mrf.mxu2 }
  0xd6   : > { %v406_v56 = vadd.f32 %v909_v55, %v405_v49 }
  0xd7   : > { %v367_v50 = vpop.f32.mrf.mxu0 }
  0xd8   : > { %v368_v52 = vadd.f32 %v909_v55, %v367_v50  ;;  %v449_v60 = vmax.f32 %v406_v56, 0.0 }
  0xda   : > { %v434_v53 = vmax.f32 %v368_v52, 0.0 }
  0xdc   : > { %v462_v54 = vpack.c.bf16 %v434_v53, %v433_v51 }
  0xdd   : > { %v407_v57 = vpop.f32.mrf.mxu2 }
  0xde   : > { %770 = vmatmul.msk.bf16.gmra.mxu1 %vm479_vm3, %v462_v54  ;;  %v408_v58 = vadd.f32 %v909_v55, %v407_v57 }
  0xdf   : > { %v370_v59 = vpop.f32.mrf.mxu0 }
  0xe0   : > { %v450_v61 = vmax.f32 %v408_v58, 0.0  ;;  %v371_v63 = vadd.f32 %v909_v55, %v370_v59 }
  0xe2   : > { %v470_v62 = vpack.c.bf16 %v450_v61, %v449_v60  ;;  %v435_v2 = vmax.f32 %v371_v63, 0.0 }
  0xe4   : > { %778 = vmatmul.msk.bf16.gmra.mxu3 %vm479_vm3, %v470_v62 }
  0xe5   : > { %v410_v0 = vpop.f32.mrf.mxu2 }
  0xe6   : > { %v411_v6 = vadd.f32 %v909_v55, %v410_v0 }
  0xe7   : > { %v372_v1 = vpop.f32.mrf.mxu0 }
  0xe8   : > { %v373_v3 = vadd.f32 %v909_v55, %v372_v1  ;;  %v451_v10 = vmax.f32 %v411_v6, 0.0 }
  0xea   : > { %v436_v4 = vmax.f32 %v373_v3, 0.0 }
  0xec   : > { %v463_v5 = vpack.c.bf16 %v436_v4, %v435_v2 }
  0xed   : > { %v412_v7 = vpop.f32.mrf.mxu2 }
  0xee   : > { %771 = vmatmul.msk.bf16.gmra.mxu1 %vm479_vm3, %v463_v5  ;;  %v413_v8 = vadd.f32 %v909_v55, %v412_v7 }
  0xef   : > { %v375_v9 = vpop.f32.mrf.mxu0 }
  0xf0   : > { %v452_v11 = vmax.f32 %v413_v8, 0.0  ;;  %v376_v13 = vadd.f32 %v909_v55, %v375_v9 }
  0xf2   : > { %v471_v12 = vpack.c.bf16 %v452_v11, %v451_v10  ;;  %v437_v16 = vmax.f32 %v376_v13, 0.0 }
  0xf4   : > { %779 = vmatmul.msk.bf16.gmra.mxu3 %vm479_vm3, %v471_v12 }
  0xf5   : > { %v415_v14 = vpop.f32.mrf.mxu2 }
  0xf6   : > { %v416_v20 = vadd.f32 %v909_v55, %v415_v14 }
  0xf7   : > { %v377_v15 = vpop.f32.mrf.mxu0 }
  0xf8   : > { %v378_v17 = vadd.f32 %v909_v55, %v377_v15  ;;  %v453_v24 = vmax.f32 %v416_v20, 0.0 }
  0xfa   : > { %v438_v18 = vmax.f32 %v378_v17, 0.0 }
  0xfc   : > { %v464_v19 = vpack.c.bf16 %v438_v18, %v437_v16 }
  0xfd   : > { %v417_v21 = vpop.f32.mrf.mxu2 }
  0xfe   : > { %772 = vmatmul.msk.bf16.gmra.mxu1 %vm479_vm3, %v464_v19  ;;  %v418_v22 = vadd.f32 %v909_v55, %v417_v21 }
  0xff   : > { %v380_v23 = vpop.f32.mrf.mxu0 }
 0x100   : > { %v454_v25 = vmax.f32 %v418_v22, 0.0  ;;  %v381_v27 = vadd.f32 %v909_v55, %v380_v23 }
 0x102   : > { %v472_v26 = vpack.c.bf16 %v454_v25, %v453_v24  ;;  %v439_v30 = vmax.f32 %v381_v27, 0.0 }
 0x104   : > { %780 = vmatmul.msk.bf16.gmra.mxu3 %vm479_vm3, %v472_v26 }
 0x105   : > { %v420_v28 = vpop.f32.mrf.mxu2 }
 0x106   : > { %v421_v34 = vadd.f32 %v909_v55, %v420_v28 }
 0x107   : > { %v382_v29 = vpop.f32.mrf.mxu0 }
 0x108   : > { %v383_v31 = vadd.f32 %v909_v55, %v382_v29  ;;  %v455_v37 = vmax.f32 %v421_v34, 0.0 }
 0x10a   : > { %v440_v32 = vmax.f32 %v383_v31, 0.0 }
 0x10c   : > { %v465_v33 = vpack.c.bf16 %v440_v32, %v439_v30 }
 0x10d   : > { %v422_v35 = vpop.f32.mrf.mxu2 }
 0x10e   : > { %773 = vmatmul.msk.bf16.gmra.mxu1 %vm479_vm3, %v465_v33  ;;  %v423_v36 = vadd.f32 %v909_v55, %v422_v35 }
 0x110   : > { %v456_v38 = vmax.f32 %v423_v36, 0.0 }
 0x112   : > { %v473_v39 = vpack.c.bf16 %v456_v38, %v455_v37 }
 0x114   : > { %781 = vmatmul.msk.bf16.gmra.mxu3 %vm479_vm3, %v473_v39 }
 0x11b   : > { %v541_v41 = vpop.f32.mrf.mxu1 }
 0x11c   : > { %v542_v42 = vadd.f32 %v962_v40, %v541_v41 }
 0x11e   : > { %v621_v55 = vmax.f32 %v542_v42, 0.0 }
 0x120   : > { %653 = vst.msk [vmem:[%s970_s10] sm:$0xff] %vm479_vm3, %v621_v55 }
 0x123   : > { %v543_v43 = vpop.f32.mrf.mxu1 }
 0x124   : > { %v544_v44 = vadd.f32 %v962_v40, %v543_v43 }
 0x126   : > { %v622_v45 = vmax.f32 %v544_v44, 0.0 }
 0x127   : > { %v581_v46 = vpop.f32.mrf.mxu3 }
 0x128   : > { %654 = vst.msk [vmem:[%s970_s10 + $0x8] sm:$0xff] %vm479_vm3, %v622_v45  ;;  %v582_v47 = vadd.f32 %v962_v40, %v581_v46 }
 0x12a   : > { %v637_v48 = vmax.f32 %v582_v47, 0.0 }
 0x12b   : > { %v546_v49 = vpop.f32.mrf.mxu1 }
 0x12c   : > { %v547_v50 = vadd.f32 %v962_v40, %v546_v49  ;;  %669 = vst.msk [vmem:[%s970_s10 + $0x80] sm:$0xff] %vm479_vm3, %v637_v48 }
 0x12e   : > { %v623_v51 = vmax.f32 %v547_v50, 0.0 }
 0x12f   : > { %v583_v52 = vpop.f32.mrf.mxu3 }
 0x130   : > { %655 = vst.msk [vmem:[%s970_s10 + $0x10] sm:$0xff] %vm479_vm3, %v623_v51  ;;  %v584_v53 = vadd.f32 %v962_v40, %v583_v52 }
 0x132   : > { %v638_v54 = vmax.f32 %v584_v53, 0.0 }
 0x133   : > { %v548_v56 = vpop.f32.mrf.mxu1 }
 0x134   : > { %v549_v57 = vadd.f32 %v962_v40, %v548_v56  ;;  %670 = vst.msk [vmem:[%s970_s10 + $0x88] sm:$0xff] %vm479_vm3, %v638_v54 }
 0x136   : > { %v624_v58 = vmax.f32 %v549_v57, 0.0 }
 0x137   : > { %v586_v59 = vpop.f32.mrf.mxu3 }
 0x138   : > { %656 = vst.msk [vmem:[%s970_s10 + $0x18] sm:$0xff] %vm479_vm3, %v624_v58  ;;  %v587_v60 = vadd.f32 %v962_v40, %v586_v59 }
 0x13a   : > { %v639_v61 = vmax.f32 %v587_v60, 0.0 }
 0x13b   : > { %v551_v62 = vpop.f32.mrf.mxu1 }
 0x13c   : > { %v552_v63 = vadd.f32 %v962_v40, %v551_v62  ;;  %671 = vst.msk [vmem:[%s970_s10 + $0x90] sm:$0xff] %vm479_vm3, %v639_v61 }
 0x13e   : > { %v625_v0 = vmax.f32 %v552_v63, 0.0 }
 0x13f   : > { %v588_v1 = vpop.f32.mrf.mxu3 }
 0x140   : > { %657 = vst.msk [vmem:[%s970_s10 + $0x20] sm:$0xff] %vm479_vm3, %v625_v0  ;;  %v589_v2 = vadd.f32 %v962_v40, %v588_v1 }
 0x142   : > { %v640_v3 = vmax.f32 %v589_v2, 0.0 }
 0x143   : > { %v553_v4 = vpop.f32.mrf.mxu1 }
 0x144   : > { %v554_v5 = vadd.f32 %v962_v40, %v553_v4  ;;  %672 = vst.msk [vmem:[%s970_s10 + $0x98] sm:$0xff] %vm479_vm3, %v640_v3 }
 0x146   : > { %v626_v6 = vmax.f32 %v554_v5, 0.0 }
 0x147   : > { %v591_v7 = vpop.f32.mrf.mxu3 }
 0x148   : > { %658 = vst.msk [vmem:[%s970_s10 + $0x28] sm:$0xff] %vm479_vm3, %v626_v6  ;;  %v592_v8 = vadd.f32 %v962_v40, %v591_v7 }
 0x14a   : > { %v641_v9 = vmax.f32 %v592_v8, 0.0 }
 0x14b   : > { %v556_v10 = vpop.f32.mrf.mxu1 }
 0x14c   : > { %v557_v11 = vadd.f32 %v962_v40, %v556_v10  ;;  %673 = vst.msk [vmem:[%s970_s10 + $0xa0] sm:$0xff] %vm479_vm3, %v641_v9 }
 0x14e   : > { %v627_v12 = vmax.f32 %v557_v11, 0.0 }
 0x14f   : > { %v593_v13 = vpop.f32.mrf.mxu3 }
 0x150   : > { %659 = vst.msk [vmem:[%s970_s10 + $0x30] sm:$0xff] %vm479_vm3, %v627_v12  ;;  %v594_v14 = vadd.f32 %v962_v40, %v593_v13 }
 0x152   : > { %v642_v15 = vmax.f32 %v594_v14, 0.0 }
 0x153   : > { %v558_v16 = vpop.f32.mrf.mxu1 }
 0x154   : > { %v559_v17 = vadd.f32 %v962_v40, %v558_v16  ;;  %674 = vst.msk [vmem:[%s970_s10 + $0xa8] sm:$0xff] %vm479_vm3, %v642_v15 }
 0x156   : > { %v628_v18 = vmax.f32 %v559_v17, 0.0 }
 0x157   : > { %v596_v19 = vpop.f32.mrf.mxu3 }
 0x158   : > { %660 = vst.msk [vmem:[%s970_s10 + $0x38] sm:$0xff] %vm479_vm3, %v628_v18  ;;  %v597_v20 = vadd.f32 %v962_v40, %v596_v19 }
 0x15a   : > { %v643_v21 = vmax.f32 %v597_v20, 0.0 }
 0x15b   : > { %v561_v22 = vpop.f32.mrf.mxu1 }
 0x15c   : > { %v562_v23 = vadd.f32 %v962_v40, %v561_v22  ;;  %675 = vst.msk [vmem:[%s970_s10 + $0xb0] sm:$0xff] %vm479_vm3, %v643_v21 }
 0x15e   : > { %v629_v24 = vmax.f32 %v562_v23, 0.0 }
 0x15f   : > { %v598_v25 = vpop.f32.mrf.mxu3 }
 0x160   : > { %661 = vst.msk [vmem:[%s970_s10 + $0x40] sm:$0xff] %vm479_vm3, %v629_v24  ;;  %v599_v26 = vadd.f32 %v962_v40, %v598_v25 }
 0x162   : > { %v644_v27 = vmax.f32 %v599_v26, 0.0 }
 0x163   : > { %v563_v28 = vpop.f32.mrf.mxu1 }
 0x164   : > { %v564_v29 = vadd.f32 %v962_v40, %v563_v28  ;;  %676 = vst.msk [vmem:[%s970_s10 + $0xb8] sm:$0xff] %vm479_vm3, %v644_v27 }
 0x166   : > { %v630_v30 = vmax.f32 %v564_v29, 0.0 }
 0x167   : > { %v601_v31 = vpop.f32.mrf.mxu3 }
 0x168   : > { %662 = vst.msk [vmem:[%s970_s10 + $0x48] sm:$0xff] %vm479_vm3, %v630_v30  ;;  %v602_v32 = vadd.f32 %v962_v40, %v601_v31 }
 0x16a   : > { %v645_v33 = vmax.f32 %v602_v32, 0.0 }
 0x16b   : > { %v566_v34 = vpop.f32.mrf.mxu1 }
 0x16c   : > { %v567_v35 = vadd.f32 %v962_v40, %v566_v34  ;;  %677 = vst.msk [vmem:[%s970_s10 + $0xc0] sm:$0xff] %vm479_vm3, %v645_v33 }
 0x16e   : > { %v631_v36 = vmax.f32 %v567_v35, 0.0 }
 0x16f   : > { %v603_v37 = vpop.f32.mrf.mxu3 }
 0x170   : > { %663 = vst.msk [vmem:[%s970_s10 + $0x50] sm:$0xff] %vm479_vm3, %v631_v36  ;;  %v604_v38 = vadd.f32 %v962_v40, %v603_v37 }
 0x172   : > { %v646_v39 = vmax.f32 %v604_v38, 0.0 }
 0x173   : > { %v568_v41 = vpop.f32.mrf.mxu1 }
 0x174   : > { %v569_v42 = vadd.f32 %v962_v40, %v568_v41  ;;  %678 = vst.msk [vmem:[%s970_s10 + $0xc8] sm:$0xff] %vm479_vm3, %v646_v39 }
 0x176   : > { %v632_v55 = vmax.f32 %v569_v42, 0.0 }
 0x177   : > { %v606_v43 = vpop.f32.mrf.mxu3 }
 0x178   : > { %664 = vst.msk [vmem:[%s970_s10 + $0x58] sm:$0xff] %vm479_vm3, %v632_v55  ;;  %v607_v44 = vadd.f32 %v962_v40, %v606_v43 }
 0x17a   : > { %v647_v45 = vmax.f32 %v607_v44, 0.0 }
 0x17b   : > { %v571_v46 = vpop.f32.mrf.mxu1 }
 0x17c   : > { %v572_v47 = vadd.f32 %v962_v40, %v571_v46  ;;  %679 = vst.msk [vmem:[%s970_s10 + $0xd0] sm:$0xff] %vm479_vm3, %v647_v45 }
 0x17e   : > { %v633_v48 = vmax.f32 %v572_v47, 0.0 }
 0x17f   : > { %v608_v49 = vpop.f32.mrf.mxu3 }
 0x180   : > { %665 = vst.msk [vmem:[%s970_s10 + $0x60] sm:$0xff] %vm479_vm3, %v633_v48  ;;  %v609_v50 = vadd.f32 %v962_v40, %v608_v49 }
 0x182   : > { %v648_v51 = vmax.f32 %v609_v50, 0.0 }
 0x183   : > { %v573_v52 = vpop.f32.mrf.mxu1 }
 0x184   : > { %v574_v53 = vadd.f32 %v962_v40, %v573_v52  ;;  %680 = vst.msk [vmem:[%s970_s10 + $0xd8] sm:$0xff] %vm479_vm3, %v648_v51 }
 0x186   : > { %v634_v54 = vmax.f32 %v574_v53, 0.0 }
 0x187   : > { %v611_v56 = vpop.f32.mrf.mxu3 }
 0x188   : > { %666 = vst.msk [vmem:[%s970_s10 + $0x68] sm:$0xff] %vm479_vm3, %v634_v54  ;;  %v612_v57 = vadd.f32 %v962_v40, %v611_v56 }
 0x18a   : > { %v649_v58 = vmax.f32 %v612_v57, 0.0 }
 0x18b   : > { %v576_v59 = vpop.f32.mrf.mxu1 }
 0x18c   : > { %v577_v60 = vadd.f32 %v962_v40, %v576_v59  ;;  %681 = vst.msk [vmem:[%s970_s10 + $0xe0] sm:$0xff] %vm479_vm3, %v649_v58 }
 0x18e   : > { %v635_v61 = vmax.f32 %v577_v60, 0.0 }
 0x18f   : > { %v613_v62 = vpop.f32.mrf.mxu3 }
 0x190   : > { %667 = vst.msk [vmem:[%s970_s10 + $0x70] sm:$0xff] %vm479_vm3, %v635_v61  ;;  %v614_v63 = vadd.f32 %v962_v40, %v613_v62 }
 0x192   : > { %v650_v0 = vmax.f32 %v614_v63, 0.0 }
 0x193   : > { %v578_v1 = vpop.f32.mrf.mxu1 }
 0x194   : > { %v579_v2 = vadd.f32 %v962_v40, %v578_v1  ;;  %682 = vst.msk [vmem:[%s970_s10 + $0xe8] sm:$0xff] %vm479_vm3, %v650_v0 }
 0x196   : > { %v636_v3 = vmax.f32 %v579_v2, 0.0 }
 0x197   : > { %v616_v4 = vpop.f32.mrf.mxu3 }
 0x198   : > { %668 = vst.msk [vmem:[%s970_s10 + $0x78] sm:$0xff] %vm479_vm3, %v636_v3  ;;  %v617_v5 = vadd.f32 %v962_v40, %v616_v4 }
 0x19a   : > { %v651_v6 = vmax.f32 %v617_v5, 0.0 }
 0x19c   : > { %683 = vst.msk [vmem:[%s970_s10 + $0xf0] sm:$0xff] %vm479_vm3, %v651_v6 }
 0x19f   : > { %v618_v7 = vpop.f32.mrf.mxu3 }
 0x1a0   : > { %v619_v8 = vadd.f32 %v962_v40, %v618_v7 }
 0x1a2   : > { %v652_v9 = vmax.f32 %v619_v8, 0.0 }
 0x1a4   : > { %684 = vst.msk [vmem:[%s970_s10 + $0xf8] sm:$0xff] %vm479_vm3, %v652_v9 }
 0x1a5 PF: > { %s15_s18 = sadd.s32 1, %s802_s18  }
 0x1a6   : > { %p12_p4 = scmp.ge.s32.totalorder %s15_s18, 4  }
 0x1a8   :  { %14 = sbr.rel (!%p12_p4) target bundleno = 1 (0x1), region = 70 }

// kernel: forward.10
= control target key start
LH: loop header
LB: loop body
LE: loop exit
PB: predicated region body
PF: predicated region fallthrough
CT: control target
= control target key end

     0   :  { %s477_s15 = smov 0   ;;  %s706_s0 = inlined_call_operand.vmem [shape: f32[2,4,512], index: 0, kind: input, shape index: {}]   ;;  %s707_s1 = inlined_call_operand.vmem [shape: f32[512,32], index: 1, kind: input, shape index: {}]   ;;  %s708_s2 = inlined_call_operand.vmem [shape: f32[1,32], index: 2, kind: input, shape index: {}]   ;;  %s709_s3 = inlined_call_operand.vmem [shape: f32[4,32], index: 3, kind: input, shape index: {}]   ;;  %s710_s4 = inlined_call_operand.vmem [shape: f32[2,4,32], index: 4, kind: output, shape index: {}]  }
   0x1 LB: > { %s424_s16 = sadd.s32 4294967295, %s450_s15   ;;  %p428_p0 = scmp.ge.s32.totalorder %s450_s15, 1  ;;  %s450_s15 = sphi %s477_s15, %s14_s15  }
   0x2   : > { %p162_p1 = scmp.lt.s32.totalorder %s450_s15, 3 }
   0x4   : > { %p163_p2 = pnand %p428_p0, %p162_p1 }
   0x5   : > { %p559_p3 = scmp.lt.s32.totalorder (!%p163_p2), %s424_s16, 1 }
   0x6   : > { %166 = sbr.rel (%p163_p2) target bundleno = 188 (0xbc), region = 36 }
   0xb   : > { %v212_v0 = vld [vmem:[%s707_s1 + $0x70] sm:$0xff]  ;;  %v213_v1 = vld [vmem:[%s707_s1 + $0x78] sm:$0xff]  ;;  %v210_v11 = vld [vmem:[%s707_s1 + $0x60] sm:$0xff]  ;;  %s713_s16 = smov (!%p559_p3, %s424_s16), 1  ;;  %vm369_vm0 = vcmask 257024  }
   0xc   : > { %v228_v2 = vld [vmem:[%s707_s1 + $0xf0] sm:$0xff]  ;;  %v286_v3 = vpack.c.bf16 %v213_v1, %v212_v0  ;;  %v229_v4 = vld [vmem:[%s707_s1 + $0xf8] sm:$0xff]  ;;  %v211_v13 = vld [vmem:[%s707_s1 + $0x68] sm:$0xff]  ;;  %s434_s26 = sshll.u32 %s713_s16, 4  ;;  %s431_s6 = sshll.u32 %s713_s16, 2 }
   0xd   : > { %v244_v5 = vld [vmem:[%s707_s1 + $0x170] sm:$0xff]  ;;  %v245_v6 = vld [vmem:[%s707_s1 + $0x178] sm:$0xff]  ;;  %v294_v7 = vpack.c.bf16 %v229_v4, %v228_v2  ;;  %v226_v14 = vld [vmem:[%s707_s1 + $0xe0] sm:$0xff]  ;;  %v285_v16 = vpack.c.bf16 %v211_v13, %v210_v11  ;;  %s191_s21 = scalar_lea.vmem %s706_s0, %s434_s26  ;;  %s195_s11 = scalar_lea.vmem %s710_s4, %s431_s6 }
   0xe   : > { %v302_v8 = vpack.c.bf16 %v245_v6, %v244_v5  ;;  %v260_v9 = vld [vmem:[%s707_s1 + $0x1f0] sm:$0xff]  ;;  %v261_v10 = vld [vmem:[%s707_s1 + $0x1f8] sm:$0xff]  ;;  %315 = vmatpush.bf16.msra.mxu0 %v286_v3  ;;  %v227_v15 = vld [vmem:[%s707_s1 + $0xe8] sm:$0xff] }
   0xf   : > { %v310_v12 = vpack.c.bf16 %v261_v10, %v260_v9  ;;  %328 = vmatpush.bf16.msra.mxu1 %v294_v7  ;;  %v293_v17 = vpack.c.bf16 %v227_v15, %v226_v14  ;;  %v242_v18 = vld [vmem:[%s707_s1 + $0x160] sm:$0xff]  ;;  %v243_v19 = vld [vmem:[%s707_s1 + $0x168] sm:$0xff]  ;;  %v208_v23 = vld [vmem:[%s707_s1 + $0x50] sm:$0xff] }
  0x10   : > { %341 = vmatpush.bf16.msra.mxu2 %v302_v8  ;;  %v258_v20 = vld [vmem:[%s707_s1 + $0x1e0] sm:$0xff]  ;;  %v301_v21 = vpack.c.bf16 %v243_v19, %v242_v18  ;;  %v259_v22 = vld [vmem:[%s707_s1 + $0x1e8] sm:$0xff]  ;;  %v209_v24 = vld [vmem:[%s707_s1 + $0x58] sm:$0xff] }
  0x11   : > { %354 = vmatpush.bf16.msra.mxu3 %v310_v12  ;;  %v309_v25 = vpack.c.bf16 %v259_v22, %v258_v20  ;;  %v224_v26 = vld [vmem:[%s707_s1 + $0xd0] sm:$0xff]  ;;  %v225_v27 = vld [vmem:[%s707_s1 + $0xd8] sm:$0xff]  ;;  %v284_v29 = vpack.c.bf16 %v209_v24, %v208_v23  ;;  %v206_v35 = vld [vmem:[%s707_s1 + $0x40] sm:$0xff] }
  0x12   : > { %v240_v28 = vld [vmem:[%s707_s1 + $0x150] sm:$0xff]  ;;  %316 = vmatpush.bf16.msra.mxu0 %v285_v16  ;;  %v241_v30 = vld [vmem:[%s707_s1 + $0x158] sm:$0xff]  ;;  %v292_v33 = vpack.c.bf16 %v225_v27, %v224_v26  ;;  %v207_v36 = vld [vmem:[%s707_s1 + $0x48] sm:$0xff] }
  0x13   : > { %v256_v31 = vld [vmem:[%s707_s1 + $0x1d0] sm:$0xff]  ;;  %v257_v32 = vld [vmem:[%s707_s1 + $0x1d8] sm:$0xff]  ;;  %329 = vmatpush.bf16.msra.mxu1 %v293_v17  ;;  %v300_v34 = vpack.c.bf16 %v241_v30, %v240_v28  ;;  %v222_v37 = vld [vmem:[%s707_s1 + $0xc0] sm:$0xff]  ;;  %v283_v44 = vpack.c.bf16 %v207_v36, %v206_v35 }
  0x14   : > { %342 = vmatpush.bf16.msra.mxu2 %v301_v21  ;;  %v308_v38 = vpack.c.bf16 %v257_v32, %v256_v31  ;;  %v223_v39 = vld [vmem:[%s707_s1 + $0xc8] sm:$0xff]  ;;  %v238_v40 = vld [vmem:[%s707_s1 + $0x140] sm:$0xff]  ;;  %v204_v47 = vld [vmem:[%s707_s1 + $0x30] sm:$0xff] }
  0x15   : > { %355 = vmatpush.bf16.msra.mxu3 %v309_v25  ;;  %v239_v41 = vld [vmem:[%s707_s1 + $0x148] sm:$0xff]  ;;  %v254_v42 = vld [vmem:[%s707_s1 + $0x1c0] sm:$0xff]  ;;  %v291_v45 = vpack.c.bf16 %v223_v39, %v222_v37  ;;  %v205_v48 = vld [vmem:[%s707_s1 + $0x38] sm:$0xff] }
  0x16   : > { %v255_v43 = vld [vmem:[%s707_s1 + $0x1c8] sm:$0xff]  ;;  %317 = vmatpush.bf16.msra.mxu0 %v284_v29  ;;  %v299_v46 = vpack.c.bf16 %v239_v41, %v238_v40  ;;  %v220_v49 = vld [vmem:[%s707_s1 + $0xb0] sm:$0xff]  ;;  %v221_v51 = vld [vmem:[%s707_s1 + $0xb8] sm:$0xff]  ;;  %v282_v56 = vpack.c.bf16 %v205_v48, %v204_v47 }
  0x17   : > { %330 = vmatpush.bf16.msra.mxu1 %v292_v33  ;;  %v307_v50 = vpack.c.bf16 %v255_v43, %v254_v42  ;;  %v236_v52 = vld [vmem:[%s707_s1 + $0x130] sm:$0xff]  ;;  %v237_v53 = vld [vmem:[%s707_s1 + $0x138] sm:$0xff]  ;;  %v290_v57 = vpack.c.bf16 %v221_v51, %v220_v49  ;;  %v202_v59 = vld [vmem:[%s707_s1 + $0x20] sm:$0xff] }
  0x18   : > { %343 = vmatpush.bf16.msra.mxu2 %v300_v34  ;;  %v252_v54 = vld [vmem:[%s707_s1 + $0x1b0] sm:$0xff]  ;;  %v253_v55 = vld [vmem:[%s707_s1 + $0x1b8] sm:$0xff]  ;;  %v298_v58 = vpack.c.bf16 %v237_v53, %v236_v52  ;;  %v203_v60 = vld [vmem:[%s707_s1 + $0x28] sm:$0xff] }
  0x19   : > { %356 = vmatpush.bf16.msra.mxu3 %v308_v38  ;;  %v218_v61 = vld [vmem:[%s707_s1 + $0xa0] sm:$0xff]  ;;  %v306_v62 = vpack.c.bf16 %v253_v55, %v252_v54  ;;  %v219_v63 = vld [vmem:[%s707_s1 + $0xa8] sm:$0xff]  ;;  %v281_v4 = vpack.c.bf16 %v203_v60, %v202_v59  ;;  %v200_v5 = vld [vmem:[%s707_s1 + $0x10] sm:$0xff] }
  0x1a   : > { %318 = vmatpush.bf16.msra.mxu0 %v283_v44  ;;  %v234_v0 = vld [vmem:[%s707_s1 + $0x120] sm:$0xff]  ;;  %v235_v1 = vld [vmem:[%s707_s1 + $0x128] sm:$0xff]  ;;  %v201_v6 = vld [vmem:[%s707_s1 + $0x18] sm:$0xff]  ;;  %v289_v7 = vpack.c.bf16 %v219_v63, %v218_v61 }
  0x1b   : > { %331 = vmatpush.bf16.msra.mxu1 %v291_v45  ;;  %v250_v2 = vld [vmem:[%s707_s1 + $0x1a0] sm:$0xff]  ;;  %v251_v3 = vld [vmem:[%s707_s1 + $0x1a8] sm:$0xff]  ;;  %v297_v8 = vpack.c.bf16 %v235_v1, %v234_v0  ;;  %v216_v9 = vld [vmem:[%s707_s1 + $0x90] sm:$0xff]  ;;  %v280_v18 = vpack.c.bf16 %v201_v6, %v200_v5 }
  0x1c   : > { %344 = vmatpush.bf16.msra.mxu2 %v299_v46  ;;  %v217_v10 = vld [vmem:[%s707_s1 + $0x98] sm:$0xff]  ;;  %v232_v11 = vld [vmem:[%s707_s1 + $0x110] sm:$0xff]  ;;  %v305_v12 = vpack.c.bf16 %v251_v3, %v250_v2  ;;  %v196_v14 = vld [vmem:[%s191_s21] sm:$0xff] }
  0x1d   : > { %357 = vmatpush.bf16.msra.mxu3 %v307_v50  ;;  %v233_v13 = vld [vmem:[%s707_s1 + $0x118] sm:$0xff]  ;;  %v197_v15 = vld [vmem:[%s191_s21 + $0x8] sm:$0xff]  ;;  %v248_v16 = vld [vmem:[%s707_s1 + $0x190] sm:$0xff]  ;;  %264 = vst [vmem:[#allocation1] ss:$2 sm:$0xff] %v196_v14  ;;  %v288_v19 = vpack.c.bf16 %v217_v10, %v216_v9 }
  0x1e   : > { %319 = vmatpush.bf16.msra.mxu0 %v282_v56  ;;  %v249_v17 = vld [vmem:[%s707_s1 + $0x198] sm:$0xff]  ;;  %266 = vst [vmem:[#allocation1 + $0x10] ss:$2 sm:$0xff] %v197_v15  ;;  %v296_v20 = vpack.c.bf16 %v233_v13, %v232_v11  ;;  %v198_v21 = vld [vmem:[%s707_s1] sm:$0xff]  ;;  %v199_v22 = vld [vmem:[%s707_s1 + $0x8] sm:$0xff] }
  0x1f   : > { %332 = vmatpush.bf16.msra.mxu1 %v290_v57  ;;  %v214_v23 = vld [vmem:[%s707_s1 + $0x80] sm:$0xff]  ;;  %v304_v24 = vpack.c.bf16 %v249_v17, %v248_v16  ;;  %v215_v25 = vld [vmem:[%s707_s1 + $0x88] sm:$0xff]  ;;  %v279_v30 = vpack.c.bf16 %v199_v22, %v198_v21 }
  0x20   : > { %345 = vmatpush.bf16.msra.mxu2 %v298_v58  ;;  %v230_v26 = vld [vmem:[%s707_s1 + $0x100] sm:$0xff]  ;;  %v231_v27 = vld [vmem:[%s707_s1 + $0x108] sm:$0xff]  ;;  %v287_v31 = vpack.c.bf16 %v215_v25, %v214_v23 }
  0x21   : > { %358 = vmatpush.bf16.msra.mxu3 %v306_v62  ;;  %v246_v28 = vld [vmem:[%s707_s1 + $0x180] sm:$0xff]  ;;  %v247_v29 = vld [vmem:[%s707_s1 + $0x188] sm:$0xff]  ;;  %v295_v32 = vpack.c.bf16 %v231_v27, %v230_v26 }
  0x22   : > { %320 = vmatpush.bf16.msra.mxu0 %v281_v4  ;;  %v303_v33 = vpack.c.bf16 %v247_v29, %v246_v28  ;;  %v443_v42 = vld [vmem:[%s708_s2] ss:$0 sm:$0xff] }
  0x23   : > { %333 = vmatpush.bf16.msra.mxu1 %v289_v7  ;;  %v367_v51 = vld [vmem:[%s709_s3] sm:$0xf] }
  0x24   : > { %346 = vmatpush.bf16.msra.mxu2 %v297_v8  ;;  %v267_v34 = vld.sshfl [vmem:[#allocation1] sm:$0xff pattern:$0x75316420]  ;;  %v268_v35 = vld.sshfl [vmem:[#allocation1 + $0x8] sm:$0xff pattern:$0x75316420] }
  0x25   : > { %359 = vmatpush.bf16.msra.mxu3 %v305_v12  ;;  %v275_v36 = vpack.c.bf16 %v267_v34, %v267_v34  ;;  %v269_v37 = vld.sshfl [vmem:[#allocation1 + $0x10] sm:$0xff pattern:$0x75316420]  ;;  %v270_v38 = vld.sshfl [vmem:[#allocation1 + $0x18] sm:$0xff pattern:$0x75316420]  ;;  %v276_v39 = vpack.c.bf16 %v268_v35, %v268_v35 }
  0x26   : > { %321 = vmatpush.bf16.msra.mxu0 %v280_v18  ;;  %v277_v40 = vpack.c.bf16 %v269_v37, %v269_v37  ;;  %v278_v41 = vpack.c.bf16 %v270_v38, %v270_v38 }
  0x27   : > { %334 = vmatpush.bf16.msra.mxu1 %v288_v19 }
  0x28   : > { %347 = vmatpush.bf16.msra.mxu2 %v296_v20 }
  0x29   : > { %360 = vmatpush.bf16.msra.mxu3 %v304_v24 }
  0x2a   : > { %322 = vmatpush.bf16.msra.mxu0 %v279_v30 }
  0x2b   : > { %335 = vmatpush.bf16.msra.mxu1 %v287_v31 }
  0x2c   : > { %348 = vmatpush.bf16.msra.mxu2 %v295_v32 }
  0x2d   : > { %361 = vmatpush.bf16.msra.mxu3 %v303_v33  ;;  %323 = vmatmul.bf16.vlgmr.msra.gmra.mxu0 %v275_v36 }
  0x2e   : > { %336 = vmatmul.bf16.vlgmr.msra.gmra.mxu1 %v276_v39 }
  0x2f   : > { %349 = vmatmul.bf16.vlgmr.msra.gmra.mxu2 %v277_v40 }
  0x30   : > { %362 = vmatmul.bf16.vlgmr.msra.gmra.mxu3 %v278_v41 }
  0xaa   : > { %v324_v43 = vpop.f32.mrf.mxu0 }
  0xab   : > { %v325_v44 = vadd.f32 %v443_v42, %v324_v43  ;;  %v337_v45 = vpop.f32.mrf.mxu1 }
  0xad   : > { %v338_v46 = vadd.f32 %v337_v45, %v325_v44 }
  0xb2   : > { %v350_v47 = vpop.f32.mrf.mxu2  ;;  %v326_v50 = vpop.f32.mrf.mxu0 }
  0xb3   : > { %v351_v48 = vadd.f32 %v350_v47, %v338_v46  ;;  %v363_v49 = vpop.f32.mrf.mxu3  ;;  %v339_v52 = vpop.f32.mrf.mxu1 }
  0xb5   : > { %v364_v53 = vadd.f32 %v363_v49, %v351_v48 }
  0xb7   : > { %v368_v54 = vadd.f32 %v367_v51, %v364_v53 }
  0xb9   : > { %370 = vst.msk [vmem:[%s195_s11] sm:$0xf] %vm369_vm0, %v368_v54 }
  0xba   : > { %v352_v55 = vpop.f32.mrf.mxu2 }
  0xbb   : > { %v365_v56 = vpop.f32.mrf.mxu3 }
  0xbc PF: > { %s14_s15 = sadd.s32 1, %s450_s15  }
  0xbd   : > { %p11_p4 = scmp.ge.s32.totalorder %s14_s15, 4  }
  0xbf   :  { %13 = sbr.rel (!%p11_p4) target bundleno = 1 (0x1), region = 67 }

// kernel: forward.11
= control target key start
LH: loop header
LB: loop body
LE: loop exit
PB: predicated region body
PF: predicated region fallthrough
CT: control target
= control target key end

     0   :  { %s838_s18 = smov 0   ;;  %s1074_s0 = inlined_call_operand.vmem [shape: f32[512,1], index: 0, kind: input, shape index: {}]   ;;  %s1075_s1 = inlined_call_operand.vmem [shape: f32[1,8], index: 1, kind: input, shape index: {}]   ;;  %s1076_s2 = inlined_call_operand.vmem [shape: f32[1,8], index: 2, kind: input, shape index: {}]   ;;  %s1077_s3 = inlined_call_operand.vmem [shape: f32[8,8], index: 3, kind: input, shape index: {}]   ;;  %s1078_s4 = inlined_call_operand.vmem [shape: f32[1,8], index: 4, kind: input, shape index: {}]   ;;  %s1079_s5 = inlined_call_operand.vmem [shape: f32[512,8], index: 5, kind: output, shape index: {}]  }
   0x1 LB: > { %s743_s19 = sadd.s32 4294967295, %s805_s18   ;;  %p747_p0 = scmp.ge.s32.totalorder %s805_s18, 1  ;;  %s805_s18 = sphi %s838_s18, %s15_s18  }
   0x2   : > { %p188_p1 = scmp.lt.s32.totalorder %s805_s18, 3 }
   0x4   : > { %p189_p2 = pnand %p747_p0, %p188_p1 }
   0x5   : > { %s748_s22 = sshll.u32 (!%p189_p2), %s743_s19, 5 }
   0x6   : > { %192 = sbr.rel (%p189_p2) target bundleno = 422 (0x1a6), region = 40  ;;  %p217_p3 = scmp.lt.s32.totalorder (!%p189_p2), %s748_s22, 63 }
   0xb   : > { %v261_v0 = vld [vmem:[%s1075_s1] sm:$0x1]  ;;  %vm332_vm0 = vcmask 1040384   ;;  %v807_v2 = vmov 0   ;;  %s1081_s22 = smov (!%p217_p3, %s748_s22), 63  ;;  %vm283_vm1 = vcmask 7168  }
   0xc   : > { %v278_v1 = vpack.c.bf16 %v261_v0, %v261_v0  ;;  %v334_v3 = vsel %vm332_vm0, 65535, %v807_v2  ;;  %s749_s23 = sshll.u32 %s1081_s22, 3  ;;  %v459_v47 = vld [vmem:[%s1077_s3] sm:$0xff]  ;;  %vm530_vm2 = vcmask 1043456   ;;  %vm481_vm3 = vcmask 64512  }
   0xd   : > { %s857_s26 = scalar_lea.vmem %s1074_s0, %s749_s23  ;;  %v476_v48 = vpack.c.bf16 %v459_v47, %v459_v47  ;;  %v913_v57 = vld [vmem:[%s1076_s2] ss:$0 sm:$0xff]  ;;  %s974_s10 = scalar_lea.vmem %s1079_s5, %s749_s23 }
   0xe   : > { %v336_v4 = vand.u32 %v334_v3, %v278_v1  ;;  %v229_v5 = vld [vmem:[%s857_s26] sm:$0xff]  ;;  %v230_v6 = vld [vmem:[%s857_s26 + $0x8] sm:$0xff]  ;;  %v231_v11 = vld [vmem:[%s857_s26 + $0x10] sm:$0xff] }
   0xf   : > { %v245_v7 = vld [vmem:[%s857_s26 + $0x80] sm:$0xff]  ;;  %v262_v8 = vpack.c.bf16 %v230_v6, %v229_v5  ;;  %v246_v9 = vld [vmem:[%s857_s26 + $0x88] sm:$0xff]  ;;  %v232_v12 = vld [vmem:[%s857_s26 + $0x18] sm:$0xff]  ;;  %v532_v51 = vsel %vm530_vm2, %v476_v48, 0 }
  0x10   : > { %345 = vmatpush.bf16.msra.mxu0 %v336_v4  ;;  %786 = vmatpush.bf16.msra.mxu2 %v336_v4  ;;  %v270_v10 = vpack.c.bf16 %v246_v9, %v245_v7  ;;  %v247_v13 = vld [vmem:[%s857_s26 + $0x90] sm:$0xff]  ;;  %v248_v14 = vld [vmem:[%s857_s26 + $0x98] sm:$0xff]  ;;  %v263_v15 = vpack.c.bf16 %v232_v12, %v231_v11  ;;  %v233_v17 = vld [vmem:[%s857_s26 + $0x20] sm:$0xff] }
  0x11   : > { %v271_v16 = vpack.c.bf16 %v248_v14, %v247_v13  ;;  %v234_v18 = vld [vmem:[%s857_s26 + $0x28] sm:$0xff]  ;;  %v249_v19 = vld [vmem:[%s857_s26 + $0xa0] sm:$0xff]  ;;  %v235_v23 = vld [vmem:[%s857_s26 + $0x30] sm:$0xff]  ;;  %541 = vmatpush.bf16.msra.mxu1 %v532_v51  ;;  %787 = vmatpush.bf16.msra.mxu3 %v532_v51 }
  0x12   : > { %v250_v20 = vld [vmem:[%s857_s26 + $0xa8] sm:$0xff]  ;;  %v264_v21 = vpack.c.bf16 %v234_v18, %v233_v17  ;;  %v236_v24 = vld [vmem:[%s857_s26 + $0x38] sm:$0xff]  ;;  %v251_v25 = vld [vmem:[%s857_s26 + $0xb0] sm:$0xff] }
  0x13   : > { %752 = vmatmul.msk.bf16.vlgmr.msra.gmra.mxu0 %vm283_vm1, %v262_v8  ;;  %760 = vmatmul.msk.bf16.vlgmr.msra.gmra.mxu2 %vm283_vm1, %v270_v10  ;;  %v272_v22 = vpack.c.bf16 %v250_v20, %v249_v19  ;;  %v252_v26 = vld [vmem:[%s857_s26 + $0xb8] sm:$0xff]  ;;  %v265_v27 = vpack.c.bf16 %v236_v24, %v235_v23  ;;  %v237_v29 = vld [vmem:[%s857_s26 + $0x40] sm:$0xff]  ;;  %v238_v30 = vld [vmem:[%s857_s26 + $0x48] sm:$0xff] }
  0x14   : > { %v273_v28 = vpack.c.bf16 %v252_v26, %v251_v25  ;;  %v253_v31 = vld [vmem:[%s857_s26 + $0xc0] sm:$0xff]  ;;  %v254_v32 = vld [vmem:[%s857_s26 + $0xc8] sm:$0xff]  ;;  %v266_v33 = vpack.c.bf16 %v238_v30, %v237_v29  ;;  %v239_v35 = vld [vmem:[%s857_s26 + $0x50] sm:$0xff] }
  0x15   : > { %v274_v34 = vpack.c.bf16 %v254_v32, %v253_v31  ;;  %v240_v36 = vld [vmem:[%s857_s26 + $0x58] sm:$0xff]  ;;  %v255_v37 = vld [vmem:[%s857_s26 + $0xd0] sm:$0xff]  ;;  %v241_v41 = vld [vmem:[%s857_s26 + $0x60] sm:$0xff] }
  0x16   : > { %v256_v38 = vld [vmem:[%s857_s26 + $0xd8] sm:$0xff]  ;;  %v267_v39 = vpack.c.bf16 %v240_v36, %v239_v35  ;;  %v242_v42 = vld [vmem:[%s857_s26 + $0x68] sm:$0xff]  ;;  %v257_v43 = vld [vmem:[%s857_s26 + $0xe0] sm:$0xff] }
  0x17   : > { %v275_v40 = vpack.c.bf16 %v256_v38, %v255_v37  ;;  %v258_v44 = vld [vmem:[%s857_s26 + $0xe8] sm:$0xff]  ;;  %v268_v45 = vpack.c.bf16 %v242_v42, %v241_v41  ;;  %v243_v49 = vld [vmem:[%s857_s26 + $0x70] sm:$0xff]  ;;  %v244_v50 = vld [vmem:[%s857_s26 + $0x78] sm:$0xff] }
  0x18   : > { %v276_v46 = vpack.c.bf16 %v258_v44, %v257_v43  ;;  %v259_v52 = vld [vmem:[%s857_s26 + $0xf0] sm:$0xff]  ;;  %v260_v53 = vld [vmem:[%s857_s26 + $0xf8] sm:$0xff]  ;;  %v269_v54 = vpack.c.bf16 %v244_v50, %v243_v49 }
  0x19   : > { %v277_v55 = vpack.c.bf16 %v260_v53, %v259_v52 }
  0x23   : > { %753 = vmatmul.msk.bf16.gmra.mxu0 %vm283_vm1, %v263_v15  ;;  %761 = vmatmul.msk.bf16.gmra.mxu2 %vm283_vm1, %v271_v16 }
  0x33   : > { %754 = vmatmul.msk.bf16.gmra.mxu0 %vm283_vm1, %v264_v21  ;;  %762 = vmatmul.msk.bf16.gmra.mxu2 %vm283_vm1, %v272_v22 }
  0x43   : > { %755 = vmatmul.msk.bf16.gmra.mxu0 %vm283_vm1, %v265_v27  ;;  %763 = vmatmul.msk.bf16.gmra.mxu2 %vm283_vm1, %v273_v28 }
  0x53   : > { %756 = vmatmul.msk.bf16.gmra.mxu0 %vm283_vm1, %v266_v33  ;;  %764 = vmatmul.msk.bf16.gmra.mxu2 %vm283_vm1, %v274_v34 }
  0x63   : > { %757 = vmatmul.msk.bf16.gmra.mxu0 %vm283_vm1, %v267_v39  ;;  %765 = vmatmul.msk.bf16.gmra.mxu2 %vm283_vm1, %v275_v40 }
  0x73   : > { %758 = vmatmul.msk.bf16.gmra.mxu0 %vm283_vm1, %v268_v45  ;;  %766 = vmatmul.msk.bf16.gmra.mxu2 %vm283_vm1, %v276_v46 }
  0x83   : > { %759 = vmatmul.msk.bf16.gmra.mxu0 %vm283_vm1, %v269_v54  ;;  %767 = vmatmul.msk.bf16.gmra.mxu2 %vm283_vm1, %v277_v55 }
  0x90   : > { %v347_v56 = vpop.f32.mrf.mxu0 }
  0x91   : > { %v348_v58 = vadd.f32 %v913_v57, %v347_v56 }
  0x93   : > { %v427_v61 = vmax.f32 %v348_v58, 0.0 }
  0x96   : > { %v387_v59 = vpop.f32.mrf.mxu2 }
  0x97   : > { %v388_v1 = vadd.f32 %v913_v57, %v387_v59 }
  0x98   : > { %v349_v60 = vpop.f32.mrf.mxu0 }
  0x99   : > { %v350_v62 = vadd.f32 %v913_v57, %v349_v60  ;;  %v443_v5 = vmax.f32 %v388_v1, 0.0 }
  0x9b   : > { %v428_v63 = vmax.f32 %v350_v62, 0.0 }
  0x9d   : > { %v460_v0 = vpack.c.bf16 %v428_v63, %v427_v61 }
  0x9e   : > { %v389_v2 = vpop.f32.mrf.mxu2 }
  0x9f   : > { %768 = vmatmul.msk.bf16.vlgmr.msra.gmra.mxu1 %vm481_vm3, %v460_v0  ;;  %v390_v3 = vadd.f32 %v913_v57, %v389_v2 }
  0xa0   : > { %v352_v4 = vpop.f32.mrf.mxu0 }
  0xa1   : > { %v444_v6 = vmax.f32 %v390_v3, 0.0  ;;  %v353_v8 = vadd.f32 %v913_v57, %v352_v4 }
  0xa3   : > { %v468_v7 = vpack.c.bf16 %v444_v6, %v443_v5  ;;  %v429_v11 = vmax.f32 %v353_v8, 0.0 }
  0xa5   : > { %776 = vmatmul.msk.bf16.vlgmr.msra.gmra.mxu3 %vm481_vm3, %v468_v7 }
  0xa6   : > { %v392_v9 = vpop.f32.mrf.mxu2 }
  0xa7   : > { %v393_v15 = vadd.f32 %v913_v57, %v392_v9 }
  0xa8   : > { %v354_v10 = vpop.f32.mrf.mxu0 }
  0xa9   : > { %v355_v12 = vadd.f32 %v913_v57, %v354_v10  ;;  %v445_v19 = vmax.f32 %v393_v15, 0.0 }
  0xab   : > { %v430_v13 = vmax.f32 %v355_v12, 0.0 }
  0xad   : > { %v461_v14 = vpack.c.bf16 %v430_v13, %v429_v11 }
  0xae   : > { %v394_v16 = vpop.f32.mrf.mxu2 }
  0xaf   : > { %769 = vmatmul.msk.bf16.gmra.mxu1 %vm481_vm3, %v461_v14  ;;  %v395_v17 = vadd.f32 %v913_v57, %v394_v16 }
  0xb0   : > { %v357_v18 = vpop.f32.mrf.mxu0 }
  0xb1   : > { %v446_v20 = vmax.f32 %v395_v17, 0.0  ;;  %v358_v22 = vadd.f32 %v913_v57, %v357_v18 }
  0xb3   : > { %v469_v21 = vpack.c.bf16 %v446_v20, %v445_v19  ;;  %v431_v25 = vmax.f32 %v358_v22, 0.0 }
  0xb5   : > { %777 = vmatmul.msk.bf16.gmra.mxu3 %vm481_vm3, %v469_v21 }
  0xb6   : > { %v397_v23 = vpop.f32.mrf.mxu2 }
  0xb7   : > { %v398_v29 = vadd.f32 %v913_v57, %v397_v23 }
  0xb8   : > { %v359_v24 = vpop.f32.mrf.mxu0 }
  0xb9   : > { %v360_v26 = vadd.f32 %v913_v57, %v359_v24  ;;  %v447_v33 = vmax.f32 %v398_v29, 0.0 }
  0xbb   : > { %v432_v27 = vmax.f32 %v360_v26, 0.0 }
  0xbd   : > { %v462_v28 = vpack.c.bf16 %v432_v27, %v431_v25 }
  0xbe   : > { %v399_v30 = vpop.f32.mrf.mxu2 }
  0xbf   : > { %770 = vmatmul.msk.bf16.gmra.mxu1 %vm481_vm3, %v462_v28  ;;  %v400_v31 = vadd.f32 %v913_v57, %v399_v30 }
  0xc0   : > { %v362_v32 = vpop.f32.mrf.mxu0 }
  0xc1   : > { %v448_v34 = vmax.f32 %v400_v31, 0.0  ;;  %v363_v36 = vadd.f32 %v913_v57, %v362_v32 }
  0xc3   : > { %v470_v35 = vpack.c.bf16 %v448_v34, %v447_v33  ;;  %v433_v39 = vmax.f32 %v363_v36, 0.0 }
  0xc5   : > { %778 = vmatmul.msk.bf16.gmra.mxu3 %vm481_vm3, %v470_v35 }
  0xc6   : > { %v402_v37 = vpop.f32.mrf.mxu2 }
  0xc7   : > { %v403_v43 = vadd.f32 %v913_v57, %v402_v37 }
  0xc8   : > { %v364_v38 = vpop.f32.mrf.mxu0 }
  0xc9   : > { %v365_v40 = vadd.f32 %v913_v57, %v364_v38  ;;  %v449_v47 = vmax.f32 %v403_v43, 0.0 }
  0xcb   : > { %v434_v41 = vmax.f32 %v365_v40, 0.0 }
  0xcd   : > { %v463_v42 = vpack.c.bf16 %v434_v41, %v433_v39 }
  0xce   : > { %v404_v44 = vpop.f32.mrf.mxu2 }
  0xcf   : > { %771 = vmatmul.msk.bf16.gmra.mxu1 %vm481_vm3, %v463_v42  ;;  %v405_v45 = vadd.f32 %v913_v57, %v404_v44  ;;  %v966_v42 = vld [vmem:[%s1078_s4] ss:$0 sm:$0xff] }
  0xd0   : > { %v367_v46 = vpop.f32.mrf.mxu0 }
  0xd1   : > { %v450_v48 = vmax.f32 %v405_v45, 0.0  ;;  %v368_v50 = vadd.f32 %v913_v57, %v367_v46 }
  0xd3   : > { %v471_v49 = vpack.c.bf16 %v450_v48, %v449_v47  ;;  %v435_v53 = vmax.f32 %v368_v50, 0.0 }
  0xd5   : > { %779 = vmatmul.msk.bf16.gmra.mxu3 %vm481_vm3, %v471_v49 }
  0xd6   : > { %v407_v51 = vpop.f32.mrf.mxu2 }
  0xd7   : > { %v408_v58 = vadd.f32 %v913_v57, %v407_v51 }
  0xd8   : > { %v369_v52 = vpop.f32.mrf.mxu0 }
  0xd9   : > { %v370_v54 = vadd.f32 %v913_v57, %v369_v52  ;;  %v451_v62 = vmax.f32 %v408_v58, 0.0 }
  0xdb   : > { %v436_v55 = vmax.f32 %v370_v54, 0.0 }
  0xdd   : > { %v464_v56 = vpack.c.bf16 %v436_v55, %v435_v53 }
  0xde   : > { %v409_v59 = vpop.f32.mrf.mxu2 }
  0xdf   : > { %772 = vmatmul.msk.bf16.gmra.mxu1 %vm481_vm3, %v464_v56  ;;  %v410_v60 = vadd.f32 %v913_v57, %v409_v59 }
  0xe0   : > { %v372_v61 = vpop.f32.mrf.mxu0 }
  0xe1   : > { %v452_v63 = vmax.f32 %v410_v60, 0.0  ;;  %v373_v1 = vadd.f32 %v913_v57, %v372_v61 }
  0xe3   : > { %v472_v0 = vpack.c.bf16 %v452_v63, %v451_v62  ;;  %v437_v4 = vmax.f32 %v373_v1, 0.0 }
  0xe5   : > { %780 = vmatmul.msk.bf16.gmra.mxu3 %vm481_vm3, %v472_v0 }
  0xe6   : > { %v412_v2 = vpop.f32.mrf.mxu2 }
  0xe7   : > { %v413_v8 = vadd.f32 %v913_v57, %v412_v2 }
  0xe8   : > { %v374_v3 = vpop.f32.mrf.mxu0 }
  0xe9   : > { %v375_v5 = vadd.f32 %v913_v57, %v374_v3  ;;  %v453_v12 = vmax.f32 %v413_v8, 0.0 }
  0xeb   : > { %v438_v6 = vmax.f32 %v375_v5, 0.0 }
  0xed   : > { %v465_v7 = vpack.c.bf16 %v438_v6, %v437_v4 }
  0xee   : > { %v414_v9 = vpop.f32.mrf.mxu2 }
  0xef   : > { %773 = vmatmul.msk.bf16.gmra.mxu1 %vm481_vm3, %v465_v7  ;;  %v415_v10 = vadd.f32 %v913_v57, %v414_v9 }
  0xf0   : > { %v377_v11 = vpop.f32.mrf.mxu0 }
  0xf1   : > { %v454_v13 = vmax.f32 %v415_v10, 0.0  ;;  %v378_v15 = vadd.f32 %v913_v57, %v377_v11 }
  0xf3   : > { %v473_v14 = vpack.c.bf16 %v454_v13, %v453_v12  ;;  %v439_v18 = vmax.f32 %v378_v15, 0.0 }
  0xf5   : > { %781 = vmatmul.msk.bf16.gmra.mxu3 %vm481_vm3, %v473_v14 }
  0xf6   : > { %v417_v16 = vpop.f32.mrf.mxu2 }
  0xf7   : > { %v418_v22 = vadd.f32 %v913_v57, %v417_v16 }
  0xf8   : > { %v379_v17 = vpop.f32.mrf.mxu0 }
  0xf9   : > { %v380_v19 = vadd.f32 %v913_v57, %v379_v17  ;;  %v455_v26 = vmax.f32 %v418_v22, 0.0 }
  0xfb   : > { %v440_v20 = vmax.f32 %v380_v19, 0.0 }
  0xfd   : > { %v466_v21 = vpack.c.bf16 %v440_v20, %v439_v18 }
  0xfe   : > { %v419_v23 = vpop.f32.mrf.mxu2 }
  0xff   : > { %774 = vmatmul.msk.bf16.gmra.mxu1 %vm481_vm3, %v466_v21  ;;  %v420_v24 = vadd.f32 %v913_v57, %v419_v23 }
 0x100   : > { %v382_v25 = vpop.f32.mrf.mxu0 }
 0x101   : > { %v456_v27 = vmax.f32 %v420_v24, 0.0  ;;  %v383_v29 = vadd.f32 %v913_v57, %v382_v25 }
 0x103   : > { %v474_v28 = vpack.c.bf16 %v456_v27, %v455_v26  ;;  %v441_v32 = vmax.f32 %v383_v29, 0.0 }
 0x105   : > { %782 = vmatmul.msk.bf16.gmra.mxu3 %vm481_vm3, %v474_v28 }
 0x106   : > { %v422_v30 = vpop.f32.mrf.mxu2 }
 0x107   : > { %v423_v36 = vadd.f32 %v913_v57, %v422_v30 }
 0x108   : > { %v384_v31 = vpop.f32.mrf.mxu0 }
 0x109   : > { %v385_v33 = vadd.f32 %v913_v57, %v384_v31  ;;  %v457_v39 = vmax.f32 %v423_v36, 0.0 }
 0x10b   : > { %v442_v34 = vmax.f32 %v385_v33, 0.0 }
 0x10d   : > { %v467_v35 = vpack.c.bf16 %v442_v34, %v441_v32 }
 0x10e   : > { %v424_v37 = vpop.f32.mrf.mxu2 }
 0x10f   : > { %775 = vmatmul.msk.bf16.gmra.mxu1 %vm481_vm3, %v467_v35  ;;  %v425_v38 = vadd.f32 %v913_v57, %v424_v37 }
 0x111   : > { %v458_v40 = vmax.f32 %v425_v38, 0.0 }
 0x113   : > { %v475_v41 = vpack.c.bf16 %v458_v40, %v457_v39 }
 0x115   : > { %783 = vmatmul.msk.bf16.gmra.mxu3 %vm481_vm3, %v475_v41 }
 0x11c   : > { %v543_v43 = vpop.f32.mrf.mxu1 }
 0x11d   : > { %v544_v44 = vadd.f32 %v966_v42, %v543_v43 }
 0x11f   : > { %v623_v57 = vmax.f32 %v544_v44, 0.0 }
 0x121   : > { %655 = vst.msk [vmem:[%s974_s10] sm:$0xff] %vm481_vm3, %v623_v57 }
 0x124   : > { %v545_v45 = vpop.f32.mrf.mxu1 }
 0x125   : > { %v546_v46 = vadd.f32 %v966_v42, %v545_v45 }
 0x127   : > { %v624_v47 = vmax.f32 %v546_v46, 0.0 }
 0x128   : > { %v583_v48 = vpop.f32.mrf.mxu3 }
 0x129   : > { %656 = vst.msk [vmem:[%s974_s10 + $0x8] sm:$0xff] %vm481_vm3, %v624_v47  ;;  %v584_v49 = vadd.f32 %v966_v42, %v583_v48 }
 0x12b   : > { %v639_v50 = vmax.f32 %v584_v49, 0.0 }
 0x12c   : > { %v548_v51 = vpop.f32.mrf.mxu1 }
 0x12d   : > { %v549_v52 = vadd.f32 %v966_v42, %v548_v51  ;;  %671 = vst.msk [vmem:[%s974_s10 + $0x80] sm:$0xff] %vm481_vm3, %v639_v50 }
 0x12f   : > { %v625_v53 = vmax.f32 %v549_v52, 0.0 }
 0x130   : > { %v585_v54 = vpop.f32.mrf.mxu3 }
 0x131   : > { %657 = vst.msk [vmem:[%s974_s10 + $0x10] sm:$0xff] %vm481_vm3, %v625_v53  ;;  %v586_v55 = vadd.f32 %v966_v42, %v585_v54 }
 0x133   : > { %v640_v56 = vmax.f32 %v586_v55, 0.0 }
 0x134   : > { %v550_v58 = vpop.f32.mrf.mxu1 }
 0x135   : > { %v551_v59 = vadd.f32 %v966_v42, %v550_v58  ;;  %672 = vst.msk [vmem:[%s974_s10 + $0x88] sm:$0xff] %vm481_vm3, %v640_v56 }
 0x137   : > { %v626_v60 = vmax.f32 %v551_v59, 0.0 }
 0x138   : > { %v588_v61 = vpop.f32.mrf.mxu3 }
 0x139   : > { %658 = vst.msk [vmem:[%s974_s10 + $0x18] sm:$0xff] %vm481_vm3, %v626_v60  ;;  %v589_v62 = vadd.f32 %v966_v42, %v588_v61 }
 0x13b   : > { %v641_v63 = vmax.f32 %v589_v62, 0.0 }
 0x13c   : > { %v553_v0 = vpop.f32.mrf.mxu1 }
 0x13d   : > { %v554_v1 = vadd.f32 %v966_v42, %v553_v0  ;;  %673 = vst.msk [vmem:[%s974_s10 + $0x90] sm:$0xff] %vm481_vm3, %v641_v63 }
 0x13f   : > { %v627_v2 = vmax.f32 %v554_v1, 0.0 }
 0x140   : > { %v590_v3 = vpop.f32.mrf.mxu3 }
 0x141   : > { %659 = vst.msk [vmem:[%s974_s10 + $0x20] sm:$0xff] %vm481_vm3, %v627_v2  ;;  %v591_v4 = vadd.f32 %v966_v42, %v590_v3 }
 0x143   : > { %v642_v5 = vmax.f32 %v591_v4, 0.0 }
 0x144   : > { %v555_v6 = vpop.f32.mrf.mxu1 }
 0x145   : > { %v556_v7 = vadd.f32 %v966_v42, %v555_v6  ;;  %674 = vst.msk [vmem:[%s974_s10 + $0x98] sm:$0xff] %vm481_vm3, %v642_v5 }
 0x147   : > { %v628_v8 = vmax.f32 %v556_v7, 0.0 }
 0x148   : > { %v593_v9 = vpop.f32.mrf.mxu3 }
 0x149   : > { %660 = vst.msk [vmem:[%s974_s10 + $0x28] sm:$0xff] %vm481_vm3, %v628_v8  ;;  %v594_v10 = vadd.f32 %v966_v42, %v593_v9 }
 0x14b   : > { %v643_v11 = vmax.f32 %v594_v10, 0.0 }
 0x14c   : > { %v558_v12 = vpop.f32.mrf.mxu1 }
 0x14d   : > { %v559_v13 = vadd.f32 %v966_v42, %v558_v12  ;;  %675 = vst.msk [vmem:[%s974_s10 + $0xa0] sm:$0xff] %vm481_vm3, %v643_v11 }
 0x14f   : > { %v629_v14 = vmax.f32 %v559_v13, 0.0 }
 0x150   : > { %v595_v15 = vpop.f32.mrf.mxu3 }
 0x151   : > { %661 = vst.msk [vmem:[%s974_s10 + $0x30] sm:$0xff] %vm481_vm3, %v629_v14  ;;  %v596_v16 = vadd.f32 %v966_v42, %v595_v15 }
 0x153   : > { %v644_v17 = vmax.f32 %v596_v16, 0.0 }
 0x154   : > { %v560_v18 = vpop.f32.mrf.mxu1 }
 0x155   : > { %v561_v19 = vadd.f32 %v966_v42, %v560_v18  ;;  %676 = vst.msk [vmem:[%s974_s10 + $0xa8] sm:$0xff] %vm481_vm3, %v644_v17 }
 0x157   : > { %v630_v20 = vmax.f32 %v561_v19, 0.0 }
 0x158   : > { %v598_v21 = vpop.f32.mrf.mxu3 }
 0x159   : > { %662 = vst.msk [vmem:[%s974_s10 + $0x38] sm:$0xff] %vm481_vm3, %v630_v20  ;;  %v599_v22 = vadd.f32 %v966_v42, %v598_v21 }
 0x15b   : > { %v645_v23 = vmax.f32 %v599_v22, 0.0 }
 0x15c   : > { %v563_v24 = vpop.f32.mrf.mxu1 }
 0x15d   : > { %v564_v25 = vadd.f32 %v966_v42, %v563_v24  ;;  %677 = vst.msk [vmem:[%s974_s10 + $0xb0] sm:$0xff] %vm481_vm3, %v645_v23 }
 0x15f   : > { %v631_v26 = vmax.f32 %v564_v25, 0.0 }
 0x160   : > { %v600_v27 = vpop.f32.mrf.mxu3 }
 0x161   : > { %663 = vst.msk [vmem:[%s974_s10 + $0x40] sm:$0xff] %vm481_vm3, %v631_v26  ;;  %v601_v28 = vadd.f32 %v966_v42, %v600_v27 }
 0x163   : > { %v646_v29 = vmax.f32 %v601_v28, 0.0 }
 0x164   : > { %v565_v30 = vpop.f32.mrf.mxu1 }
 0x165   : > { %v566_v31 = vadd.f32 %v966_v42, %v565_v30  ;;  %678 = vst.msk [vmem:[%s974_s10 + $0xb8] sm:$0xff] %vm481_vm3, %v646_v29 }
 0x167   : > { %v632_v32 = vmax.f32 %v566_v31, 0.0 }
 0x168   : > { %v603_v33 = vpop.f32.mrf.mxu3 }
 0x169   : > { %664 = vst.msk [vmem:[%s974_s10 + $0x48] sm:$0xff] %vm481_vm3, %v632_v32  ;;  %v604_v34 = vadd.f32 %v966_v42, %v603_v33 }
 0x16b   : > { %v647_v35 = vmax.f32 %v604_v34, 0.0 }
 0x16c   : > { %v568_v36 = vpop.f32.mrf.mxu1 }
 0x16d   : > { %v569_v37 = vadd.f32 %v966_v42, %v568_v36  ;;  %679 = vst.msk [vmem:[%s974_s10 + $0xc0] sm:$0xff] %vm481_vm3, %v647_v35 }
 0x16f   : > { %v633_v38 = vmax.f32 %v569_v37, 0.0 }
 0x170   : > { %v605_v39 = vpop.f32.mrf.mxu3 }
 0x171   : > { %665 = vst.msk [vmem:[%s974_s10 + $0x50] sm:$0xff] %vm481_vm3, %v633_v38  ;;  %v606_v40 = vadd.f32 %v966_v42, %v605_v39 }
 0x173   : > { %v648_v41 = vmax.f32 %v606_v40, 0.0 }
 0x174   : > { %v570_v43 = vpop.f32.mrf.mxu1 }
 0x175   : > { %v571_v44 = vadd.f32 %v966_v42, %v570_v43  ;;  %680 = vst.msk [vmem:[%s974_s10 + $0xc8] sm:$0xff] %vm481_vm3, %v648_v41 }
 0x177   : > { %v634_v57 = vmax.f32 %v571_v44, 0.0 }
 0x178   : > { %v608_v45 = vpop.f32.mrf.mxu3 }
 0x179   : > { %666 = vst.msk [vmem:[%s974_s10 + $0x58] sm:$0xff] %vm481_vm3, %v634_v57  ;;  %v609_v46 = vadd.f32 %v966_v42, %v608_v45 }
 0x17b   : > { %v649_v47 = vmax.f32 %v609_v46, 0.0 }
 0x17c   : > { %v573_v48 = vpop.f32.mrf.mxu1 }
 0x17d   : > { %v574_v49 = vadd.f32 %v966_v42, %v573_v48  ;;  %681 = vst.msk [vmem:[%s974_s10 + $0xd0] sm:$0xff] %vm481_vm3, %v649_v47 }
 0x17f   : > { %v635_v50 = vmax.f32 %v574_v49, 0.0 }
 0x180   : > { %v610_v51 = vpop.f32.mrf.mxu3 }
 0x181   : > { %667 = vst.msk [vmem:[%s974_s10 + $0x60] sm:$0xff] %vm481_vm3, %v635_v50  ;;  %v611_v52 = vadd.f32 %v966_v42, %v610_v51 }
 0x183   : > { %v650_v53 = vmax.f32 %v611_v52, 0.0 }
 0x184   : > { %v575_v54 = vpop.f32.mrf.mxu1 }
 0x185   : > { %v576_v55 = vadd.f32 %v966_v42, %v575_v54  ;;  %682 = vst.msk [vmem:[%s974_s10 + $0xd8] sm:$0xff] %vm481_vm3, %v650_v53 }
 0x187   : > { %v636_v56 = vmax.f32 %v576_v55, 0.0 }
 0x188   : > { %v613_v58 = vpop.f32.mrf.mxu3 }
 0x189   : > { %668 = vst.msk [vmem:[%s974_s10 + $0x68] sm:$0xff] %vm481_vm3, %v636_v56  ;;  %v614_v59 = vadd.f32 %v966_v42, %v613_v58 }
 0x18b   : > { %v651_v60 = vmax.f32 %v614_v59, 0.0 }
 0x18c   : > { %v578_v61 = vpop.f32.mrf.mxu1 }
 0x18d   : > { %v579_v62 = vadd.f32 %v966_v42, %v578_v61  ;;  %683 = vst.msk [vmem:[%s974_s10 + $0xe0] sm:$0xff] %vm481_vm3, %v651_v60 }
 0x18f   : > { %v637_v63 = vmax.f32 %v579_v62, 0.0 }
 0x190   : > { %v615_v0 = vpop.f32.mrf.mxu3 }
 0x191   : > { %669 = vst.msk [vmem:[%s974_s10 + $0x70] sm:$0xff] %vm481_vm3, %v637_v63  ;;  %v616_v1 = vadd.f32 %v966_v42, %v615_v0 }
 0x193   : > { %v652_v2 = vmax.f32 %v616_v1, 0.0 }
 0x194   : > { %v580_v3 = vpop.f32.mrf.mxu1 }
 0x195   : > { %v581_v4 = vadd.f32 %v966_v42, %v580_v3  ;;  %684 = vst.msk [vmem:[%s974_s10 + $0xe8] sm:$0xff] %vm481_vm3, %v652_v2 }
 0x197   : > { %v638_v5 = vmax.f32 %v581_v4, 0.0 }
 0x198   : > { %v618_v6 = vpop.f32.mrf.mxu3 }
 0x199   : > { %670 = vst.msk [vmem:[%s974_s10 + $0x78] sm:$0xff] %vm481_vm3, %v638_v5  ;;  %v619_v7 = vadd.f32 %v966_v42, %v618_v6 }
 0x19b   : > { %v653_v8 = vmax.f32 %v619_v7, 0.0 }
 0x19d   : > { %685 = vst.msk [vmem:[%s974_s10 + $0xf0] sm:$0xff] %vm481_vm3, %v653_v8 }
 0x1a0   : > { %v620_v9 = vpop.f32.mrf.mxu3 }
 0x1a1   : > { %v621_v10 = vadd.f32 %v966_v42, %v620_v9 }
 0x1a3   : > { %v654_v11 = vmax.f32 %v621_v10, 0.0 }
 0x1a5   : > { %686 = vst.msk [vmem:[%s974_s10 + $0xf8] sm:$0xff] %vm481_vm3, %v654_v11 }
 0x1a6 PF: > { %s15_s18 = sadd.s32 1, %s805_s18  }
 0x1a7   : > { %p12_p4 = scmp.ge.s32.totalorder %s15_s18, 4  }
 0x1a9   :  { %14 = sbr.rel (!%p12_p4) target bundleno = 1 (0x1), region = 70 }

// kernel: forward.15
= control target key start
LH: loop header
LB: loop body
LE: loop exit
PB: predicated region body
PF: predicated region fallthrough
CT: control target
= control target key end

     0   :  { %vm25_vm0 = vcmask 257024   ;;  %s244_s0 = inlined_call_operand.vmem [shape: f32[4,32], index: 0, kind: input, shape index: {}]   ;;  %s245_s1 = inlined_call_operand.vmem [shape: f32[1,32], index: 1, kind: input, shape index: {}]   ;;  %s246_s2 = inlined_call_operand.vmem [shape: f32[1,32], index: 2, kind: input, shape index: {}]   ;;  %s247_s3 = inlined_call_operand.vmem [shape: f32[64,32], index: 3, kind: input, shape index: {}]   ;;  %s248_s4 = inlined_call_operand.vmem [shape: f32[1,32], index: 4, kind: input, shape index: {}]   ;;  %s249_s5 = inlined_call_operand.hbm [shape: f32[2,32], index: 5, kind: output, shape index: {}]  }
   0x1   :  { %v22_v0 = vld [vmem:[%s244_s0] sm:$0xf] }
   0x2   :  { %v26_v1 = vsel %vm25_vm0, %v22_v0, 0.0 }
   0x3   :  { %27 = vadd.xlane.f32.xlu0 %v26_v1 }
   0x4   :  { %10 = vsyncpa [#allocation3], 0  ;;  %v171_v2 = vmov 32.0   ;;  %v65_v14 = vld [vmem:[%s247_s3 + $0x10] sm:$0xff]  ;;  %v66_v15 = vld [vmem:[%s247_s3 + $0x18] sm:$0xff]  ;;  %vm78_vm5 = vcmask 261120  }
   0x5   :  { %141 = vrcp.f32 %v171_v2  ;;  %v73_v16 = vpack.c.bf16 %v66_v15, %v65_v14  ;;  %v69_v17 = vld [vmem:[%s247_s3 + $0x30] sm:$0xff]  ;;  %v70_v18 = vld [vmem:[%s247_s3 + $0x38] sm:$0xff]  ;;  %v63_v19 = vld [vmem:[%s247_s3] sm:$0xff]  ;;  %s125_s18 = sshll.u32 %s249_s5, 4  ;;  %vm116_vm6 = vcmask 254976   ;;  %s126_s18 = int_to_ptr.hbm [resolvable:$true] %s125_s18 }
   0x6   :  { %v75_v20 = vpack.c.bf16 %v70_v18, %v69_v17  ;;  %v64_v21 = vld [vmem:[%s247_s3 + $0x8] sm:$0xff]  ;;  %v67_v22 = vld [vmem:[%s247_s3 + $0x20] sm:$0xff] }
   0x7   :  { %v68_v23 = vld [vmem:[%s247_s3 + $0x28] sm:$0xff]  ;;  %104 = vmatpush.bf16.msra.mxu1 %v73_v16  ;;  %v72_v24 = vpack.c.bf16 %v64_v21, %v63_v19  ;;  %v138_v35 = vld [vmem:[%s245_s1] ss:$0 sm:$0xff]  ;;  %s172_s1 = smov [#allocation2]  }
   0x8   :  { %88 = vmatpush.bf16.msra.mxu0 %v75_v20  ;;  %v74_v25 = vpack.c.bf16 %v68_v23, %v67_v22  ;;  %v139_v38 = vld [vmem:[%s246_s2] ss:$0 sm:$0xff]  ;;  %s123_s15 = sshll.u32 %s172_s1, 4  ;;  %s124_s15 = int_to_ptr.vmem [resolvable:$true] %s123_s15 }
   0x9   :  { %v140_v44 = vld [vmem:[%s248_s4] ss:$0 sm:$0xff] }
   0xb   :  { %v142_v3 = vpop.eup %141  ;;  %105 = vmatpush.bf16.msra.mxu1 %v72_v24 }
   0xc   :  { %v30_v4 = vmul.f32 32.0, %v142_v3  ;;  %vm34_vm1 = vweird.f32 %v142_v3  ;;  %89 = vmatpush.bf16.msra.mxu0 %v74_v25 }
   0xe   :  { %v31_v5 = vsub.f32 1.0, %v30_v4 }
  0x10   :  { %v32_v6 = vmul.f32 %v142_v3, %v31_v5 }
  0x12   :  { %v33_v7 = vadd.f32 %v142_v3, %v32_v6 }
  0x14   :  { %v35_v8 = vsel %vm34_vm1, %v142_v3, %v33_v7 }
  0x76   :  { %v28_v9 = vpop.xlane.xlu0 %27 }
  0x77   :  { %v36_v10 = vmul.f32 %v35_v8, %v28_v9 }
  0x79   :  { %v37_v11 = vsub.f32 %v22_v0, %v36_v10 }
  0x7b   :  { %v38_v12 = vmul.f32 %v37_v11, %v37_v11 }
  0x7d   :  { %v39_v13 = vsel %vm25_vm0, %v38_v12, 0.0 }
  0x7e   :  { %40 = vadd.xlane.f32.xlu0 %v39_v13 }
  0xf1   :  { %v41_v26 = vpop.xlane.xlu0 %40 }
  0xf2   :  { %v42_v27 = vmul.f32 %v41_v26, %v35_v8 }
  0xf4   :  { %v43_v28 = vadd.f32 1e-05, %v42_v27 }
  0xf6   :  { %143 = vrsqrt.f32 %v43_v28  ;;  %vm50_vm3 = vweird.f32 %v43_v28 }
  0xfc   :  { %v144_v29 = vpop.eup %143 }
  0xfd   :  { %v45_v30 = vmul.f32 %v144_v29, %v43_v28  ;;  %vm51_vm2 = vweird.f32 %v144_v29 }
  0xfe   :  { %vm52_vm4 = vmor %vm50_vm3, %vm51_vm2 }
  0xff   :  { %v46_v31 = vmul.f32 %v144_v29, %v45_v30 }
 0x101   :  { %v47_v32 = vmul.f32 0.5, %v46_v31 }
 0x103   :  { %v48_v33 = vsub.f32 1.5, %v47_v32 }
 0x105   :  { %v49_v34 = vmul.f32 %v144_v29, %v48_v33 }
 0x107   :  { %v53_v36 = vsel %vm52_vm4, %v144_v29, %v49_v34 }
 0x108   :  { %v54_v37 = vmul.f32 %v53_v36, %v37_v11 }
 0x10a   :  { %v58_v39 = vmul.f32 %v138_v35, %v54_v37 }
 0x10c   :  { %v62_v40 = vadd.f32 %v139_v38, %v58_v39 }
 0x10e   :  { %v71_v41 = vpack.c.bf16 %v62_v40, %v62_v40 }
 0x110   :  { %135 = vmatmul.msk.bf16.vlgmr.msra.gmra.mxu1 %vm78_vm5, %v71_v41  ;;  %v77_v42 = vrot.slane %v71_v41, 1 }
 0x112   :  { %134 = vmatmul.msk.bf16.vlgmr.msra.gmra.mxu0 %vm78_vm5, %v77_v42 }
 0x18d   :  { %v107_v43 = vpop.f32.mrf.mxu1 }
 0x18f   :  { %v91_v45 = vpop.f32.mrf.mxu0 }
 0x190   :  { %v108_v46 = vadd.f32 %v107_v43, %v91_v45 }
 0x192   :  { %v115_v47 = vadd.f32 %v140_v44, %v108_v46 }
 0x194   :  { %117 = vst.msk [vmem:[#allocation2] sm:$0x3] %vm116_vm6, %v115_v47 }
 0x195   :  { %v109_v48 = vpop.f32.mrf.mxu1  ;;  %128 = dma.vmem_to_hbm [thread:$0]  %s124_s15, 32, %s126_s18, [#allocation3]  }
 0x197   :  { %v93_v49 = vpop.f32.mrf.mxu0 }
 0x198   :  { %169 = dma.done.wait [#allocation3], 32  }
 0x199   :  { %170 = vsyncadd [#allocation3], 4294967264 }
 0x19a   :  { %133 = vsyncpa [#allocation3], 1 }

// kernel: forward.13
= control target key start
LH: loop header
LB: loop body
LE: loop exit
PB: predicated region body
PF: predicated region fallthrough
CT: control target
= control target key end

     0   :  { %s1167_s25 = smov 0   ;;  %s1373_s0 = inlined_call_operand.vmem [shape: f32[4,5,32], index: 0, kind: input, shape index: {}, may-alias: {0,13}]   ;;  %s1374_s1 = inlined_call_operand.vmem [shape: f32[1,32], index: 1, kind: input, shape index: {}]   ;;  %s1375_s2 = inlined_call_operand.vmem [shape: f32[1,32], index: 2, kind: input, shape index: {}]   ;;  %s1376_s3 = inlined_call_operand.vmem [shape: f32[32,96], index: 3, kind: input, shape index: {}]   ;;  %s1377_s4 = inlined_call_operand.vmem [shape: f32[1,96], index: 4, kind: input, shape index: {}]   ;;  %s1378_s5 = inlined_call_operand.vmem [shape: f32[32,32], index: 5, kind: input, shape index: {}]   ;;  %s1379_s6 = inlined_call_operand.vmem [shape: f32[1,32], index: 6, kind: input, shape index: {}]   ;;  %s1380_s7 = inlined_call_operand.vmem [shape: f32[1,32], index: 7, kind: input, shape index: {}]   ;;  %s1381_s8 = inlined_call_operand.vmem [shape: f32[1,32], index: 8, kind: input, shape index: {}]   ;;  %s1382_s9 = inlined_call_operand.vmem [shape: f32[32,128], index: 9, kind: input, shape index: {}]   ;;  %s1383_s10 = inlined_call_operand.vmem [shape: f32[1,128], index: 10, kind: input, shape index: {}]   ;;  %s1384_s11 = inlined_call_operand.vmem [shape: f32[128,32], index: 11, kind: input, shape index: {}]   ;;  %s1385_s12 = inlined_call_operand.vmem [shape: f32[1,32], index: 12, kind: input, shape index: {}]   ;;  %s1386_s13 = inlined_call_operand.vmem [shape: f32[4,5,32], index: 13, kind: output, shape index: {}, may-alias: {0,13}]  }
   0x1 LB: > { %s1000_s26 = sadd.s32 4294967295, %s1082_s25   ;;  %p1004_p0 = scmp.ge.s32.totalorder %s1082_s25, 1  ;;  %s1082_s25 = sphi %s1167_s25, %s23_s25  }
   0x2   : > { %p386_p1 = scmp.lt.s32.totalorder %s1082_s25, 5 }
   0x4   : > { %p387_p2 = pnand %p1004_p0, %p386_p1 }
   0x5   : > { %p428_p3 = scmp.lt.s32.totalorder (!%p387_p2), %s1000_s26, 3  ;;  %s1085_s14 = smov (!%p387_p2), 88  }
   0x6   : > { %390 = sbr.rel (%p387_p2) target bundleno = 2289 (0x8f1), region = 72  ;;  %s1086_s15 = smov (!%p387_p2), 96  }
   0x7   : > { %s1087_s16 = smov (!%p387_p2), 80   ;;  %s1088_s17 = smov (!%p387_p2), 112  }
   0x8   : > { %s1089_s18 = smov (!%p387_p2), 64   ;;  %s1090_s19 = smov (!%p387_p2), 120  }
   0x9   : > { %s1091_s20 = smov (!%p387_p2), 72   ;;  %s1092_s21 = smov (!%p387_p2), 104  }
   0xa   : > { %s1094_s24 = smov (!%p387_p2), 40   ;;  %s1095_s28 = smov (!%p387_p2), 56  }
   0xb   : > { %s1388_s26 = smov (!%p428_p3, %s1000_s26), 3  ;;  %vm440_vm0 = vcmask 258048   ;;  %v1084_v2 = vmov 32.0   ;;  %v480_v14 = vld [vmem:[%s1376_s3 + $0x10] sm:$0xff]  ;;  %v481_v15 = vld [vmem:[%s1376_s3 + $0x18] sm:$0xff]  ;;  %v478_v17 = vld [vmem:[%s1376_s3] sm:$0xff] }
   0xc   : > { %s1005_s27 = sshll.u32 %s1388_s26, 3  ;;  %1052 = vrcp.f32 %v1084_v2  ;;  %v484_v16 = vpack.c.bf16 %v481_v15, %v480_v14  ;;  %v479_v18 = vld [vmem:[%s1376_s3 + $0x8] sm:$0xff]  ;;  %v1044_v29 = vld [vmem:[%s1374_s1] ss:$0 sm:$0xff]  ;;  %vm489_vm5 = vcmask 261120   ;;  %vm514_vm6 = vcmask 64512  }
   0xd   : > { %s431_s30 = scalar_lea.vmem %s1373_s0, %s1005_s27  ;;  %v483_v19 = vpack.c.bf16 %v479_v18, %v478_v17  ;;  %v1045_v32 = vld [vmem:[%s1375_s2] ss:$0 sm:$0xff]  ;;  %vm534_vm7 = vcmask 36864   ;;  %vm636_vm8 = vcmask 1043456   ;;  %vm553_vm9 = vcmask 1041408   ;;  %s1096_s29 = smov 48  }
   0xe   : > { %v1183_v0 = vld [vmem:[%s431_s30] sm:$0x1f]  ;;  %499 = vmatpush.bf16.msra.mxu0 %v484_v16  ;;  %vm554_vm10 = vcmask 1042432   ;;  %v1093_v59 = vmov 65535   ;;  %vm549_vm11 = vcmask 39936  }
   0xf   : > { %v441_v1 = vsel %vm440_vm0, %v1183_v0, 0.0  ;;  %v1046_v36 = vld [vmem:[%s1377_s4] ss:$0 sm:$0xff]  ;;  %v555_v60 = vsel %vm553_vm9, 4294967295, %v1093_v59 }
  0x10   : > { %442 = vadd.xlane.f32.xlu0 %v441_v1  ;;  %v506_v55 = vld [vmem:[%s1378_s5] sm:$0xff]  ;;  %v1236_v61 = vsel %vm554_vm10, %v555_v60, 0 }
  0x11   : > { %v574_v56 = vpack.c.bf16 %v506_v55, %v506_v55 }
  0x12   : > { %v1053_v3 = vpop.eup %1052  ;;  %500 = vmatpush.bf16.msra.mxu0 %v483_v19 }
  0x13   : > { %v445_v4 = vmul.f32 32.0, %v1053_v3  ;;  %vm449_vm1 = vweird.f32 %v1053_v3  ;;  %v657_v57 = vsel %vm636_vm8, %v574_v56, 0 }
  0x14   : > { %666 = vmatpush.bf16.msra.mxu1 %v657_v57  ;;  %v508_v57 = vld [vmem:[%s1378_s5 + $0x10] sm:$0xff] }
  0x15   : > { %v446_v5 = vsub.f32 1.0, %v445_v4 }
  0x17   : > { %v447_v6 = vmul.f32 %v1053_v3, %v446_v5 }
  0x19   : > { %v448_v7 = vadd.f32 %v1053_v3, %v447_v6 }
  0x1b   : > { %v1187_v8 = vsel %vm449_vm1, %v1053_v3, %v448_v7 }
  0x83   : > { %v443_v9 = vpop.xlane.xlu0 %442 }
  0x84   : > { %v451_v10 = vmul.f32 %v1187_v8, %v443_v9 }
  0x86   : > { %v452_v11 = vsub.f32 %v1183_v0, %v451_v10 }
  0x88   : > { %v453_v12 = vmul.f32 %v452_v11, %v452_v11 }
  0x8a   : > { %v454_v13 = vsel %vm440_vm0, %v453_v12, 0.0 }
  0x8b   : > { %455 = vadd.xlane.f32.xlu0 %v454_v13 }
  0xfe   : > { %v456_v20 = vpop.xlane.xlu0 %455 }
  0xff   : > { %v457_v21 = vmul.f32 %v456_v20, %v1187_v8 }
 0x101   : > { %v458_v22 = vadd.f32 1e-05, %v457_v21 }
 0x103   : > { %1054 = vrsqrt.f32 %v458_v22  ;;  %vm465_vm3 = vweird.f32 %v458_v22 }
 0x109   : > { %v1055_v23 = vpop.eup %1054 }
 0x10a   : > { %v460_v24 = vmul.f32 %v1055_v23, %v458_v22  ;;  %vm466_vm2 = vweird.f32 %v1055_v23 }
 0x10b   : > { %vm467_vm4 = vmor %vm465_vm3, %vm466_vm2 }
 0x10c   : > { %v461_v25 = vmul.f32 %v1055_v23, %v460_v24 }
 0x10e   : > { %v462_v26 = vmul.f32 0.5, %v461_v25 }
 0x110   : > { %v463_v27 = vsub.f32 1.5, %v462_v26 }
 0x112   : > { %v464_v28 = vmul.f32 %v1055_v23, %v463_v27 }
 0x114   : > { %v468_v30 = vsel %vm467_vm4, %v1055_v23, %v464_v28 }
 0x115   : > { %v469_v31 = vmul.f32 %v468_v30, %v452_v11 }
 0x117   : > { %v473_v33 = vmul.f32 %v1044_v29, %v469_v31 }
 0x119   : > { %v477_v34 = vadd.f32 %v1045_v32, %v473_v33 }
 0x11b   : > { %v482_v35 = vpack.c.bf16 %v477_v34, %v477_v34 }
 0x11d   : > { %1007 = vmatmul.msk.bf16.vlgmr.msra.gmra.mxu0 %vm489_vm5, %v482_v35 }
 0x19a   : > { %v502_v37 = vpop.f32.mrf.mxu0 }
 0x19b   : > { %v503_v38 = vadd.f32 %v1046_v36, %v502_v37 }
 0x19d   : > { %v1215_v39 = vpack.c.bf16 %v503_v38, %v503_v38 }
 0x19f   : > { %577 = vrot.lane.b32.xlu0 %v1215_v39, %s1085_s14  ;;  %512 = vrot.lane.b32.xlu1 %v1215_v39, %s1086_s15  ;;  %s435_s15 = scalar_lea.vmem %s1386_s13, %s1005_s27 }
 0x1a2   : > { %v504_v40 = vpop.f32.mrf.mxu0 }
 0x1a7   : > { %674 = vrot.lane.b32.xlu0 %v1215_v39, %s1087_s16 }
 0x1af   : > { %672 = vrot.lane.b32.xlu0 %v1215_v39, %s1088_s17 }
 0x211   : > { %v578_v41 = vpop.permute.xlu0 %577  ;;  %v513_v42 = vpop.permute.xlu1 %512 }
 0x212   : > { %v519_v43 = vsel %vm514_vm6, %v513_v42, 0  ;;  %v583_v44 = vsel %vm514_vm6, %v578_v41, 0 }
 0x213   : > { %528 = vmatpush.bf16.xpose.msra.mxu3 %v519_v43 }
 0x219   : > { %v675_v45 = vpop.permute.xlu0 %674 }
 0x21a   : > { %v680_v46 = vsel %vm514_vm6, %v675_v45, 0  ;;  %1008 = vmatmul.msk.bf16.vlgmr.msra.gmra.mxu3 %vm514_vm6, %v1215_v39 }
 0x21b   : > { %592 = vmatpush.bf16.xpose.msrb.mxu3 %v583_v44 }
 0x221   : > { %v673_v7 = vpop.permute.xlu0 %672 }
 0x223   : > { %689 = vmatpush.bf16.xpose.msra.mxu3 %v680_v46 }
 0x29d   : > { %v530_v47 = vpop.f32.mrf.mxu3 }
 0x29e   : > { %v535_v48 = vsel %vm534_vm7, %v530_v47, -inf }
 0x29f   : > { %536 = vmax.xlane.f32.xlu1 %v535_v48 }
 0x2a5   : > { %v532_v49 = vpop.f32.mrf.mxu3 }
 0x312   : > { %v537_v50 = vpop.xlane.xlu1 %536 }
 0x313   : > { %v538_v51 = vsub.f32 %v530_v47, %v537_v50 }
 0x315   : > { %v539_v52 = vmul.f32 1.442695, %v538_v51 }
 0x317   : > { %1056 = vpow2.f32 %v539_v52 }
 0x31d   : > { %v1057_v53 = vpop.eup %1056 }
 0x31e   : > { %v541_v54 = vsel %vm534_vm7, %v1057_v53, 0.0 }
 0x31f   : > { %542 = vadd.xlane.f32.xlu2 %v541_v54 }
 0x337   : > { %547 = vrot.lane.b32.xlu2 %v1215_v39, %s1089_s18 }
 0x33f   : > { %575 = vrot.lane.b32.xlu2 %v1215_v39, %s1090_s19 }
 0x347   : > { %752 = vrot.lane.b32.xlu2 %v1215_v39, %s1091_s20 }
 0x34f   : > { %750 = vrot.lane.b32.xlu2 %v1215_v39, %s1092_s21 }
 0x392   : > { %v543_v58 = vpop.xlane.xlu2 %542 }
 0x393   : > { %1058 = vrcp.f32 %v543_v58  ;;  %v729_v58 = vpack.c.bf16 %v508_v57, %v508_v57  ;;  %v912_v57 = vld [vmem:[%s1384_s11 + $0x50] sm:$0xff] }
 0x395   : > { %v734_v59 = vsel %vm636_vm8, %v729_v58, 0  ;;  %v913_v58 = vld [vmem:[%s1384_s11 + $0x58] sm:$0xff] }
 0x399   : > { %v1059_v62 = vpop.eup %1058 }
 0x39a   : > { %v548_v63 = vpop.permute.xlu2 %547  ;;  %v545_v1 = vmul.f32 %v1059_v62, %v1057_v53  ;;  %v507_v53 = vld [vmem:[%s1378_s5 + $0x8] sm:$0xff] }
 0x39b   : > { %v558_v2 = vand.u32 %v1236_v61, %v548_v63  ;;  %v632_v54 = vpack.c.bf16 %v507_v53, %v507_v53  ;;  %v509_v63 = vld [vmem:[%s1378_s5 + $0x18] sm:$0xff] }
 0x39c   : > { %v546_v3 = vpack.c.bf16 %v545_v1, %v545_v1  ;;  %v807_v1 = vpack.c.bf16 %v509_v63, %v509_v63  ;;  %v908_v63 = vld [vmem:[%s1384_s11 + $0x30] sm:$0xff] }
 0x39d   : > { %567 = vmatpush.bf16.msra.mxu2 %v558_v2  ;;  %v638_v55 = vsel %vm636_vm8, %v632_v54, 0  ;;  %v914_v54 = vld [vmem:[%s1384_s11 + $0x60] sm:$0xff] }
 0x39e   : > { %647 = vmatpush.bf16.msrb.mxu0 %v638_v55  ;;  %v812_v2 = vsel %vm636_vm8, %v807_v1, 0  ;;  %v915_v55 = vld [vmem:[%s1384_s11 + $0x68] sm:$0xff]  ;;  %v909_v1 = vld [vmem:[%s1384_s11 + $0x38] sm:$0xff] }
 0x3a0   : > { %1009 = vmatmul.msk.bf16.vlgmr.msra.gmra.mxu2 %vm549_vm11, %v546_v3 }
 0x3a2   : > { %v576_v4 = vpop.permute.xlu2 %575  ;;  %743 = vmatpush.bf16.msra.mxu0 %v734_v59  ;;  %v924_v59 = vpack.c.bf16 %v913_v58, %v912_v57 }
 0x3a3   : > { %1010 = vmatmul.msk.bf16.vlgmr.msrb.gmra.mxu3 %vm514_vm6, %v576_v4 }
 0x3aa   : > { %v753_v5 = vpop.permute.xlu2 %752 }
 0x3ab   : > { %v758_v6 = vsel %vm514_vm6, %v753_v5, 0 }
 0x3ac   : > { %767 = vmatpush.bf16.xpose.msrb.mxu1 %v758_v6 }
 0x3b2   : > { %v751_v15 = vpop.permute.xlu2 %750 }
 0x3b3   : > { %1014 = vmatmul.msk.bf16.vlgmr.msra.gmra.mxu3 %vm514_vm6, %v673_v7 }
 0x423   : > { %v569_v9 = vpop.f32.mrf.mxu2 }
 0x424   : > { %v573_v10 = vpack.c.bf16 %v569_v9, %v569_v9 }
 0x426   : > { %v594_v11 = vpop.f32.mrf.mxu3  ;;  %1013 = vmatmul.msk.bf16.vlgmr.msra.gmra.mxu1 %vm514_vm6, %v573_v10 }
 0x427   : > { %v598_v12 = vsel %vm534_vm7, %v594_v11, -inf }
 0x428   : > { %599 = vmax.xlane.f32.xlu1 %v598_v12 }
 0x42b   : > { %v571_v13 = vpop.f32.mrf.mxu2 }
 0x42e   : > { %v596_v14 = vpop.f32.mrf.mxu3 }
 0x436   : > { %v691_v16 = vpop.f32.mrf.mxu3  ;;  %1017 = vmatmul.msk.bf16.vlgmr.msrb.gmra.mxu1 %vm514_vm6, %v751_v15 }
 0x437   : > { %v695_v17 = vsel %vm534_vm7, %v691_v16, -inf }
 0x438   : > { %696 = vmax.xlane.f32.xlu2 %v695_v17 }
 0x43e   : > { %v693_v18 = vpop.f32.mrf.mxu3 }
 0x450   : > { %785 = vrot.lane.b32.xlu2 %v1215_v39, %s1094_s24 }
 0x49b   : > { %v600_v19 = vpop.xlane.xlu1 %599 }
 0x49c   : > { %v601_v20 = vsub.f32 %v594_v11, %v600_v19 }
 0x49e   : > { %v602_v21 = vmul.f32 1.442695, %v601_v20 }
 0x4a0   : > { %1060 = vpow2.f32 %v602_v21  ;;  %v1047_v21 = vld [vmem:[%s1379_s6] ss:$0 sm:$0xff] }
 0x4a3   : > { %v1248_v22 = vpop.f32.mrf.mxu1 }
 0x4a6   : > { %v1061_v23 = vpop.eup %1060 }
 0x4a7   : > { %v604_v24 = vsel %vm534_vm7, %v1061_v23, 0.0 }
 0x4a8   : > { %605 = vadd.xlane.f32.xlu1 %v604_v24 }
 0x4ab   : > { %v670_v25 = vpop.f32.mrf.mxu1  ;;  %v697_v26 = vpop.xlane.xlu2 %696 }
 0x4ac   : > { %v698_v27 = vsub.f32 %v691_v16, %v697_v26 }
 0x4ae   : > { %v699_v28 = vmul.f32 1.442695, %v698_v27 }
 0x4b0   : > { %1062 = vpow2.f32 %v699_v28 }
 0x4b3   : > { %v769_v29 = vpop.f32.mrf.mxu1  ;;  %v786_v30 = vpop.permute.xlu2 %785 }
 0x4b4   : > { %v791_v31 = vand.u32 %v786_v30, %v1236_v61  ;;  %v773_v32 = vsel %vm534_vm7, %v769_v29, -inf }
 0x4b5   : > { %774 = vmax.xlane.f32.xlu0 %v773_v32 }
 0x4b6   : > { %800 = vmatpush.bf16.msrb.mxu3 %v791_v31  ;;  %v1063_v33 = vpop.eup %1062  ;;  %v869_v31 = vld [vmem:[%s1382_s9 + $0x18] sm:$0xff] }
 0x4b7   : > { %v701_v35 = vsel %vm534_vm7, %v1063_v33, 0.0 }
 0x4bb   : > { %v771_v34 = vpop.f32.mrf.mxu1 }
 0x4bc   : > { %v867_v34 = vld [vmem:[%s1382_s9 + $0x8] sm:$0xff] }
 0x4bd   : > { %702 = vadd.xlane.f32.xlu0 %v701_v35 }
 0x4c1   : > { %610 = vrot.lane.b32.xlu1 %v1215_v39, %s1095_s28 }
 0x4d1   : > { %707 = vrot.lane.b32.xlu0 %v1215_v39, %s1096_s29 }
 0x51b   : > { %v606_v36 = vpop.xlane.xlu1 %605 }
 0x51c   : > { %1064 = vrcp.f32 %v606_v36  ;;  %v916_v36 = vld [vmem:[%s1384_s11 + $0x70] sm:$0xff] }
 0x522   : > { %v1065_v41 = vpop.eup %1064 }
 0x523   : > { %v608_v43 = vmul.f32 %v1065_v41, %v1061_v23 }
 0x525   : > { %v609_v48 = vpack.c.bf16 %v608_v43, %v608_v43 }
 0x528   : > { %v775_v37 = vpop.xlane.xlu0 %774 }
 0x529   : > { %v776_v38 = vsub.f32 %v769_v29, %v775_v37  ;;  %v917_v37 = vld [vmem:[%s1384_s11 + $0x78] sm:$0xff] }
 0x52b   : > { %v777_v40 = vmul.f32 1.442695, %v776_v38 }
 0x52d   : > { %1066 = vpow2.f32 %v777_v40  ;;  %v926_v40 = vpack.c.bf16 %v917_v37, %v916_v36 }
 0x52f   : > { %927 = vmatpush.bf16.msra.mxu1 %v926_v40 }
 0x530   : > { %v703_v47 = vpop.xlane.xlu0 %702 }
 0x531   : > { %1068 = vrcp.f32 %v703_v47 }
 0x533   : > { %v1067_v42 = vpop.eup %1066  ;;  %v611_v44 = vpop.permute.xlu1 %610 }
 0x534   : > { %v616_v45 = vand.u32 %v611_v44, %v1236_v61  ;;  %v779_v46 = vsel %vm534_vm7, %v1067_v42, 0.0 }
 0x535   : > { %780 = vadd.xlane.f32.xlu1 %v779_v46 }
 0x536   : > { %625 = vmatpush.bf16.msrb.mxu2 %v616_v45 }
 0x537   : > { %v1069_v39 = vpop.eup %1068 }
 0x538   : > { %v705_v49 = vmul.f32 %v1069_v39, %v1063_v33  ;;  %v866_v33 = vld [vmem:[%s1382_s9] sm:$0xff] }
 0x539   : > { %1011 = vmatmul.msk.bf16.vlgmr.msrb.gmra.mxu2 %vm549_vm11, %v609_v48  ;;  %v871_v35 = vpack.c.bf16 %v867_v34, %v866_v33  ;;  %v1048_v39 = vld [vmem:[%s1380_s7] ss:$0 sm:$0xff] }
 0x53a   : > { %v706_v52 = vpack.c.bf16 %v705_v49, %v705_v49 }
 0x543   : > { %v708_v50 = vpop.permute.xlu0 %707 }
 0x544   : > { %v713_v51 = vand.u32 %v708_v50, %v1236_v61 }
 0x546   : > { %722 = vmatpush.bf16.msra.mxu2 %v713_v51 }
 0x549   : > { %1015 = vmatmul.msk.bf16.vlgmr.msra.gmra.mxu2 %vm549_vm11, %v706_v52 }
 0x54a   : > { %821 = vmatpush.bf16.msrb.mxu2 %v812_v2  ;;  %v922_v2 = vpack.c.bf16 %v909_v1, %v908_v63 }
 0x5a8   : > { %v781_v56 = vpop.xlane.xlu1 %780 }
 0x5a9   : > { %1070 = vrcp.f32 %v781_v56  ;;  %v925_v56 = vpack.c.bf16 %v915_v55, %v914_v54 }
 0x5ab   : > { %928 = vmatpush.bf16.msra.mxu1 %v925_v56 }
 0x5af   : > { %v1071_v60 = vpop.eup %1070  ;;  %929 = vmatpush.bf16.msra.mxu1 %v924_v59 }
 0x5b0   : > { %v783_v61 = vmul.f32 %v1071_v60, %v1067_v42  ;;  %v910_v60 = vld [vmem:[%s1384_s11 + $0x40] sm:$0xff] }
 0x5b2   : > { %v784_v62 = vpack.c.bf16 %v783_v61, %v783_v61  ;;  %v911_v61 = vld [vmem:[%s1384_s11 + $0x48] sm:$0xff] }
 0x5b4   : > { %1018 = vmatmul.msk.bf16.vlgmr.msrb.gmra.mxu3 %vm549_vm11, %v784_v62  ;;  %v923_v62 = vpack.c.bf16 %v911_v61, %v910_v60 }
 0x5b6   : > { %930 = vmatpush.bf16.msra.mxu1 %v923_v62 }
 0x5ba   : > { %931 = vmatpush.bf16.msra.mxu1 %v922_v2 }
 0x5bc   : > { %v627_v3 = vpop.f32.mrf.mxu2 }
 0x5bd   : > { %v631_v4 = vpack.c.bf16 %v627_v3, %v627_v3  ;;  %v906_v3 = vld [vmem:[%s1384_s11 + $0x20] sm:$0xff] }
 0x5bf   : > { %1012 = vmatmul.msk.bf16.vlgmr.msrb.gmra.mxu0 %vm514_vm6, %v631_v4  ;;  %v907_v4 = vld [vmem:[%s1384_s11 + $0x28] sm:$0xff] }
 0x5c4   : > { %v629_v5 = vpop.f32.mrf.mxu2 }
 0x5c5   : > { %v921_v5 = vpack.c.bf16 %v907_v4, %v906_v3 }
 0x5c7   : > { %932 = vmatpush.bf16.msra.mxu1 %v921_v5 }
 0x5cc   : > { %v724_v6 = vpop.f32.mrf.mxu2 }
 0x5cd   : > { %v728_v7 = vpack.c.bf16 %v724_v6, %v724_v6  ;;  %v904_v6 = vld [vmem:[%s1384_s11 + $0x10] sm:$0xff] }
 0x5cf   : > { %1016 = vmatmul.msk.bf16.vlgmr.msra.gmra.mxu0 %vm514_vm6, %v728_v7  ;;  %v905_v7 = vld [vmem:[%s1384_s11 + $0x18] sm:$0xff] }
 0x5d4   : > { %v726_v9 = vpop.f32.mrf.mxu2 }
 0x5d5   : > { %v920_v9 = vpack.c.bf16 %v905_v7, %v904_v6 }
 0x5d7   : > { %933 = vmatpush.bf16.msra.mxu1 %v920_v9 }
 0x637   : > { %v802_v10 = vpop.f32.mrf.mxu3 }
 0x638   : > { %v806_v11 = vpack.c.bf16 %v802_v10, %v802_v10  ;;  %v902_v10 = vld [vmem:[%s1384_s11] sm:$0xff] }
 0x63a   : > { %1019 = vmatmul.msk.bf16.vlgmr.msrb.gmra.mxu2 %vm514_vm6, %v806_v11  ;;  %v903_v11 = vld [vmem:[%s1384_s11 + $0x8] sm:$0xff] }
 0x63c   : > { %v649_v12 = vpop.f32.mrf.mxu0 }
 0x63d   : > { %v669_v15 = vadd.f32 %v1248_v22, %v649_v12  ;;  %v919_v12 = vpack.c.bf16 %v903_v11, %v902_v10 }
 0x63f   : > { %v804_v13 = vpop.f32.mrf.mxu3  ;;  %934 = vmatpush.bf16.msra.mxu1 %v919_v12 }
 0x640   : > { %v1050_v13 = vld [vmem:[%s1383_s10] ss:$0 sm:$0xff] }
 0x644   : > { %v651_v14 = vpop.f32.mrf.mxu0 }
 0x64c   : > { %v745_v16 = vpop.f32.mrf.mxu0 }
 0x64d   : > { %v749_v17 = vadd.f32 %v745_v16, %v669_v15 }
 0x654   : > { %v747_v18 = vpop.f32.mrf.mxu0 }
 0x6bd   : > { %v823_v19 = vpop.f32.mrf.mxu2 }
 0x6be   : > { %v827_v20 = vadd.f32 %v823_v19, %v749_v17 }
 0x6c0   : > { %v828_v23 = vadd.f32 %v827_v20, %v1183_v0  ;;  %v868_v0 = vld [vmem:[%s1382_s9 + $0x10] sm:$0xff] }
 0x6c1   : > { %v872_v32 = vpack.c.bf16 %v869_v31, %v868_v0 }
 0x6c2   : > { %v1282_v24 = vadd.f32 %v1047_v21, %v828_v23 }
 0x6c3   : > { %886 = vmatpush.bf16.msrb.mxu0 %v872_v32 }
 0x6c4   : > { %v836_v25 = vsel %vm440_vm0, %v1282_v24, 0.0 }
 0x6c5   : > { %837 = vadd.xlane.f32.xlu2 %v836_v25  ;;  %v825_v26 = vpop.f32.mrf.mxu2 }
 0x6c7   : > { %887 = vmatpush.bf16.msrb.mxu0 %v871_v35 }
 0x738   : > { %v838_v27 = vpop.xlane.xlu2 %837 }
 0x739   : > { %v839_v22 = vmul.f32 %v838_v27, %v1187_v8 }
 0x73b   : > { %v840_v28 = vsub.f32 %v1282_v24, %v839_v22 }
 0x73d   : > { %v841_v29 = vmul.f32 %v840_v28, %v840_v28 }
 0x73f   : > { %v842_v30 = vsel %vm440_vm0, %v841_v29, 0.0 }
 0x740   : > { %843 = vadd.xlane.f32.xlu0 %v842_v30 }
 0x7b3   : > { %v844_v38 = vpop.xlane.xlu0 %843 }
 0x7b4   : > { %v845_v41 = vmul.f32 %v844_v38, %v1187_v8  ;;  %v1049_v8 = vld [vmem:[%s1381_s8] ss:$0 sm:$0xff] }
 0x7b6   : > { %v846_v42 = vadd.f32 1e-05, %v845_v41 }
 0x7b8   : > { %1072 = vrsqrt.f32 %v846_v42  ;;  %vm853_vm13 = vweird.f32 %v846_v42 }
 0x7be   : > { %v1073_v43 = vpop.eup %1072 }
 0x7bf   : > { %v848_v44 = vmul.f32 %v1073_v43, %v846_v42  ;;  %vm854_vm12 = vweird.f32 %v1073_v43 }
 0x7c0   : > { %vm855_vm14 = vmor %vm853_vm13, %vm854_vm12 }
 0x7c1   : > { %v849_v45 = vmul.f32 %v1073_v43, %v848_v44 }
 0x7c3   : > { %v850_v46 = vmul.f32 0.5, %v849_v45 }
 0x7c5   : > { %v851_v47 = vsub.f32 1.5, %v850_v46 }
 0x7c7   : > { %v852_v48 = vmul.f32 %v1073_v43, %v851_v47 }
 0x7c9   : > { %v856_v49 = vsel %vm855_vm14, %v1073_v43, %v852_v48 }
 0x7ca   : > { %v857_v50 = vmul.f32 %v856_v49, %v840_v28  ;;  %v1051_v28 = vld [vmem:[%s1385_s12] ss:$0 sm:$0xff] }
 0x7cc   : > { %v861_v51 = vmul.f32 %v1048_v39, %v857_v50 }
 0x7ce   : > { %v865_v52 = vadd.f32 %v1049_v8, %v861_v51 }
 0x7d0   : > { %v870_v53 = vpack.c.bf16 %v865_v52, %v865_v52 }
 0x7d2   : > { %1020 = vmatmul.msk.bf16.vlgmr.msrb.gmra.mxu0 %vm489_vm5, %v870_v53 }
 0x84f   : > { %v889_v14 = vpop.f32.mrf.mxu0 }
 0x850   : > { %v890_v15 = vadd.f32 %v1050_v13, %v889_v14 }
 0x852   : > { %v893_v16 = vmul.f32 %v890_v15, %v890_v15 }
 0x854   : > { %v894_v17 = vmul.f32 %v893_v16, %v890_v15 }
 0x856   : > { %v895_v18 = vmul.f32 0.044715, %v894_v17 }
 0x857   : > { %v891_v19 = vpop.f32.mrf.mxu0 }
 0x858   : > { %v896_v20 = vadd.f32 %v895_v18, %v890_v15 }
 0x85a   : > { %v897_v21 = vmul.f32 0.7978846, %v896_v20 }
 0x85c   : > { %1074 = vtanh.f32 %v897_v21 }
 0x862   : > { %v1075_v23 = vpop.eup %1074 }
 0x863   : > { %v899_v25 = vadd.f32 1.0, %v1075_v23 }
 0x865   : > { %v900_v26 = vmul.f32 0.5, %v899_v25 }
 0x867   : > { %v901_v27 = vmul.f32 %v900_v26, %v890_v15 }
 0x869   : > { %v918_v22 = vpack.c.bf16 %v901_v27, %v901_v27 }
 0x86b   : > { %935 = vmatmul.bf16.vlgmr.msra.gmra.mxu1 %v918_v22 }
 0x8e8   : > { %v936_v29 = vpop.f32.mrf.mxu1 }
 0x8e9   : > { %v940_v30 = vadd.f32 %v936_v29, %v1282_v24 }
 0x8eb   : > { %v945_v0 = vadd.f32 %v1051_v28, %v940_v30 }
 0x8ed   : > { %946 = vst.msk [vmem:[%s435_s15] sm:$0x1f] %vm440_vm0, %v945_v0 }
 0x8f0   : > { %v938_v31 = vpop.f32.mrf.mxu1 }
 0x8f1 PF: > { %s23_s25 = sadd.s32 1, %s1082_s25  }
 0x8f2   : > { %p20_p4 = scmp.ge.s32.totalorder %s23_s25, 6  }
 0x8f4   :  { %22 = sbr.rel (!%p20_p4) target bundleno = 1 (0x1), region = 102 }

</bundles_post_ra>
